<compile_context>
chip_gen: v7x
topology: tpu7x:2x2x1
jax: 0.10.0
libtpu: 0.0.40
codegen_flags: <defaults>
</compile_context>

<pallas_src>
import functools

import jax
import jax.numpy as jnp
from jax.experimental import pallas as pl
from jax.experimental.pallas import tpu as pltpu


def _round_up(x, m):
    return ((x + m - 1) // m) * m


def _vmem_limit_bytes():
    """Per-generation VMEM budget: v7x has 64 MiB/TC, v5e/v6e have 128 MiB."""
    kind = ""
    try:
        kind = jax.devices()[0].device_kind.lower()
    except Exception:
        pass
    if "v7" in kind or "tpu7" in kind:
        return 48 * 1024 * 1024
    return 96 * 1024 * 1024


def _layer_vmem_bytes(tc, bp, e_in, hp):
    """Rough per-direction working-set estimate for the GRU layer kernel."""
    f = 4
    x_blk = 2 * tc * bp * e_in * f            # double-buffered input block
    out_blk = 2 * tc * bp * hp * f            # double-buffered output block
    gi = tc * bp * 3 * hp * f                 # hoisted projection scratch
    o_scr = tc * bp * hp * f                  # chunk output scratch
    w = 2 * (e_in * 3 * hp + hp * 3 * hp + 4 * hp + bp * hp) * f
    return x_blk + out_blk + gi + o_scr + w + (1 << 20)


def _choose_time_chunk(T, bp, e_in_list, hp, budget_bytes, max_steps=128):
    """Largest divisor Tc of T whose working set fits the VMEM budget."""
    best = 1
    for tc in range(1, min(T, max_steps) + 1):
        if T % tc:
            continue
        need = max(_layer_vmem_bytes(tc, bp, e, hp) for e in e_in_list)
        if need <= budget_bytes:
            best = tc
    return best


# ----------------------------------------------------------------------------
# Bidirectional GRU layer kernel.
# Grid = (direction, time_chunk): direction 0 = forward, 1 = backward (axis is
# "parallel" -> one direction per TensorCore on v7x).  Time reversal for the
# backward direction is done with index arithmetic only (no selects, no HBM
# copies).  Masking reproduces pack_padded_sequence semantics: padded steps
# neither advance the hidden state nor emit a non-zero output.
# ----------------------------------------------------------------------------
def _bigru_kernel(x_ref, len_ref, wih_ref, whh_ref, bgi_ref, bhn_ref, h0_ref,
                  out_ref, hT_ref, h_scr, gi_scr, o_scr,
                  *, hidden_pad, t_chunk, batch_pad):
    Hp, Tc, Bp = hidden_pad, t_chunk, batch_pad
    d = pl.program_id(0)              # 0 = forward, 1 = backward
    c = pl.program_id(1)              # chunk counter (processing order)
    C = pl.num_programs(1)
    tb = d * (C - 1) + (1 - 2 * d) * c        # sequence chunk handled here
    chunk_base = tb * Tc

    @pl.when(c == 0)
    def _():
        h_scr[...] = h0_ref[...].astype(jnp.float32)

    # Hoisted input projection for the whole chunk: one MXU matmul.  b_ih and
    # the r/z parts of b_hh are already folded into bgi.
    gi_scr[...] = (jnp.dot(x_ref[...], wih_ref[...],
                           preferred_element_type=jnp.float32) + bgi_ref[...])

    w_hh = whh_ref[...]                                     # (Hp, 3Hp)
    b_hn = jnp.broadcast_to(bhn_ref[...], (Bp, Hp))         # hoisted broadcast
    lens = jnp.broadcast_to(len_ref[...], (Bp, Hp))         # hoisted broadcast

    def step(i, h_prev):
        # forward: li = i ; backward: li = Tc-1-i  (branch-free).
        li = d * (Tc - 1) + (1 - 2 * d) * i
        row0 = pl.multiple_of(li * Bp, 8)                   # sublane-aligned
        gi_t = gi_scr[pl.ds(row0, Bp), :]                   # (Bp, 3Hp)
        gh = jnp.dot(h_prev, w_hh, preferred_element_type=jnp.float32)
        r = jax.nn.sigmoid(gi_t[:, 0:Hp] + gh[:, 0:Hp])
        z = jax.nn.sigmoid(gi_t[:, Hp:2 * Hp] + gh[:, Hp:2 * Hp])
        n = jnp.tanh(gi_t[:, 2 * Hp:3 * Hp] + r * (gh[:, 2 * Hp:3 * Hp] + b_hn))
        h_new = (1.0 - z) * n + z * h_prev
        keep = (chunk_base + li) < lens                     # (Bp, Hp) bool
        h_next = jnp.where(keep, h_new, h_prev)
        o_scr[li] = jnp.where(keep, h_new, 0.0)             # VMEM chunk buffer
        return h_next

    unroll = True if Tc <= 32 else 8
    h_final = jax.lax.fori_loop(0, Tc, step, h_scr[...], unroll=unroll)
    h_scr[...] = h_final

    # One lane-dense store per chunk (replaces Tc masked per-step stores).
    out_ref[...] = o_scr[...].astype(out_ref.dtype)

    @pl.when(c == C - 1)
    def _():
        hT_ref[...] = h_final.astype(hT_ref.dtype)


def bigru_layer(x_rows, lengths2d, w_ih, w_hh, b_gi, b_hn, h0_pair,
                *, T, Bp, Hp, Tc, vmem_limit):
    """One bidirectional GRU layer.

    x_rows : (T*Bp, E_in) time-major flattened input rows (row = t*Bp + b).
    Returns out (T, Bp, 2*Hp)  [cols 0:Hp forward, Hp:2Hp backward]
    and hT (2, Bp, Hp).
    """
    E_in = x_rows.shape[1]
    C = T // Tc

    def tb(d, c):
        return d * (C - 1) + (1 - 2 * d) * c

    kernel = functools.partial(_bigru_kernel, hidden_pad=Hp, t_chunk=Tc,
                               batch_pad=Bp)
    out, hT = pl.pallas_call(
        kernel,
        out_shape=(jax.ShapeDtypeStruct((T, Bp, 2 * Hp), jnp.float32),
                   jax.ShapeDtypeStruct((2, Bp, Hp), jnp.float32)),
        grid_spec=pltpu.PrefetchScalarGridSpec(
            num_scalar_prefetch=0,
            grid=(2, C),
            in_specs=[
                pl.BlockSpec((Tc * Bp, E_in), lambda d, c: (tb(d, c), 0)),
                pl.BlockSpec((Bp, 1), lambda d, c: (0, 0)),
                pl.BlockSpec((None, E_in, 3 * Hp), lambda d, c: (d, 0, 0)),
                pl.BlockSpec((None, Hp, 3 * Hp), lambda d, c: (d, 0, 0)),
                pl.BlockSpec((None, 1, 3 * Hp), lambda d, c: (d, 0, 0)),
                pl.BlockSpec((None, 1, Hp), lambda d, c: (d, 0, 0)),
                pl.BlockSpec((None, Bp, Hp), lambda d, c: (d, 0, 0)),
            ],
            out_specs=[
                pl.BlockSpec((Tc, Bp, Hp), lambda d, c: (tb(d, c), 0, d)),
                pl.BlockSpec((None, Bp, Hp), lambda d, c: (d, 0, 0)),
            ],
            scratch_shapes=[
                pltpu.VMEM((Bp, Hp), jnp.float32),          # carried h
                pltpu.VMEM((Tc * Bp, 3 * Hp), jnp.float32), # hoisted gi
                pltpu.VMEM((Tc, Bp, Hp), jnp.float32),      # chunk output
            ]),
        compiler_params=pltpu.CompilerParams(
            dimension_semantics=("parallel", "arbitrary"),
            vmem_limit_bytes=vmem_limit),
    )(x_rows, lengths2d, w_ih, w_hh, b_gi, b_hn, h0_pair)
    return out, hT


# ----------------------------------------------------------------------------
# Decoder: y = x @ W^T + b.  Vocab axis is the OUTER grid axis so the (K, vt)
# weight tile stays resident in VMEM across row tiles (weight read once).
# ----------------------------------------------------------------------------
def _linear_kernel(x_ref, w_ref, b_ref, o_ref):
    o_ref[...] = (jnp.dot(x_ref[...], w_ref[...],
                          preferred_element_type=jnp.float32)
                  + b_ref[...]).astype(o_ref.dtype)


def linear_padded(x, w_t, b_row, *, vmem_limit):
    """x: (N, K) f32; w_t: (K, Vp) pre-transposed, Vp % 128 == 0; b_row: (1, Vp)."""
    N, K = x.shape
    Vp = w_t.shape[1]
    budget = int(0.6 * vmem_limit)

    nt = _round_up(N, 8) if N <= 512 else 256
    Np = _round_up(N, nt)
    if Np != N:
        x = jnp.pad(x, ((0, Np - N), (0, 0)))

    vt = 128
    for cand in range(min(Vp, 2048), 127, -128):
        if Vp % cand == 0 and 4 * (2 * (nt * K + K * cand + nt * cand)
                                   + 2 * cand) <= budget:
            vt = cand
            break

    out = pl.pallas_call(
        _linear_kernel,
        out_shape=jax.ShapeDtypeStruct((Np, Vp), jnp.float32),
        grid=(Vp // vt, Np // nt),                     # vocab outer, rows inner
        in_specs=[pl.BlockSpec((nt, K), lambda j, i: (i, 0)),
                  pl.BlockSpec((K, vt), lambda j, i: (0, j)),
                  pl.BlockSpec((1, vt), lambda j, i: (0, j))],
        out_specs=pl.BlockSpec((nt, vt), lambda j, i: (i, j)),
        compiler_params=pltpu.CompilerParams(
            dimension_semantics=("parallel", "arbitrary"),
            vmem_limit_bytes=vmem_limit),
    )(x, w_t, b_row)
    return out[:N]


# ----------------------------------------------------------------------------
# RelationModel forward (eval mode)
# ----------------------------------------------------------------------------
def relation_model_forward(params, inputs, lengths, hs, *, hidden_dim,
                           num_layers, vocab_size):
    """inputs: (B, T) int32 token ids; lengths: (B,) int32 (sorted descending).

    Returns (logits (B*T, vocab), hs (num_layers*2, B, H)), matching the
    PyTorch module's forward in eval mode.
    """
    B, T = inputs.shape
    H = hidden_dim
    Hp = params["gru"][0]["w_hh"].shape[1]            # lane-padded hidden size
    Bp = _round_up(B, 8)
    E = params["embedding"].shape[1]

    # Embedding lookup directly in time-major order (avoids a (B,T,E) relayout).
    emb = jnp.take(params["embedding"], jnp.transpose(inputs).astype(jnp.int32),
                   axis=0)                                          # (T, B, E)
    emb = jnp.pad(emb, ((0, 0), (0, Bp - B), (0, 0))).astype(jnp.float32)
    x_rows = emb.reshape(T * Bp, E)

    lens_p = jnp.pad(lengths.astype(jnp.int32), (0, Bp - B)).reshape(Bp, 1)

    if hs is None:
        hs = jnp.zeros((num_layers * 2, B, H), jnp.float32)

    vmem_limit = _vmem_limit_bytes()
    Tc = _choose_time_chunk(T, Bp, (E, 2 * Hp), Hp, int(0.7 * vmem_limit))

    hs_out = []
    out = None
    for layer in range(num_layers):
        lp = params["gru"][layer]
        h0 = jnp.pad(hs[2 * layer: 2 * layer + 2].astype(jnp.float32),
                     ((0, 0), (0, Bp - B), (0, Hp - H)))
        out, hT = bigru_layer(x_rows, lens_p, lp["w_ih"], lp["w_hh"],
                              lp["b_gi"], lp["b_hn"], h0,
                              T=T, Bp=Bp, Hp=Hp, Tc=Tc, vmem_limit=vmem_limit)
        hs_out.append(hT[:, :B, :H])
        # (T, Bp, 2Hp) already holds [fwd | bwd]; free reshape, no XLA concat.
        x_rows = out.reshape(T * Bp, 2 * Hp)
        # TODO(synk): inter-layer dropout (p=0.5) only applies in training
        # mode; this implements eval-mode semantics.

    hs_new = jnp.concatenate(hs_out, axis=0)                      # (2L, B, H)

    # Batch-major rows (b*T + t) for the decoder, matching torch's
    # pad_packed(..., batch_first=True) -> decoder -> reshape(B*T, -1).
    seq = jnp.transpose(out[:, :B, :], (1, 0, 2)).reshape(B * T, 2 * Hp)
    logits = linear_padded(seq, params["decoder_wT"], params["decoder_b"],
                           vmem_limit=vmem_limit)
    return logits[:, :vocab_size], hs_new


# ----------------------------------------------------------------------------
# Deterministic parameter init: same parameterization as the PyTorch module,
# stored pre-transposed / pre-stacked / lane-padded for the kernels.
# ----------------------------------------------------------------------------
def init_params(key, hidden_dim, embed_dim, vocab_size, num_layers=2):
    H = hidden_dim
    Hp = _round_up(H, 128)
    bound = 1.0 / (H ** 0.5)

    def uni(k, shape):
        return jax.random.uniform(k, shape, jnp.float32, -bound, bound)

    n_keys = 3 + num_layers * 2 * 4
    keys = iter(jax.random.split(key, n_keys))

    params = {
        "embedding": jax.random.normal(next(keys), (vocab_size, embed_dim),
                                       jnp.float32),
        "gru": [],
    }

    # Decoder weight (V, 2H) -> pre-transposed, lane-padded (2Hp, Vp) with the
    # forward features at rows [0:H] and backward features at rows [Hp:Hp+H].
    Vp = _round_up(vocab_size, 128)
    dec_w = uni(next(keys), (vocab_size, 2 * H))
    dec_b = uni(next(keys), (vocab_size,))
    dec_wT = jnp.zeros((2 * Hp, Vp), jnp.float32)
    dec_wT = dec_wT.at[0:H, 0:vocab_size].set(dec_w[:, 0:H].T)
    dec_wT = dec_wT.at[Hp:Hp + H, 0:vocab_size].set(dec_w[:, H:2 * H].T)
    params["decoder_wT"] = dec_wT
    params["decoder_b"] = jnp.zeros((1, Vp), jnp.float32
                                    ).at[0, :vocab_size].set(dec_b)

    for layer in range(num_layers):
        in_real = embed_dim if layer == 0 else 2 * H
        in_pad = embed_dim if layer == 0 else 2 * Hp
        # Placement of real input rows into the lane-padded input feature axis.
        if layer == 0:
            row_map = [(0, 0, in_real)]
        else:
            row_map = [(0, 0, H), (Hp, H, H)]
        w_ih_l, w_hh_l, b_gi_l, b_hn_l = [], [], [], []
        for _ in range(2):                              # fwd, bwd
            w_ih = uni(next(keys), (3 * H, in_real))    # torch layout
            w_hh = uni(next(keys), (3 * H, H))
            b_ih = uni(next(keys), (3 * H,))
            b_hh = uni(next(keys), (3 * H,))

            wih_p = jnp.zeros((in_pad, 3 * Hp), jnp.float32)
            whh_p = jnp.zeros((Hp, 3 * Hp), jnp.float32)
            bgi_p = jnp.zeros((1, 3 * Hp), jnp.float32)
            bhn_p = jnp.zeros((1, Hp), jnp.float32)
            for g in range(3):                          # gates r, z, n
                wg = w_ih[g * H:(g + 1) * H, :].T       # (in_real, H)
                for dst, src, n in row_map:
                    wih_p = wih_p.at[dst:dst + n,
                                     g * Hp:g * Hp + H].set(wg[src:src + n])
                whh_p = whh_p.at[0:H, g * Hp:g * Hp + H].set(
                    w_hh[g * H:(g + 1) * H, :].T)
                bg = b_ih[g * H:(g + 1) * H]
                if g < 2:                               # fold b_hr / b_hz
                    bg = bg + b_hh[g * H:(g + 1) * H]
                bgi_p = bgi_p.at[0, g * Hp:g * Hp + H].set(bg)
            bhn_p = bhn_p.at[0, 0:H].set(b_hh[2 * H:3 * H])
            w_ih_l.append(wih_p)
            w_hh_l.append(whh_p)
            b_gi_l.append(bgi_p)
            b_hn_l.append(bhn_p)
        params["gru"].append({
            "w_ih": jnp.stack(w_ih_l, 0),    # (2, in_pad, 3Hp)
            "w_hh": jnp.stack(w_hh_l, 0),    # (2, Hp, 3Hp)
            "b_gi": jnp.stack(b_gi_l, 0),    # (2, 1, 3Hp)
            "b_hn": jnp.stack(b_hn_l, 0),    # (2, 1, Hp)
        })
    return params


if __name__ == "__main__":
    # Small shapes consistent with the module's forward.
    B, T = 4, 8
    hidden_dim, embed_dim, vocab_size, num_layers = 32, 16, 50, 2

    key = jax.random.PRNGKey(0)
    k_param, k_tok = jax.random.split(key)

    params = init_params(k_param, hidden_dim, embed_dim, vocab_size, num_layers)
    inputs = jax.random.randint(k_tok, (B, T), 0, vocab_size, jnp.int32)
    lengths = jnp.array([8, 6, 5, 3], dtype=jnp.int32)   # sorted descending
    hs0 = None                                           # -> zeros, as in torch

    fwd = jax.jit(functools.partial(relation_model_forward,
                                    hidden_dim=hidden_dim,
                                    num_layers=num_layers,
                                    vocab_size=vocab_size))
    logits, hs_out = fwd(params, inputs, lengths, hs0)
    jax.block_until_ready(logits)
    jax.block_until_ready(hs_out)

    assert logits.shape == (B * T, vocab_size), logits.shape
    assert hs_out.shape == (num_layers * 2, B, hidden_dim), hs_out.shape
    print("KERNEL_OK")
</pallas_src>

<mosaic_0001>
module attributes {stable_mosaic.version = 11 : i64} {
  func.func @_bigru_kernel(%arg0: i32, %arg1: i32, %arg2: memref<64x16xf32, #tpu.memory_space<vmem>>, %arg3: memref<8x1xi32, #tpu.memory_space<vmem>>, %arg4: memref<1x16x384xf32, #tpu.memory_space<vmem>>, %arg5: memref<1x128x384xf32, #tpu.memory_space<vmem>>, %arg6: memref<1x1x384xf32, #tpu.memory_space<vmem>>, %arg7: memref<1x1x128xf32, #tpu.memory_space<vmem>>, %arg8: memref<1x8x128xf32, #tpu.memory_space<vmem>>, %arg9: memref<8x8x128xf32, #tpu.memory_space<vmem>>, %arg10: memref<1x8x128xf32, #tpu.memory_space<vmem>>, %arg11: memref<8x128xf32, #tpu.memory_space<vmem>>, %arg12: memref<64x384xf32, #tpu.memory_space<vmem>>, %arg13: memref<8x8x128xf32, #tpu.memory_space<vmem>>) attributes {dimension_semantics = [#tpu.dimension_semantics<parallel>, #tpu.dimension_semantics<arbitrary>], iteration_bounds = array<i64: 2, 1>, scalar_prefetch = 0 : i64, scratch_operands = 3 : i64, tpu.core_type = #tpu.core_type<tc>, window_params = [{transform_indices = @transform_0, window_bounds = array<i64: 64, 16>}, {pipeline_mode = #tpu.pipeline_mode<synchronous>, transform_indices = @transform_1, window_bounds = array<i64: 8, 1>}, {transform_indices = @transform_2, window_bounds = array<i64: 1, 16, 384>}, {transform_indices = @transform_3, window_bounds = array<i64: 1, 128, 384>}, {transform_indices = @transform_4, window_bounds = array<i64: 1, 1, 384>}, {transform_indices = @transform_5, window_bounds = array<i64: 1, 1, 128>}, {transform_indices = @transform_6, window_bounds = array<i64: 1, 8, 128>}, {transform_indices = @transform_7, window_bounds = array<i64: 8, 8, 128>}, {transform_indices = @transform_8, window_bounds = array<i64: 1, 8, 128>}]} {
    %c0_i32 = arith.constant 0 : i32
    %0 = arith.muli %arg0, %c0_i32 : i32
    %c2_i32 = arith.constant 2 : i32
    %1 = arith.muli %c2_i32, %arg0 : i32
    %c1_i32 = arith.constant 1 : i32
    %2 = arith.subi %c1_i32, %1 : i32
    %3 = arith.muli %2, %arg1 : i32
    %4 = arith.addi %0, %3 : i32
    %c8_i32 = arith.constant 8 : i32
    %5 = arith.muli %4, %c8_i32 : i32
    %c0_i32_0 = arith.constant 0 : i32
    %6 = arith.cmpi eq, %arg1, %c0_i32_0 : i32
    %7 = arith.extui %6 : i1 to i32
    %c0_i32_1 = arith.constant 0 : i32
    %8 = arith.cmpi ne, %7, %c0_i32_1 : i32
    scf.if %8 {
      %c0_131 = arith.constant 0 : index
      %c0_132 = arith.constant 0 : index
      %c0_133 = arith.constant 0 : index
      %410 = vector.load %arg8[%c0_131, %c0_132, %c0_133] : memref<1x8x128xf32, #tpu.memory_space<vmem>>, vector<1x8x128xf32>
      %411 = vector.shape_cast %410 : vector<1x8x128xf32> to vector<8x128xf32>
      %c0_134 = arith.constant 0 : index
      %c0_135 = arith.constant 0 : index
      %412 = vector.load %arg11[%c0_134, %c0_135] : memref<8x128xf32, #tpu.memory_space<vmem>>, vector<8x128xf32>
      tpu.vector_store %arg11[%c0_134, %c0_135], %411 {strides = array<i32>} : memref<8x128xf32, #tpu.memory_space<vmem>>, vector<8x128xf32>,
    } else {
    }
    %c0 = arith.constant 0 : index
    %c0_2 = arith.constant 0 : index
    %9 = vector.load %arg2[%c0, %c0_2] : memref<64x16xf32, #tpu.memory_space<vmem>>, vector<64x16xf32>
    %c0_3 = arith.constant 0 : index
    %c0_4 = arith.constant 0 : index
    %c0_5 = arith.constant 0 : index
    %10 = vector.load %arg4[%c0_3, %c0_4, %c0_5] : memref<1x16x384xf32, #tpu.memory_space<vmem>>, vector<1x16x384xf32>
    %11 = vector.shape_cast %10 : vector<1x16x384xf32> to vector<16x384xf32>
    %cst = arith.constant dense<0.000000e+00> : vector<64x384xf32>
    %12 = tpu.matmul %9, %11, %cst {dimension_numbers = #tpu.dot_dimension_numbers<[1], [0], [0], [1], [0, 0, 1, 1], [], []>} : vector<64x16xf32>, vector<16x384xf32>, vector<64x384xf32> -> vector<64x384xf32>
    %c0_6 = arith.constant 0 : index
    %c0_7 = arith.constant 0 : index
    %c0_8 = arith.constant 0 : index
    %13 = vector.load %arg6[%c0_6, %c0_7, %c0_8] : memref<1x1x384xf32, #tpu.memory_space<vmem>>, vector<1x1x384xf32>
    %14 = vector.shape_cast %13 : vector<1x1x384xf32> to vector<1x384xf32>
    %15 = vector.broadcast %14 : vector<1x384xf32> to vector<64x384xf32>
    %16 = arith.addf %12, %15 : vector<64x384xf32>
    %c0_9 = arith.constant 0 : index
    %c0_10 = arith.constant 0 : index
    %17 = vector.load %arg12[%c0_9, %c0_10] : memref<64x384xf32, #tpu.memory_space<vmem>>, vector<64x384xf32>
    tpu.vector_store %arg12[%c0_9, %c0_10], %16 {strides = array<i32>} : memref<64x384xf32, #tpu.memory_space<vmem>>, vector<64x384xf32>,
    %c0_11 = arith.constant 0 : index
    %c0_12 = arith.constant 0 : index
    %c0_13 = arith.constant 0 : index
    %18 = vector.load %arg5[%c0_11, %c0_12, %c0_13] : memref<1x128x384xf32, #tpu.memory_space<vmem>>, vector<1x128x384xf32>
    %19 = vector.shape_cast %18 : vector<1x128x384xf32> to vector<128x384xf32>
    %c0_14 = arith.constant 0 : index
    %c0_15 = arith.constant 0 : index
    %c0_16 = arith.constant 0 : index
    %20 = vector.load %arg7[%c0_14, %c0_15, %c0_16] : memref<1x1x128xf32, #tpu.memory_space<vmem>>, vector<1x1x128xf32>
    %21 = vector.shape_cast %20 : vector<1x1x128xf32> to vector<1x128xf32>
    %22 = vector.shape_cast %21 : vector<1x128xf32> to vector<1x128xf32>
    %23 = vector.broadcast %22 : vector<1x128xf32> to vector<8x128xf32>
    %c0_17 = arith.constant 0 : index
    %c0_18 = arith.constant 0 : index
    %24 = vector.load %arg3[%c0_17, %c0_18] : memref<8x1xi32, #tpu.memory_space<vmem>>, vector<8x1xi32>
    %25 = vector.shape_cast %24 : vector<8x1xi32> to vector<8x1xi32>
    %26 = vector.broadcast %25 : vector<8x1xi32> to vector<8x128xi32>
    %c0_19 = arith.constant 0 : index
    %c0_20 = arith.constant 0 : index
    %27 = vector.load %arg11[%c0_19, %c0_20] : memref<8x128xf32, #tpu.memory_space<vmem>>, vector<8x128xf32>
    %c0_i32_21 = arith.constant 0 : i32
    %c7_i32 = arith.constant 7 : i32
    %28 = arith.muli %arg0, %c7_i32 : i32
    %c2_i32_22 = arith.constant 2 : i32
    %29 = arith.muli %c2_i32_22, %arg0 : i32
    %c1_i32_23 = arith.constant 1 : i32
    %30 = arith.subi %c1_i32_23, %29 : i32
    %31 = arith.muli %30, %c0_i32_21 : i32
    %32 = arith.addi %28, %31 : i32
    %c8_i32_24 = arith.constant 8 : i32
    %33 = arith.muli %32, %c8_i32_24 : i32
    %34 = tpu.assume_multiple %33, 8 : i32
    %35 = arith.index_cast %34 : i32 to index
    %c0_25 = arith.constant 0 : index
    %36 = vector.load %arg12[%35, %c0_25] : memref<64x384xf32, #tpu.memory_space<vmem>>, vector<8x384xf32>
    %cst_26 = arith.constant dense<0.000000e+00> : vector<8x384xf32>
    %37 = tpu.matmul %27, %19, %cst_26 {dimension_numbers = #tpu.dot_dimension_numbers<[1], [0], [0], [1], [0, 0, 1, 1], [], []>} : vector<8x128xf32>, vector<128x384xf32>, vector<8x384xf32> -> vector<8x384xf32>
    %38 = vector.extract_strided_slice %36 {offsets = [0, 0], sizes = [8, 128], strides = [1, 1]} : vector<8x384xf32> to vector<8x128xf32>
    %39 = vector.extract_strided_slice %37 {offsets = [0, 0], sizes = [8, 128], strides = [1, 1]} : vector<8x384xf32> to vector<8x128xf32>
    %40 = arith.addf %38, %39 : vector<8x128xf32>
    %41 = arith.negf %40 : vector<8x128xf32>
    %42 = math.exp %41 : vector<8x128xf32>
    %cst_27 = arith.constant 1.000000e+00 : f32
    %43 = vector.broadcast %cst_27 : f32 to vector<8x128xf32>
    %44 = arith.addf %43, %42 : vector<8x128xf32>
    %45 = arith.divf %43, %44 : vector<8x128xf32>
    %46 = vector.extract_strided_slice %36 {offsets = [0, 128], sizes = [8, 128], strides = [1, 1]} : vector<8x384xf32> to vector<8x128xf32>
    %47 = vector.extract_strided_slice %37 {offsets = [0, 128], sizes = [8, 128], strides = [1, 1]} : vector<8x384xf32> to vector<8x128xf32>
    %48 = arith.addf %46, %47 : vector<8x128xf32>
    %49 = arith.negf %48 : vector<8x128xf32>
    %50 = math.exp %49 : vector<8x128xf32>
    %cst_28 = arith.constant 1.000000e+00 : f32
    %51 = vector.broadcast %cst_28 : f32 to vector<8x128xf32>
    %52 = arith.addf %51, %50 : vector<8x128xf32>
    %53 = arith.divf %51, %52 : vector<8x128xf32>
    %54 = vector.extract_strided_slice %36 {offsets = [0, 256], sizes = [8, 128], strides = [1, 1]} : vector<8x384xf32> to vector<8x128xf32>
    %55 = vector.extract_strided_slice %37 {offsets = [0, 256], sizes = [8, 128], strides = [1, 1]} : vector<8x384xf32> to vector<8x128xf32>
    %56 = arith.addf %55, %23 : vector<8x128xf32>
    %57 = arith.mulf %45, %56 : vector<8x128xf32>
    %58 = arith.addf %54, %57 : vector<8x128xf32>
    %59 = math.tanh %58 : vector<8x128xf32>
    %cst_29 = arith.constant 1.000000e+00 : f32
    %60 = vector.broadcast %cst_29 : f32 to vector<8x128xf32>
    %61 = arith.subf %60, %53 : vector<8x128xf32>
    %62 = arith.mulf %61, %59 : vector<8x128xf32>
    %63 = arith.mulf %53, %27 : vector<8x128xf32>
    %64 = arith.addf %62, %63 : vector<8x128xf32>
    %65 = arith.addi %5, %32 : i32
    %66 = vector.broadcast %65 : i32 to vector<8x128xi32>
    %67 = arith.cmpi slt, %66, %26 : vector<8x128xi32>
    %68 = arith.select %67, %64, %27 : vector<8x128xi1>, vector<8x128xf32>
    %cst_30 = arith.constant 0.000000e+00 : f32
    %69 = vector.broadcast %cst_30 : f32 to vector<8x128xf32>
    %70 = arith.select %67, %64, %69 : vector<8x128xi1>, vector<8x128xf32>
    %71 = arith.index_cast %32 : i32 to index
    %c0_31 = arith.constant 0 : index
    %c0_32 = arith.constant 0 : index
    %72 = vector.load %arg13[%71, %c0_31, %c0_32] : memref<8x8x128xf32, #tpu.memory_space<vmem>>, vector<1x8x128xf32>
    %73 = vector.shape_cast %72 : vector<1x8x128xf32> to vector<8x128xf32>
    %74 = vector.shape_cast %70 : vector<8x128xf32> to vector<1x8x128xf32>
    tpu.vector_store %arg13[%71, %c0_31, %c0_32], %74 {strides = array<i32>} : memref<8x8x128xf32, #tpu.memory_space<vmem>>, vector<1x8x128xf32>,
    %c1_i32_33 = arith.constant 1 : i32
    %c7_i32_34 = arith.constant 7 : i32
    %75 = arith.muli %arg0, %c7_i32_34 : i32
    %c2_i32_35 = arith.constant 2 : i32
    %76 = arith.muli %c2_i32_35, %arg0 : i32
    %c1_i32_36 = arith.constant 1 : i32
    %77 = arith.subi %c1_i32_36, %76 : i32
    %78 = arith.muli %77, %c1_i32_33 : i32
    %79 = arith.addi %75, %78 : i32
    %c8_i32_37 = arith.constant 8 : i32
    %80 = arith.muli %79, %c8_i32_37 : i32
    %81 = tpu.assume_multiple %80, 8 : i32
    %82 = arith.index_cast %81 : i32 to index
    %c0_38 = arith.constant 0 : index
    %83 = vector.load %arg12[%82, %c0_38] : memref<64x384xf32, #tpu.memory_space<vmem>>, vector<8x384xf32>
    %cst_39 = arith.constant dense<0.000000e+00> : vector<8x384xf32>
    %84 = tpu.matmul %68, %19, %cst_39 {dimension_numbers = #tpu.dot_dimension_numbers<[1], [0], [0], [1], [0, 0, 1, 1], [], []>} : vector<8x128xf32>, vector<128x384xf32>, vector<8x384xf32> -> vector<8x384xf32>
    %85 = vector.extract_strided_slice %83 {offsets = [0, 0], sizes = [8, 128], strides = [1, 1]} : vector<8x384xf32> to vector<8x128xf32>
    %86 = vector.extract_strided_slice %84 {offsets = [0, 0], sizes = [8, 128], strides = [1, 1]} : vector<8x384xf32> to vector<8x128xf32>
    %87 = arith.addf %85, %86 : vector<8x128xf32>
    %88 = arith.negf %87 : vector<8x128xf32>
    %89 = math.exp %88 : vector<8x128xf32>
    %cst_40 = arith.constant 1.000000e+00 : f32
    %90 = vector.broadcast %cst_40 : f32 to vector<8x128xf32>
    %91 = arith.addf %90, %89 : vector<8x128xf32>
    %92 = arith.divf %90, %91 : vector<8x128xf32>
    %93 = vector.extract_strided_slice %83 {offsets = [0, 128], sizes = [8, 128], strides = [1, 1]} : vector<8x384xf32> to vector<8x128xf32>
    %94 = vector.extract_strided_slice %84 {offsets = [0, 128], sizes = [8, 128], strides = [1, 1]} : vector<8x384xf32> to vector<8x128xf32>
    %95 = arith.addf %93, %94 : vector<8x128xf32>
    %96 = arith.negf %95 : vector<8x128xf32>
    %97 = math.exp %96 : vector<8x128xf32>
    %cst_41 = arith.constant 1.000000e+00 : f32
    %98 = vector.broadcast %cst_41 : f32 to vector<8x128xf32>
    %99 = arith.addf %98, %97 : vector<8x128xf32>
    %100 = arith.divf %98, %99 : vector<8x128xf32>
    %101 = vector.extract_strided_slice %83 {offsets = [0, 256], sizes = [8, 128], strides = [1, 1]} : vector<8x384xf32> to vector<8x128xf32>
    %102 = vector.extract_strided_slice %84 {offsets = [0, 256], sizes = [8, 128], strides = [1, 1]} : vector<8x384xf32> to vector<8x128xf32>
    %103 = arith.addf %102, %23 : vector<8x128xf32>
    %104 = arith.mulf %92, %103 : vector<8x128xf32>
    %105 = arith.addf %101, %104 : vector<8x128xf32>
    %106 = math.tanh %105 : vector<8x128xf32>
    %cst_42 = arith.constant 1.000000e+00 : f32
    %107 = vector.broadcast %cst_42 : f32 to vector<8x128xf32>
    %108 = arith.subf %107, %100 : vector<8x128xf32>
    %109 = arith.mulf %108, %106 : vector<8x128xf32>
    %110 = arith.mulf %100, %68 : vector<8x128xf32>
    %111 = arith.addf %109, %110 : vector<8x128xf32>
    %112 = arith.addi %5, %79 : i32
    %113 = vector.broadcast %112 : i32 to vector<8x128xi32>
    %114 = arith.cmpi slt, %113, %26 : vector<8x128xi32>
    %115 = arith.select %114, %111, %68 : vector<8x128xi1>, vector<8x128xf32>
    %cst_43 = arith.constant 0.000000e+00 : f32
    %116 = vector.broadcast %cst_43 : f32 to vector<8x128xf32>
    %117 = arith.select %114, %111, %116 : vector<8x128xi1>, vector<8x128xf32>
    %118 = arith.index_cast %79 : i32 to index
    %c0_44 = arith.constant 0 : index
    %c0_45 = arith.constant 0 : index
    %119 = vector.load %arg13[%118, %c0_44, %c0_45] : memref<8x8x128xf32, #tpu.memory_space<vmem>>, vector<1x8x128xf32>
    %120 = vector.shape_cast %119 : vector<1x8x128xf32> to vector<8x128xf32>
    %121 = vector.shape_cast %117 : vector<8x128xf32> to vector<1x8x128xf32>
    tpu.vector_store %arg13[%118, %c0_44, %c0_45], %121 {strides = array<i32>} : memref<8x8x128xf32, #tpu.memory_space<vmem>>, vector<1x8x128xf32>,
    %c2_i32_46 = arith.constant 2 : i32
    %c7_i32_47 = arith.constant 7 : i32
    %122 = arith.muli %arg0, %c7_i32_47 : i32
    %c2_i32_48 = arith.constant 2 : i32
    %123 = arith.muli %c2_i32_48, %arg0 : i32
    %c1_i32_49 = arith.constant 1 : i32
    %124 = arith.subi %c1_i32_49, %123 : i32
    %125 = arith.muli %124, %c2_i32_46 : i32
    %126 = arith.addi %122, %125 : i32
    %c8_i32_50 = arith.constant 8 : i32
    %127 = arith.muli %126, %c8_i32_50 : i32
    %128 = tpu.assume_multiple %127, 8 : i32
    %129 = arith.index_cast %128 : i32 to index
    %c0_51 = arith.constant 0 : index
    %130 = vector.load %arg12[%129, %c0_51] : memref<64x384xf32, #tpu.memory_space<vmem>>, vector<8x384xf32>
    %cst_52 = arith.constant dense<0.000000e+00> : vector<8x384xf32>
    %131 = tpu.matmul %115, %19, %cst_52 {dimension_numbers = #tpu.dot_dimension_numbers<[1], [0], [0], [1], [0, 0, 1, 1], [], []>} : vector<8x128xf32>, vector<128x384xf32>, vector<8x384xf32> -> vector<8x384xf32>
    %132 = vector.extract_strided_slice %130 {offsets = [0, 0], sizes = [8, 128], strides = [1, 1]} : vector<8x384xf32> to vector<8x128xf32>
    %133 = vector.extract_strided_slice %131 {offsets = [0, 0], sizes = [8, 128], strides = [1, 1]} : vector<8x384xf32> to vector<8x128xf32>
    %134 = arith.addf %132, %133 : vector<8x128xf32>
    %135 = arith.negf %134 : vector<8x128xf32>
    %136 = math.exp %135 : vector<8x128xf32>
    %cst_53 = arith.constant 1.000000e+00 : f32
    %137 = vector.broadcast %cst_53 : f32 to vector<8x128xf32>
    %138 = arith.addf %137, %136 : vector<8x128xf32>
    %139 = arith.divf %137, %138 : vector<8x128xf32>
    %140 = vector.extract_strided_slice %130 {offsets = [0, 128], sizes = [8, 128], strides = [1, 1]} : vector<8x384xf32> to vector<8x128xf32>
    %141 = vector.extract_strided_slice %131 {offsets = [0, 128], sizes = [8, 128], strides = [1, 1]} : vector<8x384xf32> to vector<8x128xf32>
    %142 = arith.addf %140, %141 : vector<8x128xf32>
    %143 = arith.negf %142 : vector<8x128xf32>
    %144 = math.exp %143 : vector<8x128xf32>
    %cst_54 = arith.constant 1.000000e+00 : f32
    %145 = vector.broadcast %cst_54 : f32 to vector<8x128xf32>
    %146 = arith.addf %145, %144 : vector<8x128xf32>
    %147 = arith.divf %145, %146 : vector<8x128xf32>
    %148 = vector.extract_strided_slice %130 {offsets = [0, 256], sizes = [8, 128], strides = [1, 1]} : vector<8x384xf32> to vector<8x128xf32>
    %149 = vector.extract_strided_slice %131 {offsets = [0, 256], sizes = [8, 128], strides = [1, 1]} : vector<8x384xf32> to vector<8x128xf32>
    %150 = arith.addf %149, %23 : vector<8x128xf32>
    %151 = arith.mulf %139, %150 : vector<8x128xf32>
    %152 = arith.addf %148, %151 : vector<8x128xf32>
    %153 = math.tanh %152 : vector<8x128xf32>
    %cst_55 = arith.constant 1.000000e+00 : f32
    %154 = vector.broadcast %cst_55 : f32 to vector<8x128xf32>
    %155 = arith.subf %154, %147 : vector<8x128xf32>
    %156 = arith.mulf %155, %153 : vector<8x128xf32>
    %157 = arith.mulf %147, %115 : vector<8x128xf32>
    %158 = arith.addf %156, %157 : vector<8x128xf32>
    %159 = arith.addi %5, %126 : i32
    %160 = vector.broadcast %159 : i32 to vector<8x128xi32>
    %161 = arith.cmpi slt, %160, %26 : vector<8x128xi32>
    %162 = arith.select %161, %158, %115 : vector<8x128xi1>, vector<8x128xf32>
    %cst_56 = arith.constant 0.000000e+00 : f32
    %163 = vector.broadcast %cst_56 : f32 to vector<8x128xf32>
    %164 = arith.select %161, %158, %163 : vector<8x128xi1>, vector<8x128xf32>
    %165 = arith.index_cast %126 : i32 to index
    %c0_57 = arith.constant 0 : index
    %c0_58 = arith.constant 0 : index
    %166 = vector.load %arg13[%165, %c0_57, %c0_58] : memref<8x8x128xf32, #tpu.memory_space<vmem>>, vector<1x8x128xf32>
    %167 = vector.shape_cast %166 : vector<1x8x128xf32> to vector<8x128xf32>
    %168 = vector.shape_cast %164 : vector<8x128xf32> to vector<1x8x128xf32>
    tpu.vector_store %arg13[%165, %c0_57, %c0_58], %168 {strides = array<i32>} : memref<8x8x128xf32, #tpu.memory_space<vmem>>, vector<1x8x128xf32>,
    %c3_i32 = arith.constant 3 : i32
    %c7_i32_59 = arith.constant 7 : i32
    %169 = arith.muli %arg0, %c7_i32_59 : i32
    %c2_i32_60 = arith.constant 2 : i32
    %170 = arith.muli %c2_i32_60, %arg0 : i32
    %c1_i32_61 = arith.constant 1 : i32
    %171 = arith.subi %c1_i32_61, %170 : i32
    %172 = arith.muli %171, %c3_i32 : i32
    %173 = arith.addi %169, %172 : i32
    %c8_i32_62 = arith.constant 8 : i32
    %174 = arith.muli %173, %c8_i32_62 : i32
    %175 = tpu.assume_multiple %174, 8 : i32
    %176 = arith.index_cast %175 : i32 to index
    %c0_63 = arith.constant 0 : index
    %177 = vector.load %arg12[%176, %c0_63] : memref<64x384xf32, #tpu.memory_space<vmem>>, vector<8x384xf32>
    %cst_64 = arith.constant dense<0.000000e+00> : vector<8x384xf32>
    %178 = tpu.matmul %162, %19, %cst_64 {dimension_numbers = #tpu.dot_dimension_numbers<[1], [0], [0], [1], [0, 0, 1, 1], [], []>} : vector<8x128xf32>, vector<128x384xf32>, vector<8x384xf32> -> vector<8x384xf32>
    %179 = vector.extract_strided_slice %177 {offsets = [0, 0], sizes = [8, 128], strides = [1, 1]} : vector<8x384xf32> to vector<8x128xf32>
    %180 = vector.extract_strided_slice %178 {offsets = [0, 0], sizes = [8, 128], strides = [1, 1]} : vector<8x384xf32> to vector<8x128xf32>
    %181 = arith.addf %179, %180 : vector<8x128xf32>
    %182 = arith.negf %181 : vector<8x128xf32>
    %183 = math.exp %182 : vector<8x128xf32>
    %cst_65 = arith.constant 1.000000e+00 : f32
    %184 = vector.broadcast %cst_65 : f32 to vector<8x128xf32>
    %185 = arith.addf %184, %183 : vector<8x128xf32>
    %186 = arith.divf %184, %185 : vector<8x128xf32>
    %187 = vector.extract_strided_slice %177 {offsets = [0, 128], sizes = [8, 128], strides = [1, 1]} : vector<8x384xf32> to vector<8x128xf32>
    %188 = vector.extract_strided_slice %178 {offsets = [0, 128], sizes = [8, 128], strides = [1, 1]} : vector<8x384xf32> to vector<8x128xf32>
    %189 = arith.addf %187, %188 : vector<8x128xf32>
    %190 = arith.negf %189 : vector<8x128xf32>
    %191 = math.exp %190 : vector<8x128xf32>
    %cst_66 = arith.constant 1.000000e+00 : f32
    %192 = vector.broadcast %cst_66 : f32 to vector<8x128xf32>
    %193 = arith.addf %192, %191 : vector<8x128xf32>
    %194 = arith.divf %192, %193 : vector<8x128xf32>
    %195 = vector.extract_strided_slice %177 {offsets = [0, 256], sizes = [8, 128], strides = [1, 1]} : vector<8x384xf32> to vector<8x128xf32>
    %196 = vector.extract_strided_slice %178 {offsets = [0, 256], sizes = [8, 128], strides = [1, 1]} : vector<8x384xf32> to vector<8x128xf32>
    %197 = arith.addf %196, %23 : vector<8x128xf32>
    %198 = arith.mulf %186, %197 : vector<8x128xf32>
    %199 = arith.addf %195, %198 : vector<8x128xf32>
    %200 = math.tanh %199 : vector<8x128xf32>
    %cst_67 = arith.constant 1.000000e+00 : f32
    %201 = vector.broadcast %cst_67 : f32 to vector<8x128xf32>
    %202 = arith.subf %201, %194 : vector<8x128xf32>
    %203 = arith.mulf %202, %200 : vector<8x128xf32>
    %204 = arith.mulf %194, %162 : vector<8x128xf32>
    %205 = arith.addf %203, %204 : vector<8x128xf32>
    %206 = arith.addi %5, %173 : i32
    %207 = vector.broadcast %206 : i32 to vector<8x128xi32>
    %208 = arith.cmpi slt, %207, %26 : vector<8x128xi32>
    %209 = arith.select %208, %205, %162 : vector<8x128xi1>, vector<8x128xf32>
    %cst_68 = arith.constant 0.000000e+00 : f32
    %210 = vector.broadcast %cst_68 : f32 to vector<8x128xf32>
    %211 = arith.select %208, %205, %210 : vector<8x128xi1>, vector<8x128xf32>
    %212 = arith.index_cast %173 : i32 to index
    %c0_69 = arith.constant 0 : index
    %c0_70 = arith.constant 0 : index
    %213 = vector.load %arg13[%212, %c0_69, %c0_70] : memref<8x8x128xf32, #tpu.memory_space<vmem>>, vector<1x8x128xf32>
    %214 = vector.shape_cast %213 : vector<1x8x128xf32> to vector<8x128xf32>
    %215 = vector.shape_cast %211 : vector<8x128xf32> to vector<1x8x128xf32>
    tpu.vector_store %arg13[%212, %c0_69, %c0_70], %215 {strides = array<i32>} : memref<8x8x128xf32, #tpu.memory_space<vmem>>, vector<1x8x128xf32>,
    %c4_i32 = arith.constant 4 : i32
    %c7_i32_71 = arith.constant 7 : i32
    %216 = arith.muli %arg0, %c7_i32_71 : i32
    %c2_i32_72 = arith.constant 2 : i32
    %217 = arith.muli %c2_i32_72, %arg0 : i32
    %c1_i32_73 = arith.constant 1 : i32
    %218 = arith.subi %c1_i32_73, %217 : i32
    %219 = arith.muli %218, %c4_i32 : i32
    %220 = arith.addi %216, %219 : i32
    %c8_i32_74 = arith.constant 8 : i32
    %221 = arith.muli %220, %c8_i32_74 : i32
    %222 = tpu.assume_multiple %221, 8 : i32
    %223 = arith.index_cast %222 : i32 to index
    %c0_75 = arith.constant 0 : index
    %224 = vector.load %arg12[%223, %c0_75] : memref<64x384xf32, #tpu.memory_space<vmem>>, vector<8x384xf32>
    %cst_76 = arith.constant dense<0.000000e+00> : vector<8x384xf32>
    %225 = tpu.matmul %209, %19, %cst_76 {dimension_numbers = #tpu.dot_dimension_numbers<[1], [0], [0], [1], [0, 0, 1, 1], [], []>} : vector<8x128xf32>, vector<128x384xf32>, vector<8x384xf32> -> vector<8x384xf32>
    %226 = vector.extract_strided_slice %224 {offsets = [0, 0], sizes = [8, 128], strides = [1, 1]} : vector<8x384xf32> to vector<8x128xf32>
    %227 = vector.extract_strided_slice %225 {offsets = [0, 0], sizes = [8, 128], strides = [1, 1]} : vector<8x384xf32> to vector<8x128xf32>
    %228 = arith.addf %226, %227 : vector<8x128xf32>
    %229 = arith.negf %228 : vector<8x128xf32>
    %230 = math.exp %229 : vector<8x128xf32>
    %cst_77 = arith.constant 1.000000e+00 : f32
    %231 = vector.broadcast %cst_77 : f32 to vector<8x128xf32>
    %232 = arith.addf %231, %230 : vector<8x128xf32>
    %233 = arith.divf %231, %232 : vector<8x128xf32>
    %234 = vector.extract_strided_slice %224 {offsets = [0, 128], sizes = [8, 128], strides = [1, 1]} : vector<8x384xf32> to vector<8x128xf32>
    %235 = vector.extract_strided_slice %225 {offsets = [0, 128], sizes = [8, 128], strides = [1, 1]} : vector<8x384xf32> to vector<8x128xf32>
    %236 = arith.addf %234, %235 : vector<8x128xf32>
    %237 = arith.negf %236 : vector<8x128xf32>
    %238 = math.exp %237 : vector<8x128xf32>
    %cst_78 = arith.constant 1.000000e+00 : f32
    %239 = vector.broadcast %cst_78 : f32 to vector<8x128xf32>
    %240 = arith.addf %239, %238 : vector<8x128xf32>
    %241 = arith.divf %239, %240 : vector<8x128xf32>
    %242 = vector.extract_strided_slice %224 {offsets = [0, 256], sizes = [8, 128], strides = [1, 1]} : vector<8x384xf32> to vector<8x128xf32>
    %243 = vector.extract_strided_slice %225 {offsets = [0, 256], sizes = [8, 128], strides = [1, 1]} : vector<8x384xf32> to vector<8x128xf32>
    %244 = arith.addf %243, %23 : vector<8x128xf32>
    %245 = arith.mulf %233, %244 : vector<8x128xf32>
    %246 = arith.addf %242, %245 : vector<8x128xf32>
    %247 = math.tanh %246 : vector<8x128xf32>
    %cst_79 = arith.constant 1.000000e+00 : f32
    %248 = vector.broadcast %cst_79 : f32 to vector<8x128xf32>
    %249 = arith.subf %248, %241 : vector<8x128xf32>
    %250 = arith.mulf %249, %247 : vector<8x128xf32>
    %251 = arith.mulf %241, %209 : vector<8x128xf32>
    %252 = arith.addf %250, %251 : vector<8x128xf32>
    %253 = arith.addi %5, %220 : i32
    %254 = vector.broadcast %253 : i32 to vector<8x128xi32>
    %255 = arith.cmpi slt, %254, %26 : vector<8x128xi32>
    %256 = arith.select %255, %252, %209 : vector<8x128xi1>, vector<8x128xf32>
    %cst_80 = arith.constant 0.000000e+00 : f32
    %257 = vector.broadcast %cst_80 : f32 to vector<8x128xf32>
    %258 = arith.select %255, %252, %257 : vector<8x128xi1>, vector<8x128xf32>
    %259 = arith.index_cast %220 : i32 to index
    %c0_81 = arith.constant 0 : index
    %c0_82 = arith.constant 0 : index
    %260 = vector.load %arg13[%259, %c0_81, %c0_82] : memref<8x8x128xf32, #tpu.memory_space<vmem>>, vector<1x8x128xf32>
    %261 = vector.shape_cast %260 : vector<1x8x128xf32> to vector<8x128xf32>
    %262 = vector.shape_cast %258 : vector<8x128xf32> to vector<1x8x128xf32>
    tpu.vector_store %arg13[%259, %c0_81, %c0_82], %262 {strides = array<i32>} : memref<8x8x128xf32, #tpu.memory_space<vmem>>, vector<1x8x128xf32>,
    %c5_i32 = arith.constant 5 : i32
    %c7_i32_83 = arith.constant 7 : i32
    %263 = arith.muli %arg0, %c7_i32_83 : i32
    %c2_i32_84 = arith.constant 2 : i32
    %264 = arith.muli %c2_i32_84, %arg0 : i32
    %c1_i32_85 = arith.constant 1 : i32
    %265 = arith.subi %c1_i32_85, %264 : i32
    %266 = arith.muli %265, %c5_i32 : i32
    %267 = arith.addi %263, %266 : i32
    %c8_i32_86 = arith.constant 8 : i32
    %268 = arith.muli %267, %c8_i32_86 : i32
    %269 = tpu.assume_multiple %268, 8 : i32
    %270 = arith.index_cast %269 : i32 to index
    %c0_87 = arith.constant 0 : index
    %271 = vector.load %arg12[%270, %c0_87] : memref<64x384xf32, #tpu.memory_space<vmem>>, vector<8x384xf32>
    %cst_88 = arith.constant dense<0.000000e+00> : vector<8x384xf32>
    %272 = tpu.matmul %256, %19, %cst_88 {dimension_numbers = #tpu.dot_dimension_numbers<[1], [0], [0], [1], [0, 0, 1, 1], [], []>} : vector<8x128xf32>, vector<128x384xf32>, vector<8x384xf32> -> vector<8x384xf32>
    %273 = vector.extract_strided_slice %271 {offsets = [0, 0], sizes = [8, 128], strides = [1, 1]} : vector<8x384xf32> to vector<8x128xf32>
    %274 = vector.extract_strided_slice %272 {offsets = [0, 0], sizes = [8, 128], strides = [1, 1]} : vector<8x384xf32> to vector<8x128xf32>
    %275 = arith.addf %273, %274 : vector<8x128xf32>
    %276 = arith.negf %275 : vector<8x128xf32>
    %277 = math.exp %276 : vector<8x128xf32>
    %cst_89 = arith.constant 1.000000e+00 : f32
    %278 = vector.broadcast %cst_89 : f32 to vector<8x128xf32>
    %279 = arith.addf %278, %277 : vector<8x128xf32>
    %280 = arith.divf %278, %279 : vector<8x128xf32>
    %281 = vector.extract_strided_slice %271 {offsets = [0, 128], sizes = [8, 128], strides = [1, 1]} : vector<8x384xf32> to vector<8x128xf32>
    %282 = vector.extract_strided_slice %272 {offsets = [0, 128], sizes = [8, 128], strides = [1, 1]} : vector<8x384xf32> to vector<8x128xf32>
    %283 = arith.addf %281, %282 : vector<8x128xf32>
    %284 = arith.negf %283 : vector<8x128xf32>
    %285 = math.exp %284 : vector<8x128xf32>
    %cst_90 = arith.constant 1.000000e+00 : f32
    %286 = vector.broadcast %cst_90 : f32 to vector<8x128xf32>
    %287 = arith.addf %286, %285 : vector<8x128xf32>
    %288 = arith.divf %286, %287 : vector<8x128xf32>
    %289 = vector.extract_strided_slice %271 {offsets = [0, 256], sizes = [8, 128], strides = [1, 1]} : vector<8x384xf32> to vector<8x128xf32>
    %290 = vector.extract_strided_slice %272 {offsets = [0, 256], sizes = [8, 128], strides = [1, 1]} : vector<8x384xf32> to vector<8x128xf32>
    %291 = arith.addf %290, %23 : vector<8x128xf32>
    %292 = arith.mulf %280, %291 : vector<8x128xf32>
    %293 = arith.addf %289, %292 : vector<8x128xf32>
    %294 = math.tanh %293 : vector<8x128xf32>
    %cst_91 = arith.constant 1.000000e+00 : f32
    %295 = vector.broadcast %cst_91 : f32 to vector<8x128xf32>
    %296 = arith.subf %295, %288 : vector<8x128xf32>
    %297 = arith.mulf %296, %294 : vector<8x128xf32>
    %298 = arith.mulf %288, %256 : vector<8x128xf32>
    %299 = arith.addf %297, %298 : vector<8x128xf32>
    %300 = arith.addi %5, %267 : i32
    %301 = vector.broadcast %300 : i32 to vector<8x128xi32>
    %302 = arith.cmpi slt, %301, %26 : vector<8x128xi32>
    %303 = arith.select %302, %299, %256 : vector<8x128xi1>, vector<8x128xf32>
    %cst_92 = arith.constant 0.000000e+00 : f32
    %304 = vector.broadcast %cst_92 : f32 to vector<8x128xf32>
    %305 = arith.select %302, %299, %304 : vector<8x128xi1>, vector<8x128xf32>
    %306 = arith.index_cast %267 : i32 to index
    %c0_93 = arith.constant 0 : index
    %c0_94 = arith.constant 0 : index
    %307 = vector.load %arg13[%306, %c0_93, %c0_94] : memref<8x8x128xf32, #tpu.memory_space<vmem>>, vector<1x8x128xf32>
    %308 = vector.shape_cast %307 : vector<1x8x128xf32> to vector<8x128xf32>
    %309 = vector.shape_cast %305 : vector<8x128xf32> to vector<1x8x128xf32>
    tpu.vector_store %arg13[%306, %c0_93, %c0_94], %309 {strides = array<i32>} : memref<8x8x128xf32, #tpu.memory_space<vmem>>, vector<1x8x128xf32>,
    %c6_i32 = arith.constant 6 : i32
    %c7_i32_95 = arith.constant 7 : i32
    %310 = arith.muli %arg0, %c7_i32_95 : i32
    %c2_i32_96 = arith.constant 2 : i32
    %311 = arith.muli %c2_i32_96, %arg0 : i32
    %c1_i32_97 = arith.constant 1 : i32
    %312 = arith.subi %c1_i32_97, %311 : i32
    %313 = arith.muli %312, %c6_i32 : i32
    %314 = arith.addi %310, %313 : i32
    %c8_i32_98 = arith.constant 8 : i32
    %315 = arith.muli %314, %c8_i32_98 : i32
    %316 = tpu.assume_multiple %315, 8 : i32
    %317 = arith.index_cast %316 : i32 to index
    %c0_99 = arith.constant 0 : index
    %318 = vector.load %arg12[%317, %c0_99] : memref<64x384xf32, #tpu.memory_space<vmem>>, vector<8x384xf32>
    %cst_100 = arith.constant dense<0.000000e+00> : vector<8x384xf32>
    %319 = tpu.matmul %303, %19, %cst_100 {dimension_numbers = #tpu.dot_dimension_numbers<[1], [0], [0], [1], [0, 0, 1, 1], [], []>} : vector<8x128xf32>, vector<128x384xf32>, vector<8x384xf32> -> vector<8x384xf32>
    %320 = vector.extract_strided_slice %318 {offsets = [0, 0], sizes = [8, 128], strides = [1, 1]} : vector<8x384xf32> to vector<8x128xf32>
    %321 = vector.extract_strided_slice %319 {offsets = [0, 0], sizes = [8, 128], strides = [1, 1]} : vector<8x384xf32> to vector<8x128xf32>
    %322 = arith.addf %320, %321 : vector<8x128xf32>
    %323 = arith.negf %322 : vector<8x128xf32>
    %324 = math.exp %323 : vector<8x128xf32>
    %cst_101 = arith.constant 1.000000e+00 : f32
    %325 = vector.broadcast %cst_101 : f32 to vector<8x128xf32>
    %326 = arith.addf %325, %324 : vector<8x128xf32>
    %327 = arith.divf %325, %326 : vector<8x128xf32>
    %328 = vector.extract_strided_slice %318 {offsets = [0, 128], sizes = [8, 128], strides = [1, 1]} : vector<8x384xf32> to vector<8x128xf32>
    %329 = vector.extract_strided_slice %319 {offsets = [0, 128], sizes = [8, 128], strides = [1, 1]} : vector<8x384xf32> to vector<8x128xf32>
    %330 = arith.addf %328, %329 : vector<8x128xf32>
    %331 = arith.negf %330 : vector<8x128xf32>
    %332 = math.exp %331 : vector<8x128xf32>
    %cst_102 = arith.constant 1.000000e+00 : f32
    %333 = vector.broadcast %cst_102 : f32 to vector<8x128xf32>
    %334 = arith.addf %333, %332 : vector<8x128xf32>
    %335 = arith.divf %333, %334 : vector<8x128xf32>
    %336 = vector.extract_strided_slice %318 {offsets = [0, 256], sizes = [8, 128], strides = [1, 1]} : vector<8x384xf32> to vector<8x128xf32>
    %337 = vector.extract_strided_slice %319 {offsets = [0, 256], sizes = [8, 128], strides = [1, 1]} : vector<8x384xf32> to vector<8x128xf32>
    %338 = arith.addf %337, %23 : vector<8x128xf32>
    %339 = arith.mulf %327, %338 : vector<8x128xf32>
    %340 = arith.addf %336, %339 : vector<8x128xf32>
    %341 = math.tanh %340 : vector<8x128xf32>
    %cst_103 = arith.constant 1.000000e+00 : f32
    %342 = vector.broadcast %cst_103 : f32 to vector<8x128xf32>
    %343 = arith.subf %342, %335 : vector<8x128xf32>
    %344 = arith.mulf %343, %341 : vector<8x128xf32>
    %345 = arith.mulf %335, %303 : vector<8x128xf32>
    %346 = arith.addf %344, %345 : vector<8x128xf32>
    %347 = arith.addi %5, %314 : i32
    %348 = vector.broadcast %347 : i32 to vector<8x128xi32>
    %349 = arith.cmpi slt, %348, %26 : vector<8x128xi32>
    %350 = arith.select %349, %346, %303 : vector<8x128xi1>, vector<8x128xf32>
    %cst_104 = arith.constant 0.000000e+00 : f32
    %351 = vector.broadcast %cst_104 : f32 to vector<8x128xf32>
    %352 = arith.select %349, %346, %351 : vector<8x128xi1>, vector<8x128xf32>
    %353 = arith.index_cast %314 : i32 to index
    %c0_105 = arith.constant 0 : index
    %c0_106 = arith.constant 0 : index
    %354 = vector.load %arg13[%353, %c0_105, %c0_106] : memref<8x8x128xf32, #tpu.memory_space<vmem>>, vector<1x8x128xf32>
    %355 = vector.shape_cast %354 : vector<1x8x128xf32> to vector<8x128xf32>
    %356 = vector.shape_cast %352 : vector<8x128xf32> to vector<1x8x128xf32>
    tpu.vector_store %arg13[%353, %c0_105, %c0_106], %356 {strides = array<i32>} : memref<8x8x128xf32, #tpu.memory_space<vmem>>, vector<1x8x128xf32>,
    %c7_i32_107 = arith.constant 7 : i32
    %c7_i32_108 = arith.constant 7 : i32
    %357 = arith.muli %arg0, %c7_i32_108 : i32
    %c2_i32_109 = arith.constant 2 : i32
    %358 = arith.muli %c2_i32_109, %arg0 : i32
    %c1_i32_110 = arith.constant 1 : i32
    %359 = arith.subi %c1_i32_110, %358 : i32
    %360 = arith.muli %359, %c7_i32_107 : i32
    %361 = arith.addi %357, %360 : i32
    %c8_i32_111 = arith.constant 8 : i32
    %362 = arith.muli %361, %c8_i32_111 : i32
    %363 = tpu.assume_multiple %362, 8 : i32
    %364 = arith.index_cast %363 : i32 to index
    %c0_112 = arith.constant 0 : index
    %365 = vector.load %arg12[%364, %c0_112] : memref<64x384xf32, #tpu.memory_space<vmem>>, vector<8x384xf32>
    %cst_113 = arith.constant dense<0.000000e+00> : vector<8x384xf32>
    %366 = tpu.matmul %350, %19, %cst_113 {dimension_numbers = #tpu.dot_dimension_numbers<[1], [0], [0], [1], [0, 0, 1, 1], [], []>} : vector<8x128xf32>, vector<128x384xf32>, vector<8x384xf32> -> vector<8x384xf32>
    %367 = vector.extract_strided_slice %365 {offsets = [0, 0], sizes = [8, 128], strides = [1, 1]} : vector<8x384xf32> to vector<8x128xf32>
    %368 = vector.extract_strided_slice %366 {offsets = [0, 0], sizes = [8, 128], strides = [1, 1]} : vector<8x384xf32> to vector<8x128xf32>
    %369 = arith.addf %367, %368 : vector<8x128xf32>
    %370 = arith.negf %369 : vector<8x128xf32>
    %371 = math.exp %370 : vector<8x128xf32>
    %cst_114 = arith.constant 1.000000e+00 : f32
    %372 = vector.broadcast %cst_114 : f32 to vector<8x128xf32>
    %373 = arith.addf %372, %371 : vector<8x128xf32>
    %374 = arith.divf %372, %373 : vector<8x128xf32>
    %375 = vector.extract_strided_slice %365 {offsets = [0, 128], sizes = [8, 128], strides = [1, 1]} : vector<8x384xf32> to vector<8x128xf32>
    %376 = vector.extract_strided_slice %366 {offsets = [0, 128], sizes = [8, 128], strides = [1, 1]} : vector<8x384xf32> to vector<8x128xf32>
    %377 = arith.addf %375, %376 : vector<8x128xf32>
    %378 = arith.negf %377 : vector<8x128xf32>
    %379 = math.exp %378 : vector<8x128xf32>
    %cst_115 = arith.constant 1.000000e+00 : f32
    %380 = vector.broadcast %cst_115 : f32 to vector<8x128xf32>
    %381 = arith.addf %380, %379 : vector<8x128xf32>
    %382 = arith.divf %380, %381 : vector<8x128xf32>
    %383 = vector.extract_strided_slice %365 {offsets = [0, 256], sizes = [8, 128], strides = [1, 1]} : vector<8x384xf32> to vector<8x128xf32>
    %384 = vector.extract_strided_slice %366 {offsets = [0, 256], sizes = [8, 128], strides = [1, 1]} : vector<8x384xf32> to vector<8x128xf32>
    %385 = arith.addf %384, %23 : vector<8x128xf32>
    %386 = arith.mulf %374, %385 : vector<8x128xf32>
    %387 = arith.addf %383, %386 : vector<8x128xf32>
    %388 = math.tanh %387 : vector<8x128xf32>
    %cst_116 = arith.constant 1.000000e+00 : f32
    %389 = vector.broadcast %cst_116 : f32 to vector<8x128xf32>
    %390 = arith.subf %389, %382 : vector<8x128xf32>
    %391 = arith.mulf %390, %388 : vector<8x128xf32>
    %392 = arith.mulf %382, %350 : vector<8x128xf32>
    %393 = arith.addf %391, %392 : vector<8x128xf32>
    %394 = arith.addi %5, %361 : i32
    %395 = vector.broadcast %394 : i32 to vector<8x128xi32>
    %396 = arith.cmpi slt, %395, %26 : vector<8x128xi32>
    %397 = arith.select %396, %393, %350 : vector<8x128xi1>, vector<8x128xf32>
    %cst_117 = arith.constant 0.000000e+00 : f32
    %398 = vector.broadcast %cst_117 : f32 to vector<8x128xf32>
    %399 = arith.select %396, %393, %398 : vector<8x128xi1>, vector<8x128xf32>
    %400 = arith.index_cast %361 : i32 to index
    %c0_118 = arith.constant 0 : index
    %c0_119 = arith.constant 0 : index
    %401 = vector.load %arg13[%400, %c0_118, %c0_119] : memref<8x8x128xf32, #tpu.memory_space<vmem>>, vector<1x8x128xf32>
    %402 = vector.shape_cast %401 : vector<1x8x128xf32> to vector<8x128xf32>
    %403 = vector.shape_cast %399 : vector<8x128xf32> to vector<1x8x128xf32>
    tpu.vector_store %arg13[%400, %c0_118, %c0_119], %403 {strides = array<i32>} : memref<8x8x128xf32, #tpu.memory_space<vmem>>, vector<1x8x128xf32>,
    %c8_i32_120 = arith.constant 8 : i32
    %c0_121 = arith.constant 0 : index
    %c0_122 = arith.constant 0 : index
    %404 = vector.load %arg11[%c0_121, %c0_122] : memref<8x128xf32, #tpu.memory_space<vmem>>, vector<8x128xf32>
    tpu.vector_store %arg11[%c0_121, %c0_122], %397 {strides = array<i32>} : memref<8x128xf32, #tpu.memory_space<vmem>>, vector<8x128xf32>,
    %c0_123 = arith.constant 0 : index
    %c0_124 = arith.constant 0 : index
    %c0_125 = arith.constant 0 : index
    %405 = vector.load %arg13[%c0_123, %c0_124, %c0_125] : memref<8x8x128xf32, #tpu.memory_space<vmem>>, vector<8x8x128xf32>
    %c0_126 = arith.constant 0 : index
    %c0_127 = arith.constant 0 : index
    %c0_128 = arith.constant 0 : index
    %406 = vector.load %arg9[%c0_126, %c0_127, %c0_128] : memref<8x8x128xf32, #tpu.memory_space<vmem>>, vector<8x8x128xf32>
    tpu.vector_store %arg9[%c0_126, %c0_127, %c0_128], %405 {strides = array<i32>} : memref<8x8x128xf32, #tpu.memory_space<vmem>>, vector<8x8x128xf32>,
    %c0_i32_129 = arith.constant 0 : i32
    %407 = arith.cmpi eq, %arg1, %c0_i32_129 : i32
    %408 = arith.extui %407 : i1 to i32
    %c0_i32_130 = arith.constant 0 : i32
    %409 = arith.cmpi ne, %408, %c0_i32_130 : i32
    scf.if %409 {
      %c0_131 = arith.constant 0 : index
      %c0_132 = arith.constant 0 : index
      %c0_133 = arith.constant 0 : index
      %410 = vector.load %arg10[%c0_131, %c0_132, %c0_133] : memref<1x8x128xf32, #tpu.memory_space<vmem>>, vector<1x8x128xf32>
      %411 = vector.shape_cast %410 : vector<1x8x128xf32> to vector<8x128xf32>
      %412 = vector.shape_cast %397 : vector<8x128xf32> to vector<1x8x128xf32>
      tpu.vector_store %arg10[%c0_131, %c0_132, %c0_133], %412 {strides = array<i32>} : memref<1x8x128xf32, #tpu.memory_space<vmem>>, vector<1x8x128xf32>,
    } else {
    }
    return
  }
  func.func @transform_0(%arg0: i32, %arg1: i32) -> (i32, i32) {
    %c0_i32 = arith.constant 0 : i32
    %0 = arith.muli %arg0, %c0_i32 : i32
    %c2_i32 = arith.constant 2 : i32
    %1 = arith.muli %c2_i32, %arg0 : i32
    %c1_i32 = arith.constant 1 : i32
    %2 = arith.subi %c1_i32, %1 : i32
    %3 = arith.muli %2, %arg1 : i32
    %4 = arith.addi %0, %3 : i32
    %c0_i32_0 = arith.constant 0 : i32
    %c0_i32_1 = arith.constant 0 : i32
    return %4, %c0_i32_0 : i32, i32
  }
  func.func @transform_1(%arg0: i32, %arg1: i32) -> (i32, i32) {
    %c0_i32 = arith.constant 0 : i32
    %c0_i32_0 = arith.constant 0 : i32
    %c0_i32_1 = arith.constant 0 : i32
    return %c0_i32, %c0_i32_0 : i32, i32
  }
  func.func @transform_2(%arg0: i32, %arg1: i32) -> (i32, i32, i32) {
    %c0_i32 = arith.constant 0 : i32
    %c0_i32_0 = arith.constant 0 : i32
    %c0_i32_1 = arith.constant 0 : i32
    return %arg0, %c0_i32, %c0_i32_0 : i32, i32, i32
  }
  func.func @transform_3(%arg0: i32, %arg1: i32) -> (i32, i32, i32) {
    %c0_i32 = arith.constant 0 : i32
    %c0_i32_0 = arith.constant 0 : i32
    %c0_i32_1 = arith.constant 0 : i32
    return %arg0, %c0_i32, %c0_i32_0 : i32, i32, i32
  }
  func.func @transform_4(%arg0: i32, %arg1: i32) -> (i32, i32, i32) {
    %c0_i32 = arith.constant 0 : i32
    %c0_i32_0 = arith.constant 0 : i32
    %c0_i32_1 = arith.constant 0 : i32
    return %arg0, %c0_i32, %c0_i32_0 : i32, i32, i32
  }
  func.func @transform_5(%arg0: i32, %arg1: i32) -> (i32, i32, i32) {
    %c0_i32 = arith.constant 0 : i32
    %c0_i32_0 = arith.constant 0 : i32
    %c0_i32_1 = arith.constant 0 : i32
    return %arg0, %c0_i32, %c0_i32_0 : i32, i32, i32
  }
  func.func @transform_6(%arg0: i32, %arg1: i32) -> (i32, i32, i32) {
    %c0_i32 = arith.constant 0 : i32
    %c0_i32_0 = arith.constant 0 : i32
    %c0_i32_1 = arith.constant 0 : i32
    return %arg0, %c0_i32, %c0_i32_0 : i32, i32, i32
  }
  func.func @transform_7(%arg0: i32, %arg1: i32) -> (i32, i32, i32) {
    %c0_i32 = arith.constant 0 : i32
    %0 = arith.muli %arg0, %c0_i32 : i32
    %c2_i32 = arith.constant 2 : i32
    %1 = arith.muli %c2_i32, %arg0 : i32
    %c1_i32 = arith.constant 1 : i32
    %2 = arith.subi %c1_i32, %1 : i32
    %3 = arith.muli %2, %arg1 : i32
    %4 = arith.addi %0, %3 : i32
    %c0_i32_0 = arith.constant 0 : i32
    %c0_i32_1 = arith.constant 0 : i32
    return %4, %c0_i32_0, %arg0 : i32, i32, i32
  }
  func.func @transform_8(%arg0: i32, %arg1: i32) -> (i32, i32, i32) {
    %c0_i32 = arith.constant 0 : i32
    %c0_i32_0 = arith.constant 0 : i32
    %c0_i32_1 = arith.constant 0 : i32
    return %arg0, %c0_i32, %c0_i32_0 : i32, i32, i32
  }
}

module attributes {stable_mosaic.version = 11 : i64} {
  func.func @_linear_kernel(%arg0: i32, %arg1: i32, %arg2: memref<32x256xf32, #tpu.memory_space<vmem>>, %arg3: memref<256x128xf32, #tpu.memory_space<vmem>>, %arg4: memref<1x128xf32, #tpu.memory_space<vmem>>, %arg5: memref<32x128xf32, #tpu.memory_space<vmem>>) attributes {dimension_semantics = [#tpu.dimension_semantics<parallel>, #tpu.dimension_semantics<arbitrary>], iteration_bounds = array<i64: 1, 1>, scalar_prefetch = 0 : i64, scratch_operands = 0 : i64, tpu.core_type = #tpu.core_type<tc>, window_params = [{transform_indices = @transform_0, window_bounds = array<i64: 32, 256>}, {transform_indices = @transform_1, window_bounds = array<i64: 256, 128>}, {transform_indices = @transform_2, window_bounds = array<i64: 1, 128>}, {transform_indices = @transform_3, window_bounds = array<i64: 32, 128>}]} {
    %c0 = arith.constant 0 : index
    %c0_0 = arith.constant 0 : index
    %0 = vector.load %arg2[%c0, %c0_0] : memref<32x256xf32, #tpu.memory_space<vmem>>, vector<32x256xf32>
    %c0_1 = arith.constant 0 : index
    %c0_2 = arith.constant 0 : index
    %1 = vector.load %arg3[%c0_1, %c0_2] : memref<256x128xf32, #tpu.memory_space<vmem>>, vector<256x128xf32>
    %cst = arith.constant dense<0.000000e+00> : vector<32x128xf32>
    %2 = tpu.matmul %0, %1, %cst {dimension_numbers = #tpu.dot_dimension_numbers<[1], [0], [0], [1], [0, 0, 1, 1], [], []>} : vector<32x256xf32>, vector<256x128xf32>, vector<32x128xf32> -> vector<32x128xf32>
    %c0_3 = arith.constant 0 : index
    %c0_4 = arith.constant 0 : index
    %3 = vector.load %arg4[%c0_3, %c0_4] : memref<1x128xf32, #tpu.memory_space<vmem>>, vector<1x128xf32>
    %4 = vector.broadcast %3 : vector<1x128xf32> to vector<32x128xf32>
    %5 = arith.addf %2, %4 : vector<32x128xf32>
    %c0_5 = arith.constant 0 : index
    %c0_6 = arith.constant 0 : index
    %6 = vector.load %arg5[%c0_5, %c0_6] : memref<32x128xf32, #tpu.memory_space<vmem>>, vector<32x128xf32>
    tpu.vector_store %arg5[%c0_5, %c0_6], %5 {strides = array<i32>} : memref<32x128xf32, #tpu.memory_space<vmem>>, vector<32x128xf32>,
    return
  }
  func.func @transform_0(%arg0: i32, %arg1: i32) -> (i32, i32) {
    %c0_i32 = arith.constant 0 : i32
    %c0_i32_0 = arith.constant 0 : i32
    return %arg1, %c0_i32 : i32, i32
  }
  func.func @transform_1(%arg0: i32, %arg1: i32) -> (i32, i32) {
    %c0_i32 = arith.constant 0 : i32
    %c0_i32_0 = arith.constant 0 : i32
    return %c0_i32, %arg0 : i32, i32
  }
  func.func @transform_2(%arg0: i32, %arg1: i32) -> (i32, i32) {
    %c0_i32 = arith.constant 0 : i32
    %c0_i32_0 = arith.constant 0 : i32
    return %c0_i32, %arg0 : i32, i32
  }
  func.func @transform_3(%arg0: i32, %arg1: i32) -> (i32, i32) {
    %c0_i32 = arith.constant 0 : i32
    return %arg1, %arg0 : i32, i32
  }
}

module attributes {stable_mosaic.version = 11 : i64} {
  func.func @_bigru_kernel(%arg0: i32, %arg1: i32, %arg2: memref<64x256xf32, #tpu.memory_space<vmem>>, %arg3: memref<8x1xi32, #tpu.memory_space<vmem>>, %arg4: memref<1x256x384xf32, #tpu.memory_space<vmem>>, %arg5: memref<1x128x384xf32, #tpu.memory_space<vmem>>, %arg6: memref<1x1x384xf32, #tpu.memory_space<vmem>>, %arg7: memref<1x1x128xf32, #tpu.memory_space<vmem>>, %arg8: memref<1x8x128xf32, #tpu.memory_space<vmem>>, %arg9: memref<8x8x128xf32, #tpu.memory_space<vmem>>, %arg10: memref<1x8x128xf32, #tpu.memory_space<vmem>>, %arg11: memref<8x128xf32, #tpu.memory_space<vmem>>, %arg12: memref<64x384xf32, #tpu.memory_space<vmem>>, %arg13: memref<8x8x128xf32, #tpu.memory_space<vmem>>) attributes {dimension_semantics = [#tpu.dimension_semantics<parallel>, #tpu.dimension_semantics<arbitrary>], iteration_bounds = array<i64: 2, 1>, scalar_prefetch = 0 : i64, scratch_operands = 3 : i64, tpu.core_type = #tpu.core_type<tc>, window_params = [{transform_indices = @transform_0, window_bounds = array<i64: 64, 256>}, {pipeline_mode = #tpu.pipeline_mode<synchronous>, transform_indices = @transform_1, window_bounds = array<i64: 8, 1>}, {transform_indices = @transform_2, window_bounds = array<i64: 1, 256, 384>}, {transform_indices = @transform_3, window_bounds = array<i64: 1, 128, 384>}, {transform_indices = @transform_4, window_bounds = array<i64: 1, 1, 384>}, {transform_indices = @transform_5, window_bounds = array<i64: 1, 1, 128>}, {transform_indices = @transform_6, window_bounds = array<i64: 1, 8, 128>}, {transform_indices = @transform_7, window_bounds = array<i64: 8, 8, 128>}, {transform_indices = @transform_8, window_bounds = array<i64: 1, 8, 128>}]} {
    %c0_i32 = arith.constant 0 : i32
    %0 = arith.muli %arg0, %c0_i32 : i32
    %c2_i32 = arith.constant 2 : i32
    %1 = arith.muli %c2_i32, %arg0 : i32
    %c1_i32 = arith.constant 1 : i32
    %2 = arith.subi %c1_i32, %1 : i32
    %3 = arith.muli %2, %arg1 : i32
    %4 = arith.addi %0, %3 : i32
    %c8_i32 = arith.constant 8 : i32
    %5 = arith.muli %4, %c8_i32 : i32
    %c0_i32_0 = arith.constant 0 : i32
    %6 = arith.cmpi eq, %arg1, %c0_i32_0 : i32
    %7 = arith.extui %6 : i1 to i32
    %c0_i32_1 = arith.constant 0 : i32
    %8 = arith.cmpi ne, %7, %c0_i32_1 : i32
    scf.if %8 {
      %c0_131 = arith.constant 0 : index
      %c0_132 = arith.constant 0 : index
      %c0_133 = arith.constant 0 : index
      %410 = vector.load %arg8[%c0_131, %c0_132, %c0_133] : memref<1x8x128xf32, #tpu.memory_space<vmem>>, vector<1x8x128xf32>
      %411 = vector.shape_cast %410 : vector<1x8x128xf32> to vector<8x128xf32>
      %c0_134 = arith.constant 0 : index
      %c0_135 = arith.constant 0 : index
      %412 = vector.load %arg11[%c0_134, %c0_135] : memref<8x128xf32, #tpu.memory_space<vmem>>, vector<8x128xf32>
      tpu.vector_store %arg11[%c0_134, %c0_135], %411 {strides = array<i32>} : memref<8x128xf32, #tpu.memory_space<vmem>>, vector<8x128xf32>,
    } else {
    }
    %c0 = arith.constant 0 : index
    %c0_2 = arith.constant 0 : index
    %9 = vector.load %arg2[%c0, %c0_2] : memref<64x256xf32, #tpu.memory_space<vmem>>, vector<64x256xf32>
    %c0_3 = arith.constant 0 : index
    %c0_4 = arith.constant 0 : index
    %c0_5 = arith.constant 0 : index
    %10 = vector.load %arg4[%c0_3, %c0_4, %c0_5] : memref<1x256x384xf32, #tpu.memory_space<vmem>>, vector<1x256x384xf32>
    %11 = vector.shape_cast %10 : vector<1x256x384xf32> to vector<256x384xf32>
    %cst = arith.constant dense<0.000000e+00> : vector<64x384xf32>
    %12 = tpu.matmul %9, %11, %cst {dimension_numbers = #tpu.dot_dimension_numbers<[1], [0], [0], [1], [0, 0, 1, 1], [], []>} : vector<64x256xf32>, vector<256x384xf32>, vector<64x384xf32> -> vector<64x384xf32>
    %c0_6 = arith.constant 0 : index
    %c0_7 = arith.constant 0 : index
    %c0_8 = arith.constant 0 : index
    %13 = vector.load %arg6[%c0_6, %c0_7, %c0_8] : memref<1x1x384xf32, #tpu.memory_space<vmem>>, vector<1x1x384xf32>
    %14 = vector.shape_cast %13 : vector<1x1x384xf32> to vector<1x384xf32>
    %15 = vector.broadcast %14 : vector<1x384xf32> to vector<64x384xf32>
    %16 = arith.addf %12, %15 : vector<64x384xf32>
    %c0_9 = arith.constant 0 : index
    %c0_10 = arith.constant 0 : index
    %17 = vector.load %arg12[%c0_9, %c0_10] : memref<64x384xf32, #tpu.memory_space<vmem>>, vector<64x384xf32>
    tpu.vector_store %arg12[%c0_9, %c0_10], %16 {strides = array<i32>} : memref<64x384xf32, #tpu.memory_space<vmem>>, vector<64x384xf32>,
    %c0_11 = arith.constant 0 : index
    %c0_12 = arith.constant 0 : index
    %c0_13 = arith.constant 0 : index
    %18 = vector.load %arg5[%c0_11, %c0_12, %c0_13] : memref<1x128x384xf32, #tpu.memory_space<vmem>>, vector<1x128x384xf32>
    %19 = vector.shape_cast %18 : vector<1x128x384xf32> to vector<128x384xf32>
    %c0_14 = arith.constant 0 : index
    %c0_15 = arith.constant 0 : index
    %c0_16 = arith.constant 0 : index
    %20 = vector.load %arg7[%c0_14, %c0_15, %c0_16] : memref<1x1x128xf32, #tpu.memory_space<vmem>>, vector<1x1x128xf32>
    %21 = vector.shape_cast %20 : vector<1x1x128xf32> to vector<1x128xf32>
    %22 = vector.shape_cast %21 : vector<1x128xf32> to vector<1x128xf32>
    %23 = vector.broadcast %22 : vector<1x128xf32> to vector<8x128xf32>
    %c0_17 = arith.constant 0 : index
    %c0_18 = arith.constant 0 : index
    %24 = vector.load %arg3[%c0_17, %c0_18] : memref<8x1xi32, #tpu.memory_space<vmem>>, vector<8x1xi32>
    %25 = vector.shape_cast %24 : vector<8x1xi32> to vector<8x1xi32>
    %26 = vector.broadcast %25 : vector<8x1xi32> to vector<8x128xi32>
    %c0_19 = arith.constant 0 : index
    %c0_20 = arith.constant 0 : index
    %27 = vector.load %arg11[%c0_19, %c0_20] : memref<8x128xf32, #tpu.memory_space<vmem>>, vector<8x128xf32>
    %c0_i32_21 = arith.constant 0 : i32
    %c7_i32 = arith.constant 7 : i32
    %28 = arith.muli %arg0, %c7_i32 : i32
    %c2_i32_22 = arith.constant 2 : i32
    %29 = arith.muli %c2_i32_22, %arg0 : i32
    %c1_i32_23 = arith.constant 1 : i32
    %30 = arith.subi %c1_i32_23, %29 : i32
    %31 = arith.muli %30, %c0_i32_21 : i32
    %32 = arith.addi %28, %31 : i32
    %c8_i32_24 = arith.constant 8 : i32
    %33 = arith.muli %32, %c8_i32_24 : i32
    %34 = tpu.assume_multiple %33, 8 : i32
    %35 = arith.index_cast %34 : i32 to index
    %c0_25 = arith.constant 0 : index
    %36 = vector.load %arg12[%35, %c0_25] : memref<64x384xf32, #tpu.memory_space<vmem>>, vector<8x384xf32>
    %cst_26 = arith.constant dense<0.000000e+00> : vector<8x384xf32>
    %37 = tpu.matmul %27, %19, %cst_26 {dimension_numbers = #tpu.dot_dimension_numbers<[1], [0], [0], [1], [0, 0, 1, 1], [], []>} : vector<8x128xf32>, vector<128x384xf32>, vector<8x384xf32> -> vector<8x384xf32>
    %38 = vector.extract_strided_slice %36 {offsets = [0, 0], sizes = [8, 128], strides = [1, 1]} : vector<8x384xf32> to vector<8x128xf32>
    %39 = vector.extract_strided_slice %37 {offsets = [0, 0], sizes = [8, 128], strides = [1, 1]} : vector<8x384xf32> to vector<8x128xf32>
    %40 = arith.addf %38, %39 : vector<8x128xf32>
    %41 = arith.negf %40 : vector<8x128xf32>
    %42 = math.exp %41 : vector<8x128xf32>
    %cst_27 = arith.constant 1.000000e+00 : f32
    %43 = vector.broadcast %cst_27 : f32 to vector<8x128xf32>
    %44 = arith.addf %43, %42 : vector<8x128xf32>
    %45 = arith.divf %43, %44 : vector<8x128xf32>
    %46 = vector.extract_strided_slice %36 {offsets = [0, 128], sizes = [8, 128], strides = [1, 1]} : vector<8x384xf32> to vector<8x128xf32>
    %47 = vector.extract_strided_slice %37 {offsets = [0, 128], sizes = [8, 128], strides = [1, 1]} : vector<8x384xf32> to vector<8x128xf32>
    %48 = arith.addf %46, %47 : vector<8x128xf32>
    %49 = arith.negf %48 : vector<8x128xf32>
    %50 = math.exp %49 : vector<8x128xf32>
    %cst_28 = arith.constant 1.000000e+00 : f32
    %51 = vector.broadcast %cst_28 : f32 to vector<8x128xf32>
    %52 = arith.addf %51, %50 : vector<8x128xf32>
    %53 = arith.divf %51, %52 : vector<8x128xf32>
    %54 = vector.extract_strided_slice %36 {offsets = [0, 256], sizes = [8, 128], strides = [1, 1]} : vector<8x384xf32> to vector<8x128xf32>
    %55 = vector.extract_strided_slice %37 {offsets = [0, 256], sizes = [8, 128], strides = [1, 1]} : vector<8x384xf32> to vector<8x128xf32>
    %56 = arith.addf %55, %23 : vector<8x128xf32>
    %57 = arith.mulf %45, %56 : vector<8x128xf32>
    %58 = arith.addf %54, %57 : vector<8x128xf32>
    %59 = math.tanh %58 : vector<8x128xf32>
    %cst_29 = arith.constant 1.000000e+00 : f32
    %60 = vector.broadcast %cst_29 : f32 to vector<8x128xf32>
    %61 = arith.subf %60, %53 : vector<8x128xf32>
    %62 = arith.mulf %61, %59 : vector<8x128xf32>
    %63 = arith.mulf %53, %27 : vector<8x128xf32>
    %64 = arith.addf %62, %63 : vector<8x128xf32>
    %65 = arith.addi %5, %32 : i32
    %66 = vector.broadcast %65 : i32 to vector<8x128xi32>
    %67 = arith.cmpi slt, %66, %26 : vector<8x128xi32>
    %68 = arith.select %67, %64, %27 : vector<8x128xi1>, vector<8x128xf32>
    %cst_30 = arith.constant 0.000000e+00 : f32
    %69 = vector.broadcast %cst_30 : f32 to vector<8x128xf32>
    %70 = arith.select %67, %64, %69 : vector<8x128xi1>, vector<8x128xf32>
    %71 = arith.index_cast %32 : i32 to index
    %c0_31 = arith.constant 0 : index
    %c0_32 = arith.constant 0 : index
    %72 = vector.load %arg13[%71, %c0_31, %c0_32] : memref<8x8x128xf32, #tpu.memory_space<vmem>>, vector<1x8x128xf32>
    %73 = vector.shape_cast %72 : vector<1x8x128xf32> to vector<8x128xf32>
    %74 = vector.shape_cast %70 : vector<8x128xf32> to vector<1x8x128xf32>
    tpu.vector_store %arg13[%71, %c0_31, %c0_32], %74 {strides = array<i32>} : memref<8x8x128xf32, #tpu.memory_space<vmem>>, vector<1x8x128xf32>,
    %c1_i32_33 = arith.constant 1 : i32
    %c7_i32_34 = arith.constant 7 : i32
    %75 = arith.muli %arg0, %c7_i32_34 : i32
    %c2_i32_35 = arith.constant 2 : i32
    %76 = arith.muli %c2_i32_35, %arg0 : i32
    %c1_i32_36 = arith.constant 1 : i32
    %77 = arith.subi %c1_i32_36, %76 : i32
    %78 = arith.muli %77, %c1_i32_33 : i32
    %79 = arith.addi %75, %78 : i32
    %c8_i32_37 = arith.constant 8 : i32
    %80 = arith.muli %79, %c8_i32_37 : i32
    %81 = tpu.assume_multiple %80, 8 : i32
    %82 = arith.index_cast %81 : i32 to index
    %c0_38 = arith.constant 0 : index
    %83 = vector.load %arg12[%82, %c0_38] : memref<64x384xf32, #tpu.memory_space<vmem>>, vector<8x384xf32>
    %cst_39 = arith.constant dense<0.000000e+00> : vector<8x384xf32>
    %84 = tpu.matmul %68, %19, %cst_39 {dimension_numbers = #tpu.dot_dimension_numbers<[1], [0], [0], [1], [0, 0, 1, 1], [], []>} : vector<8x128xf32>, vector<128x384xf32>, vector<8x384xf32> -> vector<8x384xf32>
    %85 = vector.extract_strided_slice %83 {offsets = [0, 0], sizes = [8, 128], strides = [1, 1]} : vector<8x384xf32> to vector<8x128xf32>
    %86 = vector.extract_strided_slice %84 {offsets = [0, 0], sizes = [8, 128], strides = [1, 1]} : vector<8x384xf32> to vector<8x128xf32>
    %87 = arith.addf %85, %86 : vector<8x128xf32>
    %88 = arith.negf %87 : vector<8x128xf32>
    %89 = math.exp %88 : vector<8x128xf32>
    %cst_40 = arith.constant 1.000000e+00 : f32
    %90 = vector.broadcast %cst_40 : f32 to vector<8x128xf32>
    %91 = arith.addf %90, %89 : vector<8x128xf32>
    %92 = arith.divf %90, %91 : vector<8x128xf32>
    %93 = vector.extract_strided_slice %83 {offsets = [0, 128], sizes = [8, 128], strides = [1, 1]} : vector<8x384xf32> to vector<8x128xf32>
    %94 = vector.extract_strided_slice %84 {offsets = [0, 128], sizes = [8, 128], strides = [1, 1]} : vector<8x384xf32> to vector<8x128xf32>
    %95 = arith.addf %93, %94 : vector<8x128xf32>
    %96 = arith.negf %95 : vector<8x128xf32>
    %97 = math.exp %96 : vector<8x128xf32>
    %cst_41 = arith.constant 1.000000e+00 : f32
    %98 = vector.broadcast %cst_41 : f32 to vector<8x128xf32>
    %99 = arith.addf %98, %97 : vector<8x128xf32>
    %100 = arith.divf %98, %99 : vector<8x128xf32>
    %101 = vector.extract_strided_slice %83 {offsets = [0, 256], sizes = [8, 128], strides = [1, 1]} : vector<8x384xf32> to vector<8x128xf32>
    %102 = vector.extract_strided_slice %84 {offsets = [0, 256], sizes = [8, 128], strides = [1, 1]} : vector<8x384xf32> to vector<8x128xf32>
    %103 = arith.addf %102, %23 : vector<8x128xf32>
    %104 = arith.mulf %92, %103 : vector<8x128xf32>
    %105 = arith.addf %101, %104 : vector<8x128xf32>
    %106 = math.tanh %105 : vector<8x128xf32>
    %cst_42 = arith.constant 1.000000e+00 : f32
    %107 = vector.broadcast %cst_42 : f32 to vector<8x128xf32>
    %108 = arith.subf %107, %100 : vector<8x128xf32>
    %109 = arith.mulf %108, %106 : vector<8x128xf32>
    %110 = arith.mulf %100, %68 : vector<8x128xf32>
    %111 = arith.addf %109, %110 : vector<8x128xf32>
    %112 = arith.addi %5, %79 : i32
    %113 = vector.broadcast %112 : i32 to vector<8x128xi32>
    %114 = arith.cmpi slt, %113, %26 : vector<8x128xi32>
    %115 = arith.select %114, %111, %68 : vector<8x128xi1>, vector<8x128xf32>
    %cst_43 = arith.constant 0.000000e+00 : f32
    %116 = vector.broadcast %cst_43 : f32 to vector<8x128xf32>
    %117 = arith.select %114, %111, %116 : vector<8x128xi1>, vector<8x128xf32>
    %118 = arith.index_cast %79 : i32 to index
    %c0_44 = arith.constant 0 : index
    %c0_45 = arith.constant 0 : index
    %119 = vector.load %arg13[%118, %c0_44, %c0_45] : memref<8x8x128xf32, #tpu.memory_space<vmem>>, vector<1x8x128xf32>
    %120 = vector.shape_cast %119 : vector<1x8x128xf32> to vector<8x128xf32>
    %121 = vector.shape_cast %117 : vector<8x128xf32> to vector<1x8x128xf32>
    tpu.vector_store %arg13[%118, %c0_44, %c0_45], %121 {strides = array<i32>} : memref<8x8x128xf32, #tpu.memory_space<vmem>>, vector<1x8x128xf32>,
    %c2_i32_46 = arith.constant 2 : i32
    %c7_i32_47 = arith.constant 7 : i32
    %122 = arith.muli %arg0, %c7_i32_47 : i32
    %c2_i32_48 = arith.constant 2 : i32
    %123 = arith.muli %c2_i32_48, %arg0 : i32
    %c1_i32_49 = arith.constant 1 : i32
    %124 = arith.subi %c1_i32_49, %123 : i32
    %125 = arith.muli %124, %c2_i32_46 : i32
    %126 = arith.addi %122, %125 : i32
    %c8_i32_50 = arith.constant 8 : i32
    %127 = arith.muli %126, %c8_i32_50 : i32
    %128 = tpu.assume_multiple %127, 8 : i32
    %129 = arith.index_cast %128 : i32 to index
    %c0_51 = arith.constant 0 : index
    %130 = vector.load %arg12[%129, %c0_51] : memref<64x384xf32, #tpu.memory_space<vmem>>, vector<8x384xf32>
    %cst_52 = arith.constant dense<0.000000e+00> : vector<8x384xf32>
    %131 = tpu.matmul %115, %19, %cst_52 {dimension_numbers = #tpu.dot_dimension_numbers<[1], [0], [0], [1], [0, 0, 1, 1], [], []>} : vector<8x128xf32>, vector<128x384xf32>, vector<8x384xf32> -> vector<8x384xf32>
    %132 = vector.extract_strided_slice %130 {offsets = [0, 0], sizes = [8, 128], strides = [1, 1]} : vector<8x384xf32> to vector<8x128xf32>
    %133 = vector.extract_strided_slice %131 {offsets = [0, 0], sizes = [8, 128], strides = [1, 1]} : vector<8x384xf32> to vector<8x128xf32>
    %134 = arith.addf %132, %133 : vector<8x128xf32>
    %135 = arith.negf %134 : vector<8x128xf32>
    %136 = math.exp %135 : vector<8x128xf32>
    %cst_53 = arith.constant 1.000000e+00 : f32
    %137 = vector.broadcast %cst_53 : f32 to vector<8x128xf32>
    %138 = arith.addf %137, %136 : vector<8x128xf32>
    %139 = arith.divf %137, %138 : vector<8x128xf32>
    %140 = vector.extract_strided_slice %130 {offsets = [0, 128], sizes = [8, 128], strides = [1, 1]} : vector<8x384xf32> to vector<8x128xf32>
    %141 = vector.extract_strided_slice %131 {offsets = [0, 128], sizes = [8, 128], strides = [1, 1]} : vector<8x384xf32> to vector<8x128xf32>
    %142 = arith.addf %140, %141 : vector<8x128xf32>
    %143 = arith.negf %142 : vector<8x128xf32>
    %144 = math.exp %143 : vector<8x128xf32>
    %cst_54 = arith.constant 1.000000e+00 : f32
    %145 = vector.broadcast %cst_54 : f32 to vector<8x128xf32>
    %146 = arith.addf %145, %144 : vector<8x128xf32>
    %147 = arith.divf %145, %146 : vector<8x128xf32>
    %148 = vector.extract_strided_slice %130 {offsets = [0, 256], sizes = [8, 128], strides = [1, 1]} : vector<8x384xf32> to vector<8x128xf32>
    %149 = vector.extract_strided_slice %131 {offsets = [0, 256], sizes = [8, 128], strides = [1, 1]} : vector<8x384xf32> to vector<8x128xf32>
    %150 = arith.addf %149, %23 : vector<8x128xf32>
    %151 = arith.mulf %139, %150 : vector<8x128xf32>
    %152 = arith.addf %148, %151 : vector<8x128xf32>
    %153 = math.tanh %152 : vector<8x128xf32>
    %cst_55 = arith.constant 1.000000e+00 : f32
    %154 = vector.broadcast %cst_55 : f32 to vector<8x128xf32>
    %155 = arith.subf %154, %147 : vector<8x128xf32>
    %156 = arith.mulf %155, %153 : vector<8x128xf32>
    %157 = arith.mulf %147, %115 : vector<8x128xf32>
    %158 = arith.addf %156, %157 : vector<8x128xf32>
    %159 = arith.addi %5, %126 : i32
    %160 = vector.broadcast %159 : i32 to vector<8x128xi32>
    %161 = arith.cmpi slt, %160, %26 : vector<8x128xi32>
    %162 = arith.select %161, %158, %115 : vector<8x128xi1>, vector<8x128xf32>
    %cst_56 = arith.constant 0.000000e+00 : f32
    %163 = vector.broadcast %cst_56 : f32 to vector<8x128xf32>
    %164 = arith.select %161, %158, %163 : vector<8x128xi1>, vector<8x128xf32>
    %165 = arith.index_cast %126 : i32 to index
    %c0_57 = arith.constant 0 : index
    %c0_58 = arith.constant 0 : index
    %166 = vector.load %arg13[%165, %c0_57, %c0_58] : memref<8x8x128xf32, #tpu.memory_space<vmem>>, vector<1x8x128xf32>
    %167 = vector.shape_cast %166 : vector<1x8x128xf32> to vector<8x128xf32>
    %168 = vector.shape_cast %164 : vector<8x128xf32> to vector<1x8x128xf32>
    tpu.vector_store %arg13[%165, %c0_57, %c0_58], %168 {strides = array<i32>} : memref<8x8x128xf32, #tpu.memory_space<vmem>>, vector<1x8x128xf32>,
    %c3_i32 = arith.constant 3 : i32
    %c7_i32_59 = arith.constant 7 : i32
    %169 = arith.muli %arg0, %c7_i32_59 : i32
    %c2_i32_60 = arith.constant 2 : i32
    %170 = arith.muli %c2_i32_60, %arg0 : i32
    %c1_i32_61 = arith.constant 1 : i32
    %171 = arith.subi %c1_i32_61, %170 : i32
    %172 = arith.muli %171, %c3_i32 : i32
    %173 = arith.addi %169, %172 : i32
    %c8_i32_62 = arith.constant 8 : i32
    %174 = arith.muli %173, %c8_i32_62 : i32
    %175 = tpu.assume_multiple %174, 8 : i32
    %176 = arith.index_cast %175 : i32 to index
    %c0_63 = arith.constant 0 : index
    %177 = vector.load %arg12[%176, %c0_63] : memref<64x384xf32, #tpu.memory_space<vmem>>, vector<8x384xf32>
    %cst_64 = arith.constant dense<0.000000e+00> : vector<8x384xf32>
    %178 = tpu.matmul %162, %19, %cst_64 {dimension_numbers = #tpu.dot_dimension_numbers<[1], [0], [0], [1], [0, 0, 1, 1], [], []>} : vector<8x128xf32>, vector<128x384xf32>, vector<8x384xf32> -> vector<8x384xf32>
    %179 = vector.extract_strided_slice %177 {offsets = [0, 0], sizes = [8, 128], strides = [1, 1]} : vector<8x384xf32> to vector<8x128xf32>
    %180 = vector.extract_strided_slice %178 {offsets = [0, 0], sizes = [8, 128], strides = [1, 1]} : vector<8x384xf32> to vector<8x128xf32>
    %181 = arith.addf %179, %180 : vector<8x128xf32>
    %182 = arith.negf %181 : vector<8x128xf32>
    %183 = math.exp %182 : vector<8x128xf32>
    %cst_65 = arith.constant 1.000000e+00 : f32
    %184 = vector.broadcast %cst_65 : f32 to vector<8x128xf32>
    %185 = arith.addf %184, %183 : vector<8x128xf32>
    %186 = arith.divf %184, %185 : vector<8x128xf32>
    %187 = vector.extract_strided_slice %177 {offsets = [0, 128], sizes = [8, 128], strides = [1, 1]} : vector<8x384xf32> to vector<8x128xf32>
    %188 = vector.extract_strided_slice %178 {offsets = [0, 128], sizes = [8, 128], strides = [1, 1]} : vector<8x384xf32> to vector<8x128xf32>
    %189 = arith.addf %187, %188 : vector<8x128xf32>
    %190 = arith.negf %189 : vector<8x128xf32>
    %191 = math.exp %190 : vector<8x128xf32>
    %cst_66 = arith.constant 1.000000e+00 : f32
    %192 = vector.broadcast %cst_66 : f32 to vector<8x128xf32>
    %193 = arith.addf %192, %191 : vector<8x128xf32>
    %194 = arith.divf %192, %193 : vector<8x128xf32>
    %195 = vector.extract_strided_slice %177 {offsets = [0, 256], sizes = [8, 128], strides = [1, 1]} : vector<8x384xf32> to vector<8x128xf32>
    %196 = vector.extract_strided_slice %178 {offsets = [0, 256], sizes = [8, 128], strides = [1, 1]} : vector<8x384xf32> to vector<8x128xf32>
    %197 = arith.addf %196, %23 : vector<8x128xf32>
    %198 = arith.mulf %186, %197 : vector<8x128xf32>
    %199 = arith.addf %195, %198 : vector<8x128xf32>
    %200 = math.tanh %199 : vector<8x128xf32>
    %cst_67 = arith.constant 1.000000e+00 : f32
    %201 = vector.broadcast %cst_67 : f32 to vector<8x128xf32>
    %202 = arith.subf %201, %194 : vector<8x128xf32>
    %203 = arith.mulf %202, %200 : vector<8x128xf32>
    %204 = arith.mulf %194, %162 : vector<8x128xf32>
    %205 = arith.addf %203, %204 : vector<8x128xf32>
    %206 = arith.addi %5, %173 : i32
    %207 = vector.broadcast %206 : i32 to vector<8x128xi32>
    %208 = arith.cmpi slt, %207, %26 : vector<8x128xi32>
    %209 = arith.select %208, %205, %162 : vector<8x128xi1>, vector<8x128xf32>
    %cst_68 = arith.constant 0.000000e+00 : f32
    %210 = vector.broadcast %cst_68 : f32 to vector<8x128xf32>
    %211 = arith.select %208, %205, %210 : vector<8x128xi1>, vector<8x128xf32>
    %212 = arith.index_cast %173 : i32 to index
    %c0_69 = arith.constant 0 : index
    %c0_70 = arith.constant 0 : index
    %213 = vector.load %arg13[%212, %c0_69, %c0_70] : memref<8x8x128xf32, #tpu.memory_space<vmem>>, vector<1x8x128xf32>
    %214 = vector.shape_cast %213 : vector<1x8x128xf32> to vector<8x128xf32>
    %215 = vector.shape_cast %211 : vector<8x128xf32> to vector<1x8x128xf32>
    tpu.vector_store %arg13[%212, %c0_69, %c0_70], %215 {strides = array<i32>} : memref<8x8x128xf32, #tpu.memory_space<vmem>>, vector<1x8x128xf32>,
    %c4_i32 = arith.constant 4 : i32
    %c7_i32_71 = arith.constant 7 : i32
    %216 = arith.muli %arg0, %c7_i32_71 : i32
    %c2_i32_72 = arith.constant 2 : i32
    %217 = arith.muli %c2_i32_72, %arg0 : i32
    %c1_i32_73 = arith.constant 1 : i32
    %218 = arith.subi %c1_i32_73, %217 : i32
    %219 = arith.muli %218, %c4_i32 : i32
    %220 = arith.addi %216, %219 : i32
    %c8_i32_74 = arith.constant 8 : i32
    %221 = arith.muli %220, %c8_i32_74 : i32
    %222 = tpu.assume_multiple %221, 8 : i32
    %223 = arith.index_cast %222 : i32 to index
    %c0_75 = arith.constant 0 : index
    %224 = vector.load %arg12[%223, %c0_75] : memref<64x384xf32, #tpu.memory_space<vmem>>, vector<8x384xf32>
    %cst_76 = arith.constant dense<0.000000e+00> : vector<8x384xf32>
    %225 = tpu.matmul %209, %19, %cst_76 {dimension_numbers = #tpu.dot_dimension_numbers<[1], [0], [0], [1], [0, 0, 1, 1], [], []>} : vector<8x128xf32>, vector<128x384xf32>, vector<8x384xf32> -> vector<8x384xf32>
    %226 = vector.extract_strided_slice %224 {offsets = [0, 0], sizes = [8, 128], strides = [1, 1]} : vector<8x384xf32> to vector<8x128xf32>
    %227 = vector.extract_strided_slice %225 {offsets = [0, 0], sizes = [8, 128], strides = [1, 1]} : vector<8x384xf32> to vector<8x128xf32>
    %228 = arith.addf %226, %227 : vector<8x128xf32>
    %229 = arith.negf %228 : vector<8x128xf32>
    %230 = math.exp %229 : vector<8x128xf32>
    %cst_77 = arith.constant 1.000000e+00 : f32
    %231 = vector.broadcast %cst_77 : f32 to vector<8x128xf32>
    %232 = arith.addf %231, %230 : vector<8x128xf32>
    %233 = arith.divf %231, %232 : vector<8x128xf32>
    %234 = vector.extract_strided_slice %224 {offsets = [0, 128], sizes = [8, 128], strides = [1, 1]} : vector<8x384xf32> to vector<8x128xf32>
    %235 = vector.extract_strided_slice %225 {offsets = [0, 128], sizes = [8, 128], strides = [1, 1]} : vector<8x384xf32> to vector<8x128xf32>
    %236 = arith.addf %234, %235 : vector<8x128xf32>
    %237 = arith.negf %236 : vector<8x128xf32>
    %238 = math.exp %237 : vector<8x128xf32>
    %cst_78 = arith.constant 1.000000e+00 : f32
    %239 = vector.broadcast %cst_78 : f32 to vector<8x128xf32>
    %240 = arith.addf %239, %238 : vector<8x128xf32>
    %241 = arith.divf %239, %240 : vector<8x128xf32>
    %242 = vector.extract_strided_slice %224 {offsets = [0, 256], sizes = [8, 128], strides = [1, 1]} : vector<8x384xf32> to vector<8x128xf32>
    %243 = vector.extract_strided_slice %225 {offsets = [0, 256], sizes = [8, 128], strides = [1, 1]} : vector<8x384xf32> to vector<8x128xf32>
    %244 = arith.addf %243, %23 : vector<8x128xf32>
    %245 = arith.mulf %233, %244 : vector<8x128xf32>
    %246 = arith.addf %242, %245 : vector<8x128xf32>
    %247 = math.tanh %246 : vector<8x128xf32>
    %cst_79 = arith.constant 1.000000e+00 : f32
    %248 = vector.broadcast %cst_79 : f32 to vector<8x128xf32>
    %249 = arith.subf %248, %241 : vector<8x128xf32>
    %250 = arith.mulf %249, %247 : vector<8x128xf32>
    %251 = arith.mulf %241, %209 : vector<8x128xf32>
    %252 = arith.addf %250, %251 : vector<8x128xf32>
    %253 = arith.addi %5, %220 : i32
    %254 = vector.broadcast %253 : i32 to vector<8x128xi32>
    %255 = arith.cmpi slt, %254, %26 : vector<8x128xi32>
    %256 = arith.select %255, %252, %209 : vector<8x128xi1>, vector<8x128xf32>
    %cst_80 = arith.constant 0.000000e+00 : f32
    %257 = vector.broadcast %cst_80 : f32 to vector<8x128xf32>
    %258 = arith.select %255, %252, %257 : vector<8x128xi1>, vector<8x128xf32>
    %259 = arith.index_cast %220 : i32 to index
    %c0_81 = arith.constant 0 : index
    %c0_82 = arith.constant 0 : index
    %260 = vector.load %arg13[%259, %c0_81, %c0_82] : memref<8x8x128xf32, #tpu.memory_space<vmem>>, vector<1x8x128xf32>
    %261 = vector.shape_cast %260 : vector<1x8x128xf32> to vector<8x128xf32>
    %262 = vector.shape_cast %258 : vector<8x128xf32> to vector<1x8x128xf32>
    tpu.vector_store %arg13[%259, %c0_81, %c0_82], %262 {strides = array<i32>} : memref<8x8x128xf32, #tpu.memory_space<vmem>>, vector<1x8x128xf32>,
    %c5_i32 = arith.constant 5 : i32
    %c7_i32_83 = arith.constant 7 : i32
    %263 = arith.muli %arg0, %c7_i32_83 : i32
    %c2_i32_84 = arith.constant 2 : i32
    %264 = arith.muli %c2_i32_84, %arg0 : i32
    %c1_i32_85 = arith.constant 1 : i32
    %265 = arith.subi %c1_i32_85, %264 : i32
    %266 = arith.muli %265, %c5_i32 : i32
    %267 = arith.addi %263, %266 : i32
    %c8_i32_86 = arith.constant 8 : i32
    %268 = arith.muli %267, %c8_i32_86 : i32
    %269 = tpu.assume_multiple %268, 8 : i32
    %270 = arith.index_cast %269 : i32 to index
    %c0_87 = arith.constant 0 : index
    %271 = vector.load %arg12[%270, %c0_87] : memref<64x384xf32, #tpu.memory_space<vmem>>, vector<8x384xf32>
    %cst_88 = arith.constant dense<0.000000e+00> : vector<8x384xf32>
    %272 = tpu.matmul %256, %19, %cst_88 {dimension_numbers = #tpu.dot_dimension_numbers<[1], [0], [0], [1], [0, 0, 1, 1], [], []>} : vector<8x128xf32>, vector<128x384xf32>, vector<8x384xf32> -> vector<8x384xf32>
    %273 = vector.extract_strided_slice %271 {offsets = [0, 0], sizes = [8, 128], strides = [1, 1]} : vector<8x384xf32> to vector<8x128xf32>
    %274 = vector.extract_strided_slice %272 {offsets = [0, 0], sizes = [8, 128], strides = [1, 1]} : vector<8x384xf32> to vector<8x128xf32>
    %275 = arith.addf %273, %274 : vector<8x128xf32>
    %276 = arith.negf %275 : vector<8x128xf32>
    %277 = math.exp %276 : vector<8x128xf32>
    %cst_89 = arith.constant 1.000000e+00 : f32
    %278 = vector.broadcast %cst_89 : f32 to vector<8x128xf32>
    %279 = arith.addf %278, %277 : vector<8x128xf32>
    %280 = arith.divf %278, %279 : vector<8x128xf32>
    %281 = vector.extract_strided_slice %271 {offsets = [0, 128], sizes = [8, 128], strides = [1, 1]} : vector<8x384xf32> to vector<8x128xf32>
    %282 = vector.extract_strided_slice %272 {offsets = [0, 128], sizes = [8, 128], strides = [1, 1]} : vector<8x384xf32> to vector<8x128xf32>
    %283 = arith.addf %281, %282 : vector<8x128xf32>
    %284 = arith.negf %283 : vector<8x128xf32>
    %285 = math.exp %284 : vector<8x128xf32>
    %cst_90 = arith.constant 1.000000e+00 : f32
    %286 = vector.broadcast %cst_90 : f32 to vector<8x128xf32>
    %287 = arith.addf %286, %285 : vector<8x128xf32>
    %288 = arith.divf %286, %287 : vector<8x128xf32>
    %289 = vector.extract_strided_slice %271 {offsets = [0, 256], sizes = [8, 128], strides = [1, 1]} : vector<8x384xf32> to vector<8x128xf32>
    %290 = vector.extract_strided_slice %272 {offsets = [0, 256], sizes = [8, 128], strides = [1, 1]} : vector<8x384xf32> to vector<8x128xf32>
    %291 = arith.addf %290, %23 : vector<8x128xf32>
    %292 = arith.mulf %280, %291 : vector<8x128xf32>
    %293 = arith.addf %289, %292 : vector<8x128xf32>
    %294 = math.tanh %293 : vector<8x128xf32>
    %cst_91 = arith.constant 1.000000e+00 : f32
    %295 = vector.broadcast %cst_91 : f32 to vector<8x128xf32>
    %296 = arith.subf %295, %288 : vector<8x128xf32>
    %297 = arith.mulf %296, %294 : vector<8x128xf32>
    %298 = arith.mulf %288, %256 : vector<8x128xf32>
    %299 = arith.addf %297, %298 : vector<8x128xf32>
    %300 = arith.addi %5, %267 : i32
    %301 = vector.broadcast %300 : i32 to vector<8x128xi32>
    %302 = arith.cmpi slt, %301, %26 : vector<8x128xi32>
    %303 = arith.select %302, %299, %256 : vector<8x128xi1>, vector<8x128xf32>
    %cst_92 = arith.constant 0.000000e+00 : f32
    %304 = vector.broadcast %cst_92 : f32 to vector<8x128xf32>
    %305 = arith.select %302, %299, %304 : vector<8x128xi1>, vector<8x128xf32>
    %306 = arith.index_cast %267 : i32 to index
    %c0_93 = arith.constant 0 : index
    %c0_94 = arith.constant 0 : index
    %307 = vector.load %arg13[%306, %c0_93, %c0_94] : memref<8x8x128xf32, #tpu.memory_space<vmem>>, vector<1x8x128xf32>
    %308 = vector.shape_cast %307 : vector<1x8x128xf32> to vector<8x128xf32>
    %309 = vector.shape_cast %305 : vector<8x128xf32> to vector<1x8x128xf32>
    tpu.vector_store %arg13[%306, %c0_93, %c0_94], %309 {strides = array<i32>} : memref<8x8x128xf32, #tpu.memory_space<vmem>>, vector<1x8x128xf32>,
    %c6_i32 = arith.constant 6 : i32
    %c7_i32_95 = arith.constant 7 : i32
    %310 = arith.muli %arg0, %c7_i32_95 : i32
    %c2_i32_96 = arith.constant 2 : i32
    %311 = arith.muli %c2_i32_96, %arg0 : i32
    %c1_i32_97 = arith.constant 1 : i32
    %312 = arith.subi %c1_i32_97, %311 : i32
    %313 = arith.muli %312, %c6_i32 : i32
    %314 = arith.addi %310, %313 : i32
    %c8_i32_98 = arith.constant 8 : i32
    %315 = arith.muli %314, %c8_i32_98 : i32
    %316 = tpu.assume_multiple %315, 8 : i32
    %317 = arith.index_cast %316 : i32 to index
    %c0_99 = arith.constant 0 : index
    %318 = vector.load %arg12[%317, %c0_99] : memref<64x384xf32, #tpu.memory_space<vmem>>, vector<8x384xf32>
    %cst_100 = arith.constant dense<0.000000e+00> : vector<8x384xf32>
    %319 = tpu.matmul %303, %19, %cst_100 {dimension_numbers = #tpu.dot_dimension_numbers<[1], [0], [0], [1], [0, 0, 1, 1], [], []>} : vector<8x128xf32>, vector<128x384xf32>, vector<8x384xf32> -> vector<8x384xf32>
    %320 = vector.extract_strided_slice %318 {offsets = [0, 0], sizes = [8, 128], strides = [1, 1]} : vector<8x384xf32> to vector<8x128xf32>
    %321 = vector.extract_strided_slice %319 {offsets = [0, 0], sizes = [8, 128], strides = [1, 1]} : vector<8x384xf32> to vector<8x128xf32>
    %322 = arith.addf %320, %321 : vector<8x128xf32>
    %323 = arith.negf %322 : vector<8x128xf32>
    %324 = math.exp %323 : vector<8x128xf32>
    %cst_101 = arith.constant 1.000000e+00 : f32
    %325 = vector.broadcast %cst_101 : f32 to vector<8x128xf32>
    %326 = arith.addf %325, %324 : vector<8x128xf32>
    %327 = arith.divf %325, %326 : vector<8x128xf32>
    %328 = vector.extract_strided_slice %318 {offsets = [0, 128], sizes = [8, 128], strides = [1, 1]} : vector<8x384xf32> to vector<8x128xf32>
    %329 = vector.extract_strided_slice %319 {offsets = [0, 128], sizes = [8, 128], strides = [1, 1]} : vector<8x384xf32> to vector<8x128xf32>
    %330 = arith.addf %328, %329 : vector<8x128xf32>
    %331 = arith.negf %330 : vector<8x128xf32>
    %332 = math.exp %331 : vector<8x128xf32>
    %cst_102 = arith.constant 1.000000e+00 : f32
    %333 = vector.broadcast %cst_102 : f32 to vector<8x128xf32>
    %334 = arith.addf %333, %332 : vector<8x128xf32>
    %335 = arith.divf %333, %334 : vector<8x128xf32>
    %336 = vector.extract_strided_slice %318 {offsets = [0, 256], sizes = [8, 128], strides = [1, 1]} : vector<8x384xf32> to vector<8x128xf32>
    %337 = vector.extract_strided_slice %319 {offsets = [0, 256], sizes = [8, 128], strides = [1, 1]} : vector<8x384xf32> to vector<8x128xf32>
    %338 = arith.addf %337, %23 : vector<8x128xf32>
    %339 = arith.mulf %327, %338 : vector<8x128xf32>
    %340 = arith.addf %336, %339 : vector<8x128xf32>
    %341 = math.tanh %340 : vector<8x128xf32>
    %cst_103 = arith.constant 1.000000e+00 : f32
    %342 = vector.broadcast %cst_103 : f32 to vector<8x128xf32>
    %343 = arith.subf %342, %335 : vector<8x128xf32>
    %344 = arith.mulf %343, %341 : vector<8x128xf32>
    %345 = arith.mulf %335, %303 : vector<8x128xf32>
    %346 = arith.addf %344, %345 : vector<8x128xf32>
    %347 = arith.addi %5, %314 : i32
    %348 = vector.broadcast %347 : i32 to vector<8x128xi32>
    %349 = arith.cmpi slt, %348, %26 : vector<8x128xi32>
    %350 = arith.select %349, %346, %303 : vector<8x128xi1>, vector<8x128xf32>
    %cst_104 = arith.constant 0.000000e+00 : f32
    %351 = vector.broadcast %cst_104 : f32 to vector<8x128xf32>
    %352 = arith.select %349, %346, %351 : vector<8x128xi1>, vector<8x128xf32>
    %353 = arith.index_cast %314 : i32 to index
    %c0_105 = arith.constant 0 : index
    %c0_106 = arith.constant 0 : index
    %354 = vector.load %arg13[%353, %c0_105, %c0_106] : memref<8x8x128xf32, #tpu.memory_space<vmem>>, vector<1x8x128xf32>
    %355 = vector.shape_cast %354 : vector<1x8x128xf32> to vector<8x128xf32>
    %356 = vector.shape_cast %352 : vector<8x128xf32> to vector<1x8x128xf32>
    tpu.vector_store %arg13[%353, %c0_105, %c0_106], %356 {strides = array<i32>} : memref<8x8x128xf32, #tpu.memory_space<vmem>>, vector<1x8x128xf32>,
    %c7_i32_107 = arith.constant 7 : i32
    %c7_i32_108 = arith.constant 7 : i32
    %357 = arith.muli %arg0, %c7_i32_108 : i32
    %c2_i32_109 = arith.constant 2 : i32
    %358 = arith.muli %c2_i32_109, %arg0 : i32
    %c1_i32_110 = arith.constant 1 : i32
    %359 = arith.subi %c1_i32_110, %358 : i32
    %360 = arith.muli %359, %c7_i32_107 : i32
    %361 = arith.addi %357, %360 : i32
    %c8_i32_111 = arith.constant 8 : i32
    %362 = arith.muli %361, %c8_i32_111 : i32
    %363 = tpu.assume_multiple %362, 8 : i32
    %364 = arith.index_cast %363 : i32 to index
    %c0_112 = arith.constant 0 : index
    %365 = vector.load %arg12[%364, %c0_112] : memref<64x384xf32, #tpu.memory_space<vmem>>, vector<8x384xf32>
    %cst_113 = arith.constant dense<0.000000e+00> : vector<8x384xf32>
    %366 = tpu.matmul %350, %19, %cst_113 {dimension_numbers = #tpu.dot_dimension_numbers<[1], [0], [0], [1], [0, 0, 1, 1], [], []>} : vector<8x128xf32>, vector<128x384xf32>, vector<8x384xf32> -> vector<8x384xf32>
    %367 = vector.extract_strided_slice %365 {offsets = [0, 0], sizes = [8, 128], strides = [1, 1]} : vector<8x384xf32> to vector<8x128xf32>
    %368 = vector.extract_strided_slice %366 {offsets = [0, 0], sizes = [8, 128], strides = [1, 1]} : vector<8x384xf32> to vector<8x128xf32>
    %369 = arith.addf %367, %368 : vector<8x128xf32>
    %370 = arith.negf %369 : vector<8x128xf32>
    %371 = math.exp %370 : vector<8x128xf32>
    %cst_114 = arith.constant 1.000000e+00 : f32
    %372 = vector.broadcast %cst_114 : f32 to vector<8x128xf32>
    %373 = arith.addf %372, %371 : vector<8x128xf32>
    %374 = arith.divf %372, %373 : vector<8x128xf32>
    %375 = vector.extract_strided_slice %365 {offsets = [0, 128], sizes = [8, 128], strides = [1, 1]} : vector<8x384xf32> to vector<8x128xf32>
    %376 = vector.extract_strided_slice %366 {offsets = [0, 128], sizes = [8, 128], strides = [1, 1]} : vector<8x384xf32> to vector<8x128xf32>
    %377 = arith.addf %375, %376 : vector<8x128xf32>
    %378 = arith.negf %377 : vector<8x128xf32>
    %379 = math.exp %378 : vector<8x128xf32>
    %cst_115 = arith.constant 1.000000e+00 : f32
    %380 = vector.broadcast %cst_115 : f32 to vector<8x128xf32>
    %381 = arith.addf %380, %379 : vector<8x128xf32>
    %382 = arith.divf %380, %381 : vector<8x128xf32>
    %383 = vector.extract_strided_slice %365 {offsets = [0, 256], sizes = [8, 128], strides = [1, 1]} : vector<8x384xf32> to vector<8x128xf32>
    %384 = vector.extract_strided_slice %366 {offsets = [0, 256], sizes = [8, 128], strides = [1, 1]} : vector<8x384xf32> to vector<8x128xf32>
    %385 = arith.addf %384, %23 : vector<8x128xf32>
    %386 = arith.mulf %374, %385 : vector<8x128xf32>
    %387 = arith.addf %383, %386 : vector<8x128xf32>
    %388 = math.tanh %387 : vector<8x128xf32>
    %cst_116 = arith.constant 1.000000e+00 : f32
    %389 = vector.broadcast %cst_116 : f32 to vector<8x128xf32>
    %390 = arith.subf %389, %382 : vector<8x128xf32>
    %391 = arith.mulf %390, %388 : vector<8x128xf32>
    %392 = arith.mulf %382, %350 : vector<8x128xf32>
    %393 = arith.addf %391, %392 : vector<8x128xf32>
    %394 = arith.addi %5, %361 : i32
    %395 = vector.broadcast %394 : i32 to vector<8x128xi32>
    %396 = arith.cmpi slt, %395, %26 : vector<8x128xi32>
    %397 = arith.select %396, %393, %350 : vector<8x128xi1>, vector<8x128xf32>
    %cst_117 = arith.constant 0.000000e+00 : f32
    %398 = vector.broadcast %cst_117 : f32 to vector<8x128xf32>
    %399 = arith.select %396, %393, %398 : vector<8x128xi1>, vector<8x128xf32>
    %400 = arith.index_cast %361 : i32 to index
    %c0_118 = arith.constant 0 : index
    %c0_119 = arith.constant 0 : index
    %401 = vector.load %arg13[%400, %c0_118, %c0_119] : memref<8x8x128xf32, #tpu.memory_space<vmem>>, vector<1x8x128xf32>
    %402 = vector.shape_cast %401 : vector<1x8x128xf32> to vector<8x128xf32>
    %403 = vector.shape_cast %399 : vector<8x128xf32> to vector<1x8x128xf32>
    tpu.vector_store %arg13[%400, %c0_118, %c0_119], %403 {strides = array<i32>} : memref<8x8x128xf32, #tpu.memory_space<vmem>>, vector<1x8x128xf32>,
    %c8_i32_120 = arith.constant 8 : i32
    %c0_121 = arith.constant 0 : index
    %c0_122 = arith.constant 0 : index
    %404 = vector.load %arg11[%c0_121, %c0_122] : memref<8x128xf32, #tpu.memory_space<vmem>>, vector<8x128xf32>
    tpu.vector_store %arg11[%c0_121, %c0_122], %397 {strides = array<i32>} : memref<8x128xf32, #tpu.memory_space<vmem>>, vector<8x128xf32>,
    %c0_123 = arith.constant 0 : index
    %c0_124 = arith.constant 0 : index
    %c0_125 = arith.constant 0 : index
    %405 = vector.load %arg13[%c0_123, %c0_124, %c0_125] : memref<8x8x128xf32, #tpu.memory_space<vmem>>, vector<8x8x128xf32>
    %c0_126 = arith.constant 0 : index
    %c0_127 = arith.constant 0 : index
    %c0_128 = arith.constant 0 : index
    %406 = vector.load %arg9[%c0_126, %c0_127, %c0_128] : memref<8x8x128xf32, #tpu.memory_space<vmem>>, vector<8x8x128xf32>
    tpu.vector_store %arg9[%c0_126, %c0_127, %c0_128], %405 {strides = array<i32>} : memref<8x8x128xf32, #tpu.memory_space<vmem>>, vector<8x8x128xf32>,
    %c0_i32_129 = arith.constant 0 : i32
    %407 = arith.cmpi eq, %arg1, %c0_i32_129 : i32
    %408 = arith.extui %407 : i1 to i32
    %c0_i32_130 = arith.constant 0 : i32
    %409 = arith.cmpi ne, %408, %c0_i32_130 : i32
    scf.if %409 {
      %c0_131 = arith.constant 0 : index
      %c0_132 = arith.constant 0 : index
      %c0_133 = arith.constant 0 : index
      %410 = vector.load %arg10[%c0_131, %c0_132, %c0_133] : memref<1x8x128xf32, #tpu.memory_space<vmem>>, vector<1x8x128xf32>
      %411 = vector.shape_cast %410 : vector<1x8x128xf32> to vector<8x128xf32>
      %412 = vector.shape_cast %397 : vector<8x128xf32> to vector<1x8x128xf32>
      tpu.vector_store %arg10[%c0_131, %c0_132, %c0_133], %412 {strides = array<i32>} : memref<1x8x128xf32, #tpu.memory_space<vmem>>, vector<1x8x128xf32>,
    } else {
    }
    return
  }
  func.func @transform_0(%arg0: i32, %arg1: i32) -> (i32, i32) {
    %c0_i32 = arith.constant 0 : i32
    %0 = arith.muli %arg0, %c0_i32 : i32
    %c2_i32 = arith.constant 2 : i32
    %1 = arith.muli %c2_i32, %arg0 : i32
    %c1_i32 = arith.constant 1 : i32
    %2 = arith.subi %c1_i32, %1 : i32
    %3 = arith.muli %2, %arg1 : i32
    %4 = arith.addi %0, %3 : i32
    %c0_i32_0 = arith.constant 0 : i32
    %c0_i32_1 = arith.constant 0 : i32
    return %4, %c0_i32_0 : i32, i32
  }
  func.func @transform_1(%arg0: i32, %arg1: i32) -> (i32, i32) {
    %c0_i32 = arith.constant 0 : i32
    %c0_i32_0 = arith.constant 0 : i32
    %c0_i32_1 = arith.constant 0 : i32
    return %c0_i32, %c0_i32_0 : i32, i32
  }
  func.func @transform_2(%arg0: i32, %arg1: i32) -> (i32, i32, i32) {
    %c0_i32 = arith.constant 0 : i32
    %c0_i32_0 = arith.constant 0 : i32
    %c0_i32_1 = arith.constant 0 : i32
    return %arg0, %c0_i32, %c0_i32_0 : i32, i32, i32
  }
  func.func @transform_3(%arg0: i32, %arg1: i32) -> (i32, i32, i32) {
    %c0_i32 = arith.constant 0 : i32
    %c0_i32_0 = arith.constant 0 : i32
    %c0_i32_1 = arith.constant 0 : i32
    return %arg0, %c0_i32, %c0_i32_0 : i32, i32, i32
  }
  func.func @transform_4(%arg0: i32, %arg1: i32) -> (i32, i32, i32) {
    %c0_i32 = arith.constant 0 : i32
    %c0_i32_0 = arith.constant 0 : i32
    %c0_i32_1 = arith.constant 0 : i32
    return %arg0, %c0_i32, %c0_i32_0 : i32, i32, i32
  }
  func.func @transform_5(%arg0: i32, %arg1: i32) -> (i32, i32, i32) {
    %c0_i32 = arith.constant 0 : i32
    %c0_i32_0 = arith.constant 0 : i32
    %c0_i32_1 = arith.constant 0 : i32
    return %arg0, %c0_i32, %c0_i32_0 : i32, i32, i32
  }
  func.func @transform_6(%arg0: i32, %arg1: i32) -> (i32, i32, i32) {
    %c0_i32 = arith.constant 0 : i32
    %c0_i32_0 = arith.constant 0 : i32
    %c0_i32_1 = arith.constant 0 : i32
    return %arg0, %c0_i32, %c0_i32_0 : i32, i32, i32
  }
  func.func @transform_7(%arg0: i32, %arg1: i32) -> (i32, i32, i32) {
    %c0_i32 = arith.constant 0 : i32
    %0 = arith.muli %arg0, %c0_i32 : i32
    %c2_i32 = arith.constant 2 : i32
    %1 = arith.muli %c2_i32, %arg0 : i32
    %c1_i32 = arith.constant 1 : i32
    %2 = arith.subi %c1_i32, %1 : i32
    %3 = arith.muli %2, %arg1 : i32
    %4 = arith.addi %0, %3 : i32
    %c0_i32_0 = arith.constant 0 : i32
    %c0_i32_1 = arith.constant 0 : i32
    return %4, %c0_i32_0, %arg0 : i32, i32, i32
  }
  func.func @transform_8(%arg0: i32, %arg1: i32) -> (i32, i32, i32) {
    %c0_i32 = arith.constant 0 : i32
    %c0_i32_0 = arith.constant 0 : i32
    %c0_i32_1 = arith.constant 0 : i32
    return %arg0, %c0_i32, %c0_i32_0 : i32, i32, i32
  }
}

</mosaic_0001>

<bundles_post_ra>
// kernel: relation_model_forward.5
= control target key start
LH: loop header
LB: loop body
LE: loop exit
PB: predicated region body
PF: predicated region fallthrough
CT: control target
= control target key end

     0   :  { %8 = vsyncpa [#allocation3], 0  ;;  %s485_s0 = inlined_call_operand.hbm [shape: f32[32,256], index: 0, kind: input, shape index: {}]   ;;  %s486_s1 = inlined_call_operand.hbm [shape: f32[256,128], index: 1, kind: input, shape index: {}]   ;;  %s487_s2 = inlined_call_operand.hbm [shape: f32[1,128], index: 2, kind: input, shape index: {}]   ;;  %s488_s3 = inlined_call_operand.hbm [shape: f32[32,128], index: 3, kind: output, shape index: {}]  }
   0x1   :  { %9 = vsyncpa [#allocation6], 0 }
   0x2   :  { %10 = vsyncpa [#allocation4], 0  ;;  %s403_s12 = smov [#allocation5]   ;;  %s309_s16 = scalar_lea.hbm %s486_s1, 4096 }
   0x3   :  { %s28_s13 = sshll.u32 %s403_s12, 4  ;;  %p310_p0 = scmp.ne.s32.totalorder %s486_s1, %s309_s16  ;;  %s29_s13 = int_to_ptr.vmem [resolvable:$true] %s28_s13 }
   0x4   :  { %p313_p1 = scmp.lt.u32.totalorder %s309_s16, %s486_s1 }
   0x6   :  { %p315_p2 = pnand %p313_p1, %p310_p0 }
   0x8   :  { %318 = shalt.err (!%p315_p2)
}
   0x9   :  { %s319_s21 = scalar_lea.vmem %s29_s13, 4096  ;;  %p324_p4 = scmp.lt.s32.totalorder %s29_s13, %s29_s13 }
   0xa   :  { %p320_p3 = scmp.ne.s32.totalorder %s29_s13, %s319_s21  ;;  %p325_p5 = scmp.lt.s32.totalorder %s319_s21, %s319_s21 }
   0xc   :  { %p326_p6 = por %p325_p5, %p324_p4 }
   0xe   :  { %p327_p7 = pnand %p326_p6, %p320_p3 }
  0x10   :  { %330 = shalt.err (!%p327_p7)
}
  0x11   :  { %s404_s22 = smov 128   ;;  %s405_s23 = smov 8  }
  0x12   :  { %34 = dma.hbm_to_vmem [thread:$0]  %s486_s1, 4096, %s29_s13, [#allocation6], %s404_s22, %s404_s22, %s405_s23  }
  0x13   :  { %s406_s26 = smov [#allocation2]   ;;  %s331_s30 = scalar_lea.hbm %s485_s0, 1024 }
  0x14   :  { %s16_s27 = sshll.u32 %s406_s26, 4  ;;  %p332_p8 = scmp.ne.s32.totalorder %s485_s0, %s331_s30  ;;  %s17_s27 = int_to_ptr.vmem [resolvable:$true] %s16_s27 }
  0x15   :  { %p335_p9 = scmp.lt.u32.totalorder %s331_s30, %s485_s0 }
  0x17   :  { %p337_p10 = pnand %p335_p9, %p332_p8 }
  0x19   :  { %340 = shalt.err (!%p337_p10)
}
  0x1a   :  { %s341_s8 = scalar_lea.vmem %s17_s27, 1024  ;;  %p346_p12 = scmp.lt.s32.totalorder %s17_s27, %s17_s27 }
  0x1b   :  { %p342_p11 = scmp.ne.s32.totalorder %s17_s27, %s341_s8  ;;  %p347_p13 = scmp.lt.s32.totalorder %s341_s8, %s341_s8 }
  0x1d   :  { %p348_p0 = por %p347_p13, %p346_p12 }
  0x1f   :  { %p349_p1 = pnand %p348_p0, %p342_p11 }
  0x21   :  { %352 = shalt.err (!%p349_p1)
}
  0x22   :  { %s407_s1 = smov 256   ;;  %s408_s9 = smov 16  }
  0x23   :  { %22 = dma.hbm_to_vmem [thread:$0]  %s485_s0, 1024, %s17_s27, [#allocation3], %s407_s1, %s407_s1, %s408_s9  }
  0x24   :  { %s409_s12 = smov [#allocation7]   ;;  %s353_s16 = scalar_lea.hbm %s487_s2, 16 }
  0x25   :  { %s41_s13 = sshll.u32 %s409_s12, 4  ;;  %p354_p2 = scmp.ne.s32.totalorder %s487_s2, %s353_s16  ;;  %s42_s13 = int_to_ptr.vmem [resolvable:$true] %s41_s13 }
  0x26   :  { %p357_p3 = scmp.lt.u32.totalorder %s353_s16, %s487_s2 }
  0x28   :  { %p359_p4 = pnand %p357_p3, %p354_p2 }
  0x2a   :  { %362 = shalt.err (!%p359_p4)
}
  0x2b   :  { %s363_s21 = scalar_lea.vmem %s42_s13, 16  ;;  %s367_s0 = scalar_lea.vmem %s42_s13, 32 }
  0x2c   :  { %p364_p5 = scmp.ne.s32.totalorder %s42_s13, %s363_s21  ;;  %p368_p6 = scmp.lt.s32.totalorder %s42_s13, %s42_s13 }
  0x2d   :  { %p369_p7 = scmp.lt.s32.totalorder %s367_s0, %s363_s21 }
  0x2f   :  { %p370_p8 = por %p369_p7, %p368_p6 }
  0x31   :  { %p371_p9 = pnand %p370_p8, %p364_p5 }
  0x33   :  { %374 = shalt.err (!%p371_p9)
}
  0x34   :  { %44 = dma.hbm_to_vmem [thread:$0]  %s487_s2, 16, %s42_s13, [#allocation6]  }
  0x35   :  { %397 = dma.done.wait [#allocation3], 1024  }
  0x36   :  { %398 = vsyncadd [#allocation3], 4294966272 }
  0x37   :  { %399 = dma.done.wait [#allocation6], 4112  }
  0x38   :  { %400 = vsyncadd [#allocation6], 4294963184  ;;  %v78_v0 = vld [vmem:[#allocation5 + $0x80] sm:$0xff]  ;;  %v79_v1 = vld [vmem:[#allocation5 + $0x88] sm:$0xff]  ;;  %s410_s2 = smov [#allocation8]  }
  0x39   :  { %v62_v2 = vld [vmem:[#allocation5] sm:$0xff]  ;;  %v253_v3 = vpack.c.bf16 %v79_v1, %v78_v0  ;;  %v63_v4 = vld [vmem:[#allocation5 + $0x8] sm:$0xff]  ;;  %v80_v5 = vld [vmem:[#allocation5 + $0x90] sm:$0xff]  ;;  %s195_s26 = sshll.u32 %s410_s2, 4  ;;  %s196_s26 = int_to_ptr.vmem [resolvable:$true] %s195_s26 }
  0x3a   :  { %v81_v6 = vld [vmem:[#allocation5 + $0x98] sm:$0xff]  ;;  %v255_v7 = vpack.c.bf16 %v63_v4, %v62_v2  ;;  %v64_v9 = vld [vmem:[#allocation5 + $0x10] sm:$0xff]  ;;  %v82_v11 = vld [vmem:[#allocation5 + $0xa0] sm:$0xff]  ;;  %s375_s27 = scalar_lea.vmem %s196_s26, 512  ;;  %p380_p11 = scmp.lt.s32.totalorder %s196_s26, %s196_s26 }
  0x3b   :  { %v257_v8 = vpack.c.bf16 %v81_v6, %v80_v5  ;;  %v65_v10 = vld [vmem:[#allocation5 + $0x18] sm:$0xff]  ;;  %254 = vmatprep.subr.bf16.mxu0 %v253_v3  ;;  %285 = vmatprep.subr.bf16.mxu1 %v253_v3  ;;  %v83_v12 = vld [vmem:[#allocation5 + $0xa8] sm:$0xff]  ;;  %v66_v15 = vld [vmem:[#allocation5 + $0x20] sm:$0xff]  ;;  %p376_p10 = scmp.ne.s32.totalorder %s196_s26, %s375_s27  ;;  %p381_p12 = scmp.lt.s32.totalorder %s375_s27, %s375_s27 }
  0x3c   :  { %256 = vmatpush3.bf16.msra.mxu0 %v255_v7  ;;  %293 = vmatpush3.bf16.msra.mxu1 %v255_v7  ;;  %v259_v13 = vpack.c.bf16 %v65_v10, %v64_v9  ;;  %v261_v14 = vpack.c.bf16 %v83_v12, %v82_v11  ;;  %v67_v16 = vld [vmem:[#allocation5 + $0x28] sm:$0xff]  ;;  %v84_v17 = vld [vmem:[#allocation5 + $0xb0] sm:$0xff]  ;;  %v85_v18 = vld [vmem:[#allocation5 + $0xb8] sm:$0xff] }
  0x3d   :  { %258 = vmatprep.subr.bf16.mxu0 %v257_v8  ;;  %286 = vmatprep.subr.bf16.mxu1 %v257_v8  ;;  %v263_v19 = vpack.c.bf16 %v67_v16, %v66_v15  ;;  %v265_v20 = vpack.c.bf16 %v85_v18, %v84_v17  ;;  %v68_v21 = vld [vmem:[#allocation5 + $0x30] sm:$0xff]  ;;  %v69_v22 = vld [vmem:[#allocation5 + $0x38] sm:$0xff]  ;;  %v86_v23 = vld [vmem:[#allocation5 + $0xc0] sm:$0xff]  ;;  %p382_p13 = por %p381_p12, %p380_p11 }
  0x3e   :  { %v87_v24 = vld [vmem:[#allocation5 + $0xc8] sm:$0xff]  ;;  %v267_v27 = vpack.c.bf16 %v69_v22, %v68_v21  ;;  %v70_v29 = vld [vmem:[#allocation5 + $0x40] sm:$0xff]  ;;  %v88_v31 = vld [vmem:[#allocation5 + $0xd0] sm:$0xff] }
  0x3f   :  { %v55_v25 = vld [vmem:[#allocation2 + $0x8] sm:$0xff]  ;;  %v269_v28 = vpack.c.bf16 %v87_v24, %v86_v23  ;;  %v89_v32 = vld [vmem:[#allocation5 + $0xd8] sm:$0xff]  ;;  %v72_v35 = vld [vmem:[#allocation5 + $0x50] sm:$0xff]  ;;  %p383_p0 = pnand %p382_p13, %p376_p10 }
  0x40   :  { %260 = vmatpush3.bf16.msra.mxu0 %v259_v13  ;;  %294 = vmatpush3.bf16.msra.mxu1 %v259_v13  ;;  %v59_v26 = vld [vmem:[#allocation2 + $0x28] sm:$0xff]  ;;  %v273_v34 = vpack.c.bf16 %v89_v32, %v88_v31  ;;  %v73_v36 = vld [vmem:[#allocation5 + $0x58] sm:$0xff]  ;;  %v90_v37 = vld [vmem:[#allocation5 + $0xe0] sm:$0xff] }
  0x41   :  { %262 = vmatprep.subr.bf16.mxu0 %v261_v14  ;;  %287 = vmatprep.subr.bf16.mxu1 %v261_v14  ;;  %v71_v30 = vld [vmem:[#allocation5 + $0x48] sm:$0xff]  ;;  %v275_v39 = vpack.c.bf16 %v73_v36, %v72_v35  ;;  %v74_v41 = vld [vmem:[#allocation5 + $0x60] sm:$0xff]  ;;  %v92_v43 = vld [vmem:[#allocation5 + $0xf0] sm:$0xff] }
  0x42   :  { %165 = vmatprep.mubr.f32.mxu0 %v55_v25  ;;  %175 = vmatprep.mubr.f32.mxu1 %v59_v26  ;;  %v271_v33 = vpack.c.bf16 %v71_v30, %v70_v29  ;;  %v91_v38 = vld [vmem:[#allocation5 + $0xe8] sm:$0xff]  ;;  %v93_v44 = vld [vmem:[#allocation5 + $0xf8] sm:$0xff]  ;;  %v76_v47 = vld [vmem:[#allocation5 + $0x70] sm:$0xff] }
  0x43   :  { %v277_v40 = vpack.c.bf16 %v91_v38, %v90_v37  ;;  %v75_v42 = vld [vmem:[#allocation5 + $0x68] sm:$0xff]  ;;  %v281_v46 = vpack.c.bf16 %v93_v44, %v92_v43  ;;  %v77_v48 = vld [vmem:[#allocation5 + $0x78] sm:$0xff]  ;;  %v54_v50 = vld [vmem:[#allocation2] sm:$0xff] }
  0x44   :  { %264 = vmatpush3.bf16.msra.mxu0 %v263_v19  ;;  %295 = vmatpush3.bf16.msra.mxu1 %v263_v19  ;;  %v279_v45 = vpack.c.bf16 %v75_v42, %v74_v41  ;;  %v283_v49 = vpack.c.bf16 %v77_v48, %v76_v47  ;;  %v58_v51 = vld [vmem:[#allocation2 + $0x20] sm:$0xff]  ;;  %v57_v52 = vld [vmem:[#allocation2 + $0x18] sm:$0xff]  ;;  %v56_v54 = vld [vmem:[#allocation2 + $0x10] sm:$0xff] }
  0x45   :  { %266 = vmatprep.subr.bf16.mxu0 %v265_v20  ;;  %288 = vmatprep.subr.bf16.mxu1 %v265_v20  ;;  %v61_v53 = vld [vmem:[#allocation2 + $0x38] sm:$0xff]  ;;  %v60_v55 = vld [vmem:[#allocation2 + $0x30] sm:$0xff]  ;;  %v208_v58 = vld [vmem:[#allocation7] ss:$0 sm:$0xff] }
  0x48   :  { %268 = vmatpush3.bf16.msra.mxu0 %v267_v27  ;;  %296 = vmatpush3.bf16.msra.mxu1 %v267_v27 }
  0x49   :  { %270 = vmatprep.subr.bf16.mxu0 %v269_v28  ;;  %289 = vmatprep.subr.bf16.mxu1 %v269_v28 }
  0x4c   :  { %272 = vmatpush3.bf16.msra.mxu0 %v271_v33  ;;  %297 = vmatpush3.bf16.msra.mxu1 %v271_v33 }
  0x4d   :  { %274 = vmatprep.subr.bf16.mxu0 %v273_v34  ;;  %290 = vmatprep.subr.bf16.mxu1 %v273_v34 }
  0x50   :  { %276 = vmatpush3.bf16.msra.mxu0 %v275_v39  ;;  %298 = vmatpush3.bf16.msra.mxu1 %v275_v39 }
  0x51   :  { %278 = vmatprep.subr.bf16.mxu0 %v277_v40  ;;  %291 = vmatprep.subr.bf16.mxu1 %v277_v40 }
  0x54   :  { %280 = vmatpush3.bf16.msra.mxu0 %v279_v45  ;;  %299 = vmatpush3.bf16.msra.mxu1 %v279_v45 }
  0x55   :  { %282 = vmatprep.subr.bf16.mxu0 %v281_v46  ;;  %292 = vmatprep.subr.bf16.mxu1 %v281_v46 }
  0x58   :  { %284 = vmatpush3.bf16.msra.mxu0 %v283_v49  ;;  %300 = vmatpush3.bf16.msra.mxu1 %v283_v49 }
  0x5b   :  { %166 = vmatmul.mubr.f32.vlgmr.msra.gmra.mrb[0].mxu0 %v54_v50  ;;  %176 = vmatmul.mubr.f32.vlgmr.msra.gmra.mrb[0].mxu1 %v58_v51 }
  0x5c   :  { %170 = vmatprep.mubr.f32.mxu0 %v57_v52  ;;  %180 = vmatprep.mubr.f32.mxu1 %v61_v53 }
  0x5f   :  { %171 = vmatmul.mubr.f32.gmra.mrb[2].mxu0 %v56_v54  ;;  %181 = vmatmul.mubr.f32.gmra.mrb[2].mxu1 %v60_v55 }
 0x12e   :  { %v241_v56 = vpop.f32.mrb[0].mxu0  ;;  %v247_v57 = vpop.f32.mrb[0].mxu1 }
 0x12f   :  { %v242_v59 = vpop.f32.mrb[1].mxu0  ;;  %v248_v60 = vpop.f32.mrb[1].mxu1 }
 0x130   :  { %v243_v61 = vadd.f32 %v242_v59, %v241_v56  ;;  %v249_v62 = vadd.f32 %v248_v60, %v247_v57 }
 0x132   :  { %v168_v63 = vadd.f32 %v243_v61, %v208_v58  ;;  %v178_v0 = vadd.f32 %v249_v62, %v208_v58  ;;  %v244_v1 = vpop.f32.mrb[2].mxu0  ;;  %v250_v2 = vpop.f32.mrb[2].mxu1 }
 0x133   :  { %v245_v3 = vpop.f32.mrb[3].mxu0  ;;  %v251_v4 = vpop.f32.mrb[3].mxu1 }
 0x134   :  { %186 = vst [vmem:[#allocation8] sm:$0xff] %v168_v63  ;;  %188 = vst [vmem:[#allocation8 + $0x10] sm:$0xff] %v178_v0  ;;  %v246_v5 = vadd.f32 %v245_v3, %v244_v1  ;;  %v252_v6 = vadd.f32 %v251_v4, %v250_v2 }
 0x136   :  { %v173_v7 = vadd.f32 %v246_v5, %v208_v58  ;;  %v183_v8 = vadd.f32 %v252_v6, %v208_v58 }
 0x138   :  { %187 = vst [vmem:[#allocation8 + $0x8] sm:$0xff] %v173_v7  ;;  %189 = vst [vmem:[#allocation8 + $0x18] sm:$0xff] %v183_v8 }
 0x139   :  { %386 = shalt.err (!%p383_p0)
}
 0x13a   :  { %s387_s30 = scalar_lea.hbm %s488_s3, 512 }
 0x13b   :  { %p388_p1 = scmp.ne.s32.totalorder %s488_s3, %s387_s30  ;;  %p391_p2 = scmp.lt.u32.totalorder %s387_s30, %s488_s3 }
 0x13d   :  { %p393_p3 = pnand %p391_p2, %p388_p1 }
 0x13f   :  { %396 = shalt.err (!%p393_p3)
}
 0x140   :  { %201 = dma.vmem_to_hbm [thread:$0]  %s196_s26, 512, %s488_s3, [#allocation4], %s404_s22, %s404_s22, %s405_s23  }
 0x141   :  { %401 = dma.done.wait [#allocation4], 512  }
 0x142   :  { %402 = vsyncadd [#allocation4], 4294966784 }
 0x143   :  { %205 = vsyncpa [#allocation3], 1 }
 0x144   :  { %206 = vsyncpa [#allocation6], 1 }
 0x145   :  { %207 = vsyncpa [#allocation4], 1 }

// kernel: relation_model_forward.3
= control target key start
LH: loop header
LB: loop body
LE: loop exit
PB: predicated region body
PF: predicated region fallthrough
CT: control target
= control target key end

     0   :  { %s5320_s0 = inlined_call_operand.hbm [shape: f32[64,16], index: 0, kind: input, shape index: {}]   ;;  %s5321_s1 = inlined_call_operand.hbm [shape: s32[8,1], index: 1, kind: input, shape index: {}]   ;;  %s5322_s2 = inlined_call_operand.hbm [shape: f32[2,16,384], index: 2, kind: input, shape index: {}]   ;;  %s5323_s3 = inlined_call_operand.hbm [shape: f32[2,128,384], index: 3, kind: input, shape index: {}]   ;;  %s5324_s4 = inlined_call_operand.hbm [shape: f32[2,1,384], index: 4, kind: input, shape index: {}]   ;;  %s5325_s5 = inlined_call_operand.hbm [shape: f32[2,1,128], index: 5, kind: input, shape index: {}]   ;;  %s5326_s6 = inlined_call_operand.hbm [shape: f32[2,8,128], index: 6, kind: input, shape index: {}]   ;;  %s5327_s7 = inlined_call_operand.hbm [shape: f32[8,8,256], index: 7, kind: output, shape index: {0}]   ;;  %s5328_s8 = inlined_call_operand.hbm [shape: f32[2,8,128], index: 8, kind: output, shape index: {1}]  }
   0x1   :  { %5340 = sst [smem:[#allocation25_spill]] %s5320_s0 }
   0x2   :  { %5341 = sst [smem:[#allocation26_spill]] %s5322_s2 }
   0x3   :  { %5342 = sst [smem:[#allocation27_spill]] %s5323_s3 }
   0x4   :  { %5343 = sst [smem:[#allocation28_spill]] %s5324_s4 }
   0x5   :  { %5344 = sst [smem:[#allocation29_spill]] %s5327_s7 }
   0x6   :  { %14 = vsyncpa [#allocation6], 0 }
   0x7   :  { %16 = vsyncpa [#allocation6 + $0x1], 0 }
   0x8   :  { %17 = vsyncpa [#allocation9], 0 }
   0x9   :  { %18 = vsyncpa [#allocation7], 0 }
   0xa   :  { %20 = vsyncpa [#allocation7 + $0x1], 0 }
   0xb   :  { %21 = vsyncpa [#allocation17], 0 }
   0xc   :  { %23 = vsyncpa [#allocation17 + $0x1], 0  ;;  %s4298_s27 = smov 0   ;;  %s4300_s28 = smov 0  }
   0xd   :  { %s4302_s29 = smov 0   ;;  %s4304_s30 = smov 0  }
   0xe   :  { %s4306_s9 = smov 0   ;;  %s4308_s10 = smov 0  }
   0xf LB: > { %s101_s11 = sadd.s32 1, %s4219_s29  ;;  %p5329_p0 = scmp.ne.s32.totalorder %s4219_s29, %s4215_s28  ;;  %s4231_s10 = sphi %s4308_s10, %s29_s10   ;;  %s4227_s9 = sphi %s4306_s9, %s5398_s9   ;;  %s4223_s30 = sphi %s4304_s30, %s5397_s30   ;;  %s4219_s29 = sphi %s4302_s29, %s5396_s29   ;;  %s4215_s28 = sphi %s4300_s28, %s5395_s28   ;;  %s4211_s27 = sphi %s4298_s27, %s5394_s27  }
  0x10   : > { %p109_p1 = scmp.eq.s32.totalorder %s4231_s10, 0  ;;  %p5330_p3 = scmp.lt.s32.totalorder %s4231_s10, 2 }
  0x11   : > { %s313_s13 = sand.u32 1, %s4231_s10   ;;  %s4233_s14 = smov [#allocation5]  }
  0x12   : > { %p4337_p4 = por %p109_p1, %p5329_p0  ;;  %s327_s15 = sshll.u32 %s4233_s14, 4  ;;  %s328_s15 = int_to_ptr.vmem [resolvable:$true] %s327_s15 }
  0x13   : > { %p4344_p5 = pnand %p5330_p3, %p109_p1  ;;  %s4348_s17 = scalar_lea.sflag [#allocation6], %s313_s13 }
  0x14   : > { %s5345_s12 = scalar_select %p4337_p4, 1, 0 }
  0x15   : > { %s5347_s0 = sld [smem:[#allocation25_spill]]  ;;  %p3905_p7 = pneg %p4344_p5 }
  0x1b   : > { %s3903_s20 = scalar_lea.hbm %s5347_s0, 1024 }
  0x1c   : > { %p3904_p6 = scmp.ne.s32.totalorder %s5347_s0, %s3903_s20  ;;  %p3910_p10 = scmp.lt.u32.totalorder %s3903_s20, %s5347_s0 }
  0x1e   : > { %p3906_p8 = pnand %p3905_p7, %p3904_p6 }
  0x20   : > { %p3907_p9 = pneg %p3906_p8 }
  0x22   : > { %p3912_p11 = pnand %p3910_p10, %p3907_p9 }
  0x24   : > { %3915 = shalt.err (!%p3912_p11)
}
  0x25   : > { %s3916_s25 = scalar_lea.vmem %s328_s15, 1024  ;;  %s3923_s26 = scalar_lea.vmem %s328_s15, 2048 }
  0x26   : > { %p3917_p12 = scmp.ne.s32.totalorder %s328_s15, %s3916_s25  ;;  %p3924_p2 = scmp.lt.s32.totalorder %s328_s15, %s328_s15 }
  0x27   : > { %p3925_p0 = scmp.lt.s32.totalorder %s3923_s26, %s3916_s25 }
  0x28   : > { %p3919_p13 = pnand %p3917_p12, %p3905_p7 }
  0x29   : > { %p3926_p3 = por %p3925_p0, %p3924_p2 }
  0x2a   : > { %p3920_p1 = pneg %p3919_p13 }
  0x2c   : > { %p3927_p4 = pnand %p3926_p3, %p3920_p1 }
  0x2e   : > { %3930 = shalt.err (!%p3927_p4)
}
  0x2f   : > { %s4234_s13 = smov 128   ;;  %s4235_s14 = smov 8  }
  0x30   : > { %3732 = dma.hbm_to_vmem [thread:$0]  (!%p4344_p5), %s5347_s0, 1024, %s328_s15, %s4348_s17, %s4234_s13, %s4234_s13, %s4235_s14  }
  0x31   : > { %p5348_p0 = scmp.ne.s32.totalorder %s5345_s12, 0  ;;  %p5349_p2 = scmp.lt.s32.totalorder %s4231_s10, 2 }
  0x32   : > { %s4376_s21 = sand.u32 1, %s4219_s29   ;;  %s41_s22 = sadd.s32 1, %s4227_s9 }
  0x33   : > { %p4371_p3 = pnand %p5349_p2, %p5348_p0  ;;  %p43_p4 = scmp.ge.s32.totalorder %s41_s22, 2 }
  0x34   : > { %s3694_s16 = smul.u32 48, %s4376_s21  ;;  %s5352_s2 = sld [smem:[#allocation26_spill]] }
  0x35   : > { %s5350_s20 = scalar_select %p4371_p3, 1, 0 }
  0x36   : > { %s3695_s23 = smul.u32 768, %s4227_s9  ;;  %s5400_s22 = smov (%p43_p4, %s41_s22), 0 }
  0x37   : > { %5351 = sst [smem:[#allocation23_spill]] %s5400_s22  ;;  %s98_s15 = ssub.s32 %s4227_s9, %s5400_s22 }
  0x38   : > { %s341_s26 = scalar_lea.vmem [#allocation10], %s3694_s16  ;;  %p99_p5 = scmp.eq.s32.totalorder %s98_s15, 0 }
  0x39   : > { %s348_s13 = sshll.u32 %s341_s26, 4  ;;  %s3696_s14 = smul.u32 384, %s4376_s21  ;;  %s4390_s13 = int_to_ptr.vmem [resolvable:$true] %s348_s13 }
  0x3a   : > { %s4386_s12 = scalar_lea.hbm %s5352_s2, %s3695_s23  ;;  %p4402_p7 = pneg %p4371_p3 }
  0x3b   : > { %s4396_s18 = scalar_select %p99_p5, %s4219_s29, %s101_s11  }
  0x3c   : > { %s3931_s19 = scalar_lea.hbm %s4386_s12, 768  ;;  %s3936_s25 = scalar_lea.hbm %s5352_s2, 1536 }
  0x3d   : > { %5353 = sst [smem:[#allocation24_spill]] %s4396_s18  ;;  %p3932_p6 = scmp.ne.s32.totalorder %s4386_s12, %s3931_s19 }
  0x3e   : > { %p3937_p10 = scmp.lt.u32.totalorder %s4386_s12, %s5352_s2  ;;  %p3938_p11 = scmp.lt.u32.totalorder %s3936_s25, %s3931_s19 }
  0x3f   : > { %p3934_p8 = pnand %p4402_p7, %p3932_p6  ;;  %p3940_p13 = scmp.lt.u32.totalorder %s3931_s19, %s4386_s12 }
  0x40   : > { %p3939_p12 = por %p3938_p11, %p3937_p10 }
  0x41   : > { %p3935_p9 = pneg %p3934_p8 }
  0x42   : > { %p3941_p1 = por %p3940_p13, %p3939_p12 }
  0x44   : > { %p3942_p0 = pnand %p3941_p1, %p3935_p9 }
  0x46   : > { %3945 = shalt.err (!%p3942_p0)
}
  0x47   : > { %s3946_s11 = scalar_lea.vmem %s4390_s13, 768  ;;  %s4236_s16 = smov [#allocation10]  }
  0x48   : > { %p3947_p2 = scmp.ne.s32.totalorder %s4390_s13, %s3946_s11  ;;  %s3951_s24 = sshll.u32 %s4236_s16, 4  ;;  %s3952_s24 = int_to_ptr.vmem [resolvable:$false] %s3951_s24 }
  0x49   : > { %s3953_s15 = scalar_lea.vmem %s3952_s24, 1536  ;;  %p3954_p6 = scmp.lt.s32.totalorder %s4390_s13, %s3952_s24 }
  0x4a   : > { %p3949_p4 = pnand %p3947_p2, %p4402_p7  ;;  %p3955_p8 = scmp.lt.s32.totalorder %s3953_s15, %s3946_s11 }
  0x4c   : > { %p3950_p5 = pneg %p3949_p4  ;;  %p3956_p10 = por %p3955_p8, %p3954_p6 }
  0x4e   : > { %p3957_p11 = pnand %p3956_p10, %p3950_p5 }
  0x50   : > { %3960 = shalt.err (!%p3957_p11)
}
  0x51   : > { %s4237_s19 = smov 384   ;;  %s4238_s25 = smov 24  }
  0x52   : > { %3735 = dma.hbm_to_vmem [thread:$0]  (!%p4371_p3), %s4386_s12, 768, %s4390_s13, %s4348_s17, %s4237_s19, %s4237_s19, %s4238_s25  }
  0x53   : > { %s3697_s26 = smul.u32 6144, %s4227_s9  ;;  %s362_s11 = scalar_lea.vmem [#allocation11], %s3696_s14 }
  0x54   : > { %s369_s16 = sshll.u32 %s362_s11, 4  ;;  %s5355_s3 = sld [smem:[#allocation27_spill]]  ;;  %s4438_s16 = int_to_ptr.vmem [resolvable:$true] %s369_s16 }
  0x5a   : > { %s4436_s2 = scalar_lea.hbm %s5355_s3, %s3697_s26  ;;  %s3966_s14 = scalar_lea.hbm %s5355_s3, 12288 }
  0x5b   : > { %s3961_s22 = scalar_lea.hbm %s4436_s2, 6144  ;;  %p3967_p1 = scmp.lt.u32.totalorder %s4436_s2, %s5355_s3 }
  0x5c   : > { %p3962_p9 = scmp.ne.s32.totalorder %s4436_s2, %s3961_s22  ;;  %p3968_p0 = scmp.lt.u32.totalorder %s3966_s14, %s3961_s22 }
  0x5d   : > { %p3970_p4 = scmp.lt.u32.totalorder %s3961_s22, %s4436_s2 }
  0x5e   : > { %p3964_p12 = pnand %p3962_p9, %p4402_p7  ;;  %p3969_p2 = por %p3968_p0, %p3967_p1 }
  0x60   : > { %p3965_p13 = pneg %p3964_p12  ;;  %p3971_p5 = por %p3970_p4, %p3969_p2 }
  0x62   : > { %p3972_p6 = pnand %p3971_p5, %p3965_p13 }
  0x64   : > { %3975 = shalt.err (!%p3972_p6)
}
  0x65   : > { %s3976_s0 = scalar_lea.vmem %s4438_s16, 6144  ;;  %s4239_s26 = smov [#allocation11]  }
  0x66   : > { %p3977_p8 = scmp.ne.s32.totalorder %s4438_s16, %s3976_s0  ;;  %s3981_s15 = sshll.u32 %s4239_s26, 4  ;;  %s3982_s15 = int_to_ptr.vmem [resolvable:$false] %s3981_s15 }
  0x67   : > { %s3983_s24 = scalar_lea.vmem %s3982_s15, 12288  ;;  %p3984_p9 = scmp.lt.s32.totalorder %s4438_s16, %s3982_s15 }
  0x68   : > { %p3979_p10 = pnand %p3977_p8, %p4402_p7  ;;  %p3985_p12 = scmp.lt.s32.totalorder %s3983_s24, %s3976_s0 }
  0x6a   : > { %p3980_p11 = pneg %p3979_p10  ;;  %p3986_p1 = por %p3985_p12, %p3984_p9 }
  0x6c   : > { %p3987_p0 = pnand %p3986_p1, %p3980_p11 }
  0x6e   : > { %3990 = shalt.err (!%p3987_p0)
}
  0x6f   : > { %3738 = dma.hbm_to_vmem [thread:$0]  (!%p4371_p3), %s4436_s2, 6144, %s4438_s16, %s4348_s17, %s4237_s19, %s4237_s19, %s4238_s25  }
  0x70   : > { %s3699_s22 = smul.u32 48, %s4227_s9  ;;  %s5357_s4 = sld [smem:[#allocation28_spill]] }
  0x71   : > { %s5356_s12 = smul.u32 3, %s4376_s21 }
  0x73   : > { %s383_s13 = scalar_lea.vmem [#allocation12], %s5356_s12 }
  0x74   : > { %s391_s14 = sshll.u32 %s383_s13, 4  ;;  %s392_s14 = int_to_ptr.vmem [resolvable:$true] %s391_s14 }
  0x76   : > { %s389_s26 = scalar_lea.hbm %s5357_s4, %s3699_s22  ;;  %s3996_s18 = scalar_lea.hbm %s5357_s4, 96 }
  0x77   : > { %s3991_s15 = scalar_lea.hbm %s389_s26, 48  ;;  %p3997_p5 = scmp.lt.u32.totalorder %s389_s26, %s5357_s4 }
  0x78   : > { %p3992_p13 = scmp.ne.s32.totalorder %s389_s26, %s3991_s15  ;;  %p3998_p6 = scmp.lt.u32.totalorder %s3996_s18, %s3991_s15 }
  0x79   : > { %p4000_p10 = scmp.lt.u32.totalorder %s3991_s15, %s389_s26 }
  0x7a   : > { %p3994_p2 = pnand %p3992_p13, %p4402_p7  ;;  %p3999_p8 = por %p3998_p6, %p3997_p5 }
  0x7c   : > { %p3995_p4 = pneg %p3994_p2  ;;  %p4001_p11 = por %p4000_p10, %p3999_p8 }
  0x7e   : > { %p4002_p9 = pnand %p4001_p11, %p3995_p4 }
  0x80   : > { %4005 = shalt.err (!%p4002_p9)
}
  0x81   : > { %s4006_s19 = scalar_lea.vmem %s392_s14, 48  ;;  %s4240_s25 = smov [#allocation12]  }
  0x82   : > { %p4007_p12 = scmp.ne.s32.totalorder %s392_s14, %s4006_s19  ;;  %s4011_s16 = sshll.u32 %s4240_s25, 4  ;;  %s4012_s16 = int_to_ptr.vmem [resolvable:$false] %s4011_s16 }
  0x83   : > { %s4013_s3 = scalar_lea.vmem %s4012_s16, 96  ;;  %p4014_p13 = scmp.lt.s32.totalorder %s392_s14, %s4012_s16 }
  0x84   : > { %p4009_p1 = pnand %p4007_p12, %p4402_p7  ;;  %p4015_p2 = scmp.lt.s32.totalorder %s4013_s3, %s4006_s19 }
  0x86   : > { %p4010_p0 = pneg %p4009_p1  ;;  %p4016_p3 = por %p4015_p2, %p4014_p13 }
  0x88   : > { %p4017_p5 = pnand %p4016_p3, %p4010_p0 }
  0x8a   : > { %4020 = shalt.err (!%p4017_p5)
}
  0x8b   : > { %p5358_p6 = scmp.ne.s32.totalorder %s5350_s20, 0  ;;  %s2720_s7 = sshll.u32 %s4227_s9, 4 }
  0x8c   : > { %s401_s18 = scalar_lea.vmem [#allocation13], %s4376_s21  ;;  %s406_s11 = scalar_lea.hbm %s5325_s5, %s2720_s7 }
  0x8d   : > { %3741 = dma.hbm_to_vmem [thread:$0]  (!%p5358_p6), %s389_s26, 48, %s392_s14, %s4348_s17  }
  0x8e   : > { %s408_s22 = sshll.u32 %s401_s18, 4  ;;  %s4021_s0 = scalar_lea.hbm %s406_s11, 16  ;;  %s409_s22 = int_to_ptr.vmem [resolvable:$true] %s408_s22 }
  0x8f   : > { %p4022_p4 = scmp.ne.s32.totalorder %s406_s11, %s4021_s0  ;;  %s4026_s2 = scalar_lea.hbm %s5325_s5, 32 }
  0x90   : > { %p4027_p10 = scmp.lt.u32.totalorder %s406_s11, %s5325_s5  ;;  %p4028_p11 = scmp.lt.u32.totalorder %s4026_s2, %s4021_s0 }
  0x91   : > { %p4024_p3 = pnand %p4022_p4, %p4402_p7  ;;  %p4030_p12 = scmp.lt.u32.totalorder %s4021_s0, %s406_s11 }
  0x92   : > { %p4029_p9 = por %p4028_p11, %p4027_p10 }
  0x93   : > { %p4025_p8 = pneg %p4024_p3 }
  0x94   : > { %p4031_p1 = por %p4030_p12, %p4029_p9 }
  0x96   : > { %p4032_p0 = pnand %p4031_p1, %p4025_p8 }
  0x98   : > { %4035 = shalt.err (!%p4032_p0)
}
  0x99   : > { %s4036_s14 = scalar_lea.vmem %s409_s22, 16  ;;  %s4241_s26 = smov [#allocation13]  }
  0x9a   : > { %p4037_p13 = scmp.ne.s32.totalorder %s409_s22, %s4036_s14  ;;  %s4041_s16 = sshll.u32 %s4241_s26, 4  ;;  %s4042_s16 = int_to_ptr.vmem [resolvable:$false] %s4041_s16 }
  0x9b   : > { %s4043_s3 = scalar_lea.vmem %s4042_s16, 32  ;;  %p4044_p4 = scmp.lt.s32.totalorder %s409_s22, %s4042_s16 }
  0x9c   : > { %p4039_p2 = pnand %p4037_p13, %p4402_p7  ;;  %p4045_p3 = scmp.lt.s32.totalorder %s4043_s3, %s4036_s14 }
  0x9e   : > { %p4040_p5 = pneg %p4039_p2  ;;  %p4046_p6 = por %p4045_p3, %p4044_p4 }
  0xa0   : > { %p4047_p10 = pnand %p4046_p6, %p4040_p5 }
  0xa2   : > { %4050 = shalt.err (!%p4047_p10)
}
  0xa3   : > { %p5359_p11 = scmp.ne.s32.totalorder %s5350_s20, 0  ;;  %s4503_s7 = sadd.s32 4294967295, %s4231_s10  }
  0xa4   : > { %s2707_s18 = sadd.s32 4294967294, %s4231_s10   ;;  %p114_p6 = scmp.ne.s32.totalorder %s4215_s28, %s4211_s27 }
  0xa5   : > { %3744 = dma.hbm_to_vmem [thread:$0]  (!%p5359_p11), %s406_s11, 16, %s409_s22, %s4348_s17  }
  0xa6   : > { %p5335_p8 = scmp.eq.s32.totalorder %s4503_s7, 0  ;;  %p250_p9 = scmp.eq.s32.totalorder %s4503_s7, 1 }
  0xa7   : > { %p256_p12 = scmp.eq.s32.totalorder %s2707_s18, 1  ;;  %p2712_p0 = scmp.ge.s32.totalorder %s4231_s10, 1 }
  0xa8   : > { %p4512_p1 = por %p5335_p8, %p114_p6  ;;  %p5361_p13 = scmp.ne.s32.totalorder %s4219_s29, %s4215_s28 }
  0xa9   : > { %p4524_p5 = por %p256_p12, %p114_p6  ;;  %p289_p4 = scmp.lt.s32.totalorder %s4231_s10, 3 }
  0xaa   : > { %s5360_s12 = scalar_select %p4512_p1, 1, 0 }
  0xab   : > { %p4520_p2 = por %p250_p9, %p5361_p13  ;;  %s2721_s11 = sshll.u32 %s4376_s21, 3 }
  0xac   : > { %s5363_s13 = scalar_select %p4524_p5, 1, 0 }
  0xad   : > { %s5362_s22 = scalar_select %p4520_p2, 1, 0 }
  0xae   : > { %p4530_p3 = pnand %p2712_p0, %p289_p4  ;;  %s4242_s15 = smov [#allocation8]  }
  0xaf   : > { %s302_s24 = sshll.u32 %s4242_s15, 4  ;;  %s2722_s2 = sshll.u32 %s4227_s9, 7  ;;  %s4534_s24 = int_to_ptr.vmem [resolvable:$true] %s302_s24 }
  0xb0   : > { %s5364_s0 = scalar_select %p4530_p3, 1, 0 }
  0xb1   : > { %p3725_p10 = pneg %p4530_p3  ;;  %s4542_s14 = scalar_lea.hbm %s5326_s6, %s2722_s2 }
  0xb2   : > { %s419_s21 = scalar_lea.vmem [#allocation14], %s2721_s11  ;;  %s4051_s3 = scalar_lea.hbm %s4542_s14, 128 }
  0xb3   : > { %s426_s26 = sshll.u32 %s419_s21, 4  ;;  %p4546_p6 = pnand %p3725_p10, %p5335_p8  ;;  %s427_s26 = int_to_ptr.vmem [resolvable:$true] %s426_s26 }
  0xb4   : > { %p4052_p9 = scmp.ne.s32.totalorder %s4542_s14, %s4051_s3  ;;  %s4056_s2 = scalar_lea.hbm %s5326_s6, 256 }
  0xb5   : > { %s5365_s16 = scalar_select %p4546_p6, 1, 0 }
  0xb6   : > { %p4054_p12 = pnand %p4052_p9, %p4402_p7  ;;  %p4057_p13 = scmp.lt.u32.totalorder %s4542_s14, %s5326_s6 }
  0xb7   : > { %p4058_p4 = scmp.lt.u32.totalorder %s4056_s2, %s4051_s3  ;;  %p4060_p10 = scmp.lt.u32.totalorder %s4051_s3, %s4542_s14 }
  0xb8   : > { %p4055_p0 = pneg %p4054_p12 }
  0xb9   : > { %p4059_p5 = por %p4058_p4, %p4057_p13 }
  0xbb   : > { %p4061_p8 = por %p4060_p10, %p4059_p5 }
  0xbd   : > { %p4062_p2 = pnand %p4061_p8, %p4055_p0 }
  0xbf   : > { %4065 = shalt.err (!%p4062_p2)
}
  0xc0   : > { %s4066_s11 = scalar_lea.vmem %s427_s26, 128  ;;  %s4243_s21 = smov [#allocation14]  }
  0xc1   : > { %p4067_p1 = scmp.ne.s32.totalorder %s427_s26, %s4066_s11  ;;  %s4071_s4 = sshll.u32 %s4243_s21, 4  ;;  %s4072_s4 = int_to_ptr.vmem [resolvable:$false] %s4071_s4 }
  0xc2   : > { %s4073_s18 = scalar_lea.vmem %s4072_s4, 256  ;;  %p4074_p3 = scmp.lt.s32.totalorder %s427_s26, %s4072_s4 }
  0xc3   : > { %p4069_p9 = pnand %p4067_p1, %p4402_p7  ;;  %p4075_p6 = scmp.lt.s32.totalorder %s4073_s18, %s4066_s11 }
  0xc5   : > { %p4070_p12 = pneg %p4069_p9  ;;  %p4076_p11 = por %p4075_p6, %p4074_p3 }
  0xc7   : > { %p4077_p4 = pnand %p4076_p11, %p4070_p12 }
  0xc9   : > { %4080 = shalt.err (!%p4077_p4)
}
  0xca   : > { %p5366_p13 = scmp.ne.s32.totalorder %s5350_s20, 0  ;;  %s4081_s23 = scalar_lea.hbm %s5321_s1, 128 }
  0xcb   : > { %p4082_p7 = scmp.ne.s32.totalorder %s5321_s1, %s4081_s23  ;;  %p5367_p8 = scmp.ne.s32.totalorder %s5365_s16, 0 }
  0xcc   : > { %3747 = dma.hbm_to_vmem [thread:$0]  (!%p5366_p13), %s4542_s14, 128, %s427_s26, %s4348_s17  }
  0xcd   : > { %p4083_p1 = pneg %p5367_p8  ;;  %p4088_p11 = scmp.lt.u32.totalorder %s4081_s23, %s5321_s1 }
  0xcf   : > { %p4084_p2 = pnand %p4083_p1, %p4082_p7 }
  0xd1   : > { %p4085_p5 = pneg %p4084_p2 }
  0xd3   : > { %p4090_p3 = pnand %p4088_p11, %p4085_p5 }
  0xd5   : > { %4093 = shalt.err (!%p4090_p3)
}
  0xd6   : > { %s4094_s17 = scalar_lea.vmem %s4534_s24, 128  ;;  %p4102_p9 = scmp.lt.s32.totalorder %s4534_s24, %s4534_s24 }
  0xd7   : > { %p4095_p6 = scmp.ne.s32.totalorder %s4534_s24, %s4094_s17  ;;  %p4103_p12 = scmp.lt.s32.totalorder %s4094_s17, %s4094_s17 }
  0xd9   : > { %p4097_p0 = pnand %p4095_p6, %p4083_p1  ;;  %p4104_p4 = por %p4103_p12, %p4102_p9 }
  0xdb   : > { %p4098_p10 = pneg %p4097_p0 }
  0xdd   : > { %p4105_p13 = pnand %p4104_p4, %p4098_p10 }
  0xdf   : > { %4108 = shalt.err (!%p4105_p13)
}
  0xe0   : > { %3728 = dma.hbm_to_vmem [thread:$0]  (!%p5367_p8), %s5321_s1, 128, %s4534_s24, [#allocation9]  }
  0xe1   : > { %p5368_p7 = scmp.ne.s32.totalorder %s5364_s0, 0 }
  0xe2   : > { %s437_s26 = sand.u32 (!%p5368_p7), 1, %s4503_s7   ;;  %p5369_p1 = scmp.eq.s32.totalorder (!%p5368_p7), %s4503_s7, 0 }
  0xe3   : > { %435 = sbr.rel (%p5368_p7) target bundleno = 2413 (0x96d), region = 48  ;;  %s438_s11 = scalar_lea.sflag (!%p5368_p7), [#allocation6], %s437_s26 }
  0xea   : > { %4190 = dma.done.wait (%p5369_p1), %s438_s11, 1024   ;;  %p5370_p2 = pmov %p5369_p1 }
  0xeb   : > { %p5371_p5 = pmov %p5369_p1 }
  0xec   : > { %4192 = vsyncadd (%p5370_p2), %s438_s11, 4294966272 }
  0xed   : > { %4194 = dma.done.wait (%p5371_p5), [#allocation9], 128   ;;  %p5372_p11 = pmov %p5369_p1 }
  0xee   : > { %s4601_s24 = sand.u32 1, %s4215_s28   ;;  %p5373_p8 = scmp.ne.s32.totalorder %s5360_s12, 0 }
  0xef   : > { %4196 = vsyncadd (%p5372_p11), [#allocation9], 4294967168  ;;  %s3700_s0 = smul.u32 48, %s4601_s24 }
  0xf1   : > { %s454_s16 = scalar_lea.vmem [#allocation10], %s3700_s0 }
  0xf2   : > { %4198 = dma.done.wait (%p5373_p8), %s438_s11, 7104  }
  0xf3   : > { %4200 = vsyncadd (%p5373_p8), %s438_s11, 4294960192  ;;  %v4244_v0 = vmov 0.0   ;;  %s3701_s21 = smul.u32 384, %s4601_s24  ;;  %v4245_v1 = vmov 0   ;;  %v578_v2 = vld [vmem:[%s454_s16 + $0x8] sm:$0xff]  ;;  %v581_v3 = vld [vmem:[%s454_s16 + $0x20] sm:$0xff] }
  0xf4   : > { %689 = vmatprep.mubr.f32.mxu0 %v4244_v0  ;;  %3822 = vset.pattern.permute.xlu0 %v4245_v1  ;;  %v577_v4 = vld [vmem:[%s454_s16] sm:$0xff]  ;;  %v3238_v5 = vpack.c.bf16 %v581_v3, %v578_v2  ;;  %v580_v6 = vld [vmem:[%s454_s16 + $0x18] sm:$0xff]  ;;  %vm600_vm0 = vcmask 130048   ;;  %v579_v17 = vld [vmem:[%s454_s16 + $0x10] sm:$0xff]  ;;  %v4246_v32 = vmov 0.0|0.0   ;;  %vm4247_vm1 = vmmov 0  }
  0xf5   : > { %v569_v7 = vld [vmem:[#allocation5] sm:$0xff]  ;;  %v3240_v8 = vpack.c.bf16 %v580_v6, %v577_v4  ;;  %s4610_s7 = scalar_lea.vmem [#allocation11], %s3701_s21  ;;  %v570_v25 = vld [vmem:[#allocation5 + $0x8] sm:$0xff]  ;;  %v571_v33 = vld [vmem:[#allocation5 + $0x10] sm:$0xff]  ;;  %s2726_s12 = sshll.u32 %s4601_s24, 3 }
  0xf6   : > { %v868_v9 = vld [vmem:[%s4610_s7 + $0x8] sm:$0xff]  ;;  %v871_v10 = vld [vmem:[%s4610_s7 + $0x20] sm:$0xff]  ;;  %2946 = vmatprep.mubr.msk.f32.mxu1 %vm600_vm0, %v569_v7  ;;  %3239 = vmatprep.subr.bf16.mxu0 %v3238_v5  ;;  %v870_v13 = vld [vmem:[%s4610_s7 + $0x18] sm:$0xff]  ;;  %s489_s18 = scalar_lea.vmem [#allocation14], %s2726_s12  ;;  %s2729_s3 = sshll.u32 %s4223_s30, 1 }
  0xf7   : > { %v867_v11 = vld [vmem:[%s4610_s7] sm:$0xff]  ;;  %v4616_v12 = vpack.c.bf16 %v871_v10, %v868_v9  ;;  %v874_v14 = vld [vmem:[%s4610_s7 + $0x38] sm:$0xff]  ;;  %3241 = vmatpush1.bf16.msra.mxu0 %v3240_v8  ;;  %v877_v16 = vld [vmem:[%s4610_s7 + $0x50] sm:$0xff]  ;;  %s560_s15 = ssub.s32 1, %s2729_s3  ;;  %s4812_s23 = smul.u32 7, %s4223_s30 }
  0xf8   : > { %v4620_v15 = vpack.c.bf16 %v870_v13, %v867_v11  ;;  %v582_v18 = vld [vmem:[%s454_s16 + $0x28] sm:$0xff]  ;;  %v4624_v19 = vpack.c.bf16 %v877_v16, %v874_v14  ;;  %v873_v21 = vld [vmem:[%s4610_s7 + $0x30] sm:$0xff]  ;;  %v883_v24 = vld [vmem:[%s4610_s7 + $0x80] sm:$0xff]  ;;  %s2193_s2 = smul.u32 7, %s560_s15  ;;  %s2755_s4 = sshll.u32 %s560_s15, 1 }
  0xf9   : > { %3247 = vmatprep.subr.bf16.mxu0 %v4616_v12  ;;  %v3242_v20 = vpack.c.bf16 %v582_v18, %v579_v17  ;;  %v876_v22 = vld [vmem:[%s4610_s7 + $0x48] sm:$0xff]  ;;  %v879_v28 = vld [vmem:[%s4610_s7 + $0x60] sm:$0xff]  ;;  %v882_v29 = vld [vmem:[%s4610_s7 + $0x78] sm:$0xff]  ;;  %s4818_s25 = sadd.s32 %s2755_s4, %s4812_s23  ;;  %s1469_s17 = smul.u32 3, %s560_s15 }
  0xfa   : > { %v880_v23 = vld [vmem:[%s4610_s7 + $0x68] sm:$0xff]  ;;  %2730 = vmatmul.mubr.msk.f32.vlgmr.msra.gmra.mrb[0].mxu0 %vm600_vm0, %v569_v7  ;;  %v4633_v26 = vpack.c.bf16 %v876_v22, %v873_v21  ;;  %v886_v30 = vld [vmem:[%s4610_s7 + $0x98] sm:$0xff]  ;;  %v889_v31 = vld [vmem:[%s4610_s7 + $0xb0] sm:$0xff]  ;;  %v4646_v34 = vpack.c.bf16 %v882_v29, %v879_v28  ;;  %s4815_s19 = sadd.s32 %s2193_s2, %s4812_s23  ;;  %s2764_s20 = sshll.u32 %s560_s15, 2 }
  0xfb   : > { %3243 = vmatprep.subr.bf16.mxu1 %v3242_v20  ;;  %695 = vmatprep.mubr.f32.mxu0 %v4244_v0  ;;  %v4636_v27 = vpack.c.bf16 %v883_v24, %v880_v23  ;;  %v4650_v35 = vpack.c.bf16 %v889_v31, %v886_v30  ;;  %v885_v36 = vld [vmem:[%s4610_s7 + $0x90] sm:$0xff]  ;;  %v888_v37 = vld [vmem:[%s4610_s7 + $0xa8] sm:$0xff]  ;;  %v895_v39 = vld [vmem:[%s4610_s7 + $0xe0] sm:$0xff]  ;;  %s4821_s14 = sadd.s32 %s2764_s20, %s4812_s23  ;;  %s4824_s26 = sadd.s32 %s1469_s17, %s4812_s23 }
  0xfc   : > { %3249 = vmatpush1.bf16.msra.mxu0 %v4620_v15  ;;  %3245 = vmatpush3.bf16.msra.mxu1 %v3242_v20  ;;  %v892_v38 = vld [vmem:[%s4610_s7 + $0xc8] sm:$0xff]  ;;  %v869_v40 = vld [vmem:[%s4610_s7 + $0x10] sm:$0xff]  ;;  %v4664_v44 = vpack.c.bf16 %v888_v37, %v885_v36  ;;  %v875_v45 = vld [vmem:[%s4610_s7 + $0x40] sm:$0xff]  ;;  %s1831_s11 = smul.u32 5, %s560_s15  ;;  %s480_s20 = scalar_lea.vmem [#allocation13], %s4601_s24 }
  0xfd   : > { %3251 = vmatprep.subr.bf16.mxu0 %v4624_v19  ;;  %3278 = vmatprep.subr.bf16.mxu1 %v4246_v32  ;;  %v872_v41 = vld [vmem:[%s4610_s7 + $0x28] sm:$0xff]  ;;  %v572_v43 = vld [vmem:[#allocation5 + $0x18] sm:$0xff]  ;;  %v878_v46 = vld [vmem:[%s4610_s7 + $0x58] sm:$0xff]  ;;  %v4670_v48 = vpack.c.bf16 %v895_v39, %v892_v38  ;;  %s2012_s0 = smul.u32 6, %s560_s15  ;;  %v2368_v39 = vstv %s4815_s19  ;;  %p5388_p6 = scmp.ne.s32.totalorder %s5362_s22, 0 }
  0xfe   : > { %2731 = vmatmul.mubr.msk.f32.gmra.mrb[2].mxu0 %vm600_vm0, %v570_v25  ;;  %v4660_v42 = vpack.c.bf16 %v872_v41, %v869_v40  ;;  %v573_v47 = vld [vmem:[#allocation5 + $0x20] sm:$0xff]  ;;  %v891_v49 = vld [vmem:[%s4610_s7 + $0xc0] sm:$0xff]  ;;  %v901_v52 = vld [vmem:[%s4610_s7 + $0x110] sm:$0xff]  ;;  %v4678_v53 = vpack.c.bf16 %v878_v46, %v875_v45  ;;  %s4827_s16 = sadd.s32 %s1831_s11, %s4812_s23  ;;  %v1463_v46 = vstv %s4818_s25 }
  0xff   : > { %701 = vmatprep.mubr.f32.mxu0 %v4244_v0  ;;  %2947 = vmatmul.mubr.msk.f32.vlgmr.msra.gmra.mrb[0].mxu1 %vm600_vm0, %v570_v25  ;;  %v894_v50 = vld [vmem:[%s4610_s7 + $0xd8] sm:$0xff]  ;;  %v881_v54 = vld [vmem:[%s4610_s7 + $0x70] sm:$0xff]  ;;  %v884_v55 = vld [vmem:[%s4610_s7 + $0x88] sm:$0xff]  ;;  %s4830_s21 = sadd.s32 %s2012_s0, %s4812_s23 }
 0x100   : > { %3253 = vmatpush1.bf16.msra.mxu0 %v4633_v26  ;;  %2949 = vmatprep.mubr.msk.f32.mxu1 %vm600_vm0, %v571_v33  ;;  %v898_v51 = vld [vmem:[%s4610_s7 + $0xf8] sm:$0xff]  ;;  %v574_v56 = vld [vmem:[#allocation5 + $0x28] sm:$0xff]  ;;  %v4686_v57 = vpack.c.bf16 %v894_v50, %v891_v49  ;;  %v575_v58 = vld [vmem:[#allocation5 + $0x30] sm:$0xff]  ;;  %v4698_v2 = vpack.c.bf16 %v884_v55, %v881_v54  ;;  %v1644_v49 = vstv %s4824_s26  ;;  %v2006_v54 = vstv %s4827_s16 }
 0x101   : > { %3255 = vmatprep.subr.bf16.mxu0 %v4636_v27  ;;  %3280 = vmatpush3.bf16.msra.mxu1 %v4660_v42  ;;  %v4690_v59 = vpack.c.bf16 %v901_v52, %v898_v51  ;;  %v897_v60 = vld [vmem:[%s4610_s7 + $0xf0] sm:$0xff]  ;;  %v900_v61 = vld [vmem:[%s4610_s7 + $0x108] sm:$0xff]  ;;  %v907_v1 = vld [vmem:[%s4610_s7 + $0x140] sm:$0xff]  ;;  %v1825_v51 = vstv %s4821_s14 }
 0x102   : > { %2732 = vmatmul.mubr.msk.f32.gmra.mrb[4].mxu0 %vm600_vm0, %v571_v33  ;;  %3281 = vmatprep.subr.bf16.mxu1 %v4246_v32  ;;  %v576_v62 = vld [vmem:[#allocation5 + $0x38] sm:$0xff]  ;;  %v904_v63 = vld [vmem:[%s4610_s7 + $0x128] sm:$0xff]  ;;  %v887_v3 = vld [vmem:[%s4610_s7 + $0xa0] sm:$0xff]  ;;  %v4706_v5 = vpack.c.bf16 %v900_v61, %v897_v60  ;;  %v585_v60 = vlaneseq }
 0x103   : > { %707 = vmatprep.mubr.f32.mxu0 %v4244_v0  ;;  %2950 = vmatmul.mubr.msk.f32.gmra.mrb[2].mxu1 %vm600_vm0, %v572_v43  ;;  %v890_v4 = vld [vmem:[%s4610_s7 + $0xb8] sm:$0xff]  ;;  %v4710_v6 = vpack.c.bf16 %v907_v1, %v904_v63  ;;  %v903_v7 = vld [vmem:[%s4610_s7 + $0x120] sm:$0xff]  ;;  %v913_v10 = vld [vmem:[%s4610_s7 + $0x170] sm:$0xff] }
 0x104   : > { %3257 = vmatpush1.bf16.msra.mxu0 %v4646_v34  ;;  %2952 = vmatprep.mubr.msk.f32.mxu1 %vm600_vm0, %v573_v47  ;;  %v906_v8 = vld [vmem:[%s4610_s7 + $0x138] sm:$0xff]  ;;  %v4717_v11 = vpack.c.bf16 %v890_v4, %v887_v3  ;;  %v893_v14 = vld [vmem:[%s4610_s7 + $0xd0] sm:$0xff]  ;;  %v896_v16 = vld [vmem:[%s4610_s7 + $0xe8] sm:$0xff]  ;;  %v586_v61 = vshrl.u32 %v585_v60, 7 }
 0x105   : > { %3259 = vmatprep.subr.bf16.mxu0 %v4650_v35  ;;  %3283 = vmatpush3.bf16.msra.mxu1 %v4678_v53  ;;  %v910_v9 = vld [vmem:[%s4610_s7 + $0x158] sm:$0xff]  ;;  %v4727_v17 = vpack.c.bf16 %v906_v8, %v903_v7  ;;  %v909_v20 = vld [vmem:[%s4610_s7 + $0x150] sm:$0xff]  ;;  %v912_v21 = vld [vmem:[%s4610_s7 + $0x168] sm:$0xff]  ;;  %v4736_v22 = vpack.c.bf16 %v896_v16, %v893_v14 }
 0x106   : > { %2733 = vmatmul.mubr.msk.f32.gmra.mrb[6].mxu0 %vm600_vm0, %v572_v43  ;;  %3284 = vmatprep.subr.bf16.mxu1 %v4246_v32  ;;  %v922_v13 = vld [vmem:[#allocation8] sm:$0xff]  ;;  %v4730_v18 = vpack.c.bf16 %v913_v10, %v910_v9  ;;  %v899_v23 = vld [vmem:[%s4610_s7 + $0x100] sm:$0xff]  ;;  %v4744_v25 = vpack.c.bf16 %v912_v21, %v909_v20  ;;  %v905_v29 = vld [vmem:[%s4610_s7 + $0x130] sm:$0xff]  ;;  %v591_v1 = vsub.s32 1, %v586_v61  ;;  %v595_v7 = vsub.s32 2, %v586_v61 }
 0x107   : > { %713 = vmatprep.mubr.f32.mxu0 %v4244_v0  ;;  %2953 = vmatmul.mubr.msk.f32.gmra.mrb[4].mxu1 %vm600_vm0, %v574_v56  ;;  %v902_v24 = vld [vmem:[%s4610_s7 + $0x118] sm:$0xff]  ;;  %v908_v30 = vld [vmem:[%s4610_s7 + $0x148] sm:$0xff]  ;;  %v911_v36 = vld [vmem:[%s4610_s7 + $0x160] sm:$0xff] }
 0x108   : > { %3261 = vmatpush1.bf16.msra.mxu0 %v4664_v44  ;;  %2955 = vmatprep.mubr.msk.f32.mxu1 %vm600_vm0, %v575_v58  ;;  %v4748_v28 = vpack.c.bf16 %v902_v24, %v899_v23  ;;  %v4758_v31 = vld [vmem:[%s489_s18] sm:$0xff]  ;;  %v4762_v33 = vpack.c.bf16 %v908_v30, %v905_v29  ;;  %v914_v37 = vld [vmem:[%s4610_s7 + $0x178] sm:$0xff]  ;;  %s4841_s7 = sadd.s32 %s4812_s23, %s560_s15  ;;  %s3702_s18 = smul.u32 3, %s4601_s24 }
 0x109   : > { %3263 = vmatprep.subr.bf16.mxu0 %v4670_v48  ;;  %3286 = vmatpush3.bf16.msra.mxu1 %v4698_v2  ;;  %v4772_v38 = vpack.c.bf16 %v914_v37, %v911_v36  ;;  %v1282_v43 = vstv %s4841_s7  ;;  %s928_s15 = smul.u32 56, %s4223_s30 }
 0x10a   : > { %2734 = vmatmul.mubr.msk.f32.gmra.mrb[8].mxu0 %vm600_vm0, %v573_v47  ;;  %3287 = vmatprep.subr.bf16.mxu1 %v4246_v32  ;;  %s472_s3 = scalar_lea.vmem [#allocation12], %s3702_s18 }
 0x10b   : > { %719 = vmatprep.mubr.f32.mxu0 %v4244_v0  ;;  %2956 = vmatmul.mubr.msk.f32.gmra.mrb[6].mxu1 %vm600_vm0, %v576_v62  ;;  %v583_v63 = vld [vmem:[%s472_s3] sm:$0x7]  ;;  %s929_s2 = sshra.s32 %s928_s15, 3  ;;  %s1106_s11 = scalar_lea.vmem [#allocation4], %s928_s15 }
 0x10c   : > { %3265 = vmatpush1.bf16.msra.mxu0 %v4686_v57  ;;  %2990 = vmatprep.mubr.msk.f32.mxu1 %vm4247_vm1, %v4244_v0  ;;  %v4882_v4 = vrot.slane %v583_v63, %v591_v1  ;;  %v596_v14 = vrot.slane %v583_v63, %v595_v7  ;;  %s2788_s4 = smul.u32 24, %s929_s2 }
 0x10d   : > { %3267 = vmatprep.subr.bf16.mxu0 %v4690_v59  ;;  %924 = vperm.xlu0 %3822, %v922_v13  }
 0x10e   : > { %2735 = vmatmul.mubr.msk.f32.gmra.mrb[10].mxu0 %vm600_vm0, %v574_v56  ;;  %3289 = vmatpush3.bf16.msra.mxu1 %v4717_v11  ;;  %v2187_v56 = vstv %s4830_s21  ;;  %s933_s17 = scalar_lea.vmem [#allocation3], %s2788_s4 }
 0x10f   : > { %725 = vmatprep.mubr.f32.mxu0 %v4244_v0  ;;  %3290 = vmatprep.subr.bf16.mxu1 %v4246_v32 }
 0x110   : > { %3269 = vmatpush1.bf16.msra.mxu0 %v4706_v5 }
 0x111   : > { %3271 = vmatprep.subr.bf16.mxu0 %v4710_v6 }
 0x112   : > { %2736 = vmatmul.mubr.msk.f32.gmra.mrb[12].mxu0 %vm600_vm0, %v575_v58  ;;  %3292 = vmatpush3.bf16.msra.mxu1 %v4736_v22 }
 0x113   : > { %731 = vmatprep.mubr.f32.mxu0 %v4244_v0  ;;  %3293 = vmatprep.subr.bf16.mxu1 %v4246_v32 }
 0x114   : > { %3273 = vmatpush1.bf16.msra.mxu0 %v4727_v17 }
 0x115   : > { %3275 = vmatprep.subr.bf16.mxu0 %v4730_v18 }
 0x116   : > { %2737 = vmatmul.mubr.msk.f32.gmra.mrb[14].mxu0 %vm600_vm0, %v576_v62  ;;  %3295 = vmatpush3.bf16.msra.mxu1 %v4748_v28  ;;  %v587_v62 = vsub.s32 0, %v586_v61 }
 0x117   : > { %1001 = vmatprep.mubr.f32.mxu0 %v4244_v0  ;;  %3296 = vmatprep.subr.bf16.mxu1 %v4246_v32 }
 0x118   : > { %3277 = vmatpush1.bf16.msra.mxu0 %v4744_v25  ;;  %v4880_v3 = vrot.slane %v583_v63, %v587_v62 }
 0x119   : > { %3303 = vmatprep.subr.bf16.mxu0 %v4616_v12 }
 0x11a   : > { %3298 = vmatpush3.bf16.msra.mxu1 %v4762_v33 }
 0x11b   : > { %1002 = vmatmul.mubr.f32.vlgmr.msra.gmra.mrb[16].mxu0 %v4758_v31  ;;  %3299 = vmatprep.subr.bf16.mxu1 %v4246_v32 }
 0x11c   : > { %3305 = vmatpush1.bf16.msra.mxu0 %v4620_v15  ;;  %1182 = vmatprep.mubr.f32.mxu0 %v4244_v0 }
 0x11d   : > { %3307 = vmatprep.subr.bf16.mxu0 %v4624_v19 }
 0x11e   : > { %3301 = vmatpush3.bf16.msra.mxu1 %v4772_v38 }
 0x11f   : > { %3334 = vmatprep.subr.bf16.mxu1 %v4246_v32 }
 0x120   : > { %3309 = vmatpush1.bf16.msra.mxu0 %v4633_v26 }
 0x121   : > { %3311 = vmatprep.subr.bf16.mxu0 %v4636_v27  ;;  %2991 = vmatmul.mubr.f32.vlgmr.msra.gmra.mrb[8].mxu1 %v4758_v31 }
 0x122   : > { %3336 = vmatpush3.bf16.msra.mxu1 %v4660_v42  ;;  %3025 = vmatprep.mubr.msk.f32.mxu1 %vm4247_vm1, %v4244_v0 }
 0x123   : > { %3337 = vmatprep.subr.bf16.mxu1 %v4246_v32 }
 0x124   : > { %3313 = vmatpush1.bf16.msra.mxu0 %v4646_v34 }
 0x125   : > { %3315 = vmatprep.subr.bf16.mxu0 %v4650_v35 }
 0x126   : > { %3339 = vmatpush3.bf16.msra.mxu1 %v4678_v53 }
 0x127   : > { %3340 = vmatprep.subr.bf16.mxu1 %v4246_v32 }
 0x128   : > { %3317 = vmatpush1.bf16.msra.mxu0 %v4664_v44 }
 0x129   : > { %3319 = vmatprep.subr.bf16.mxu0 %v4670_v48 }
 0x12a   : > { %3342 = vmatpush3.bf16.msra.mxu1 %v4698_v2 }
 0x12b   : > { %3343 = vmatprep.subr.bf16.mxu1 %v4246_v32 }
 0x12c   : > { %3321 = vmatpush1.bf16.msra.mxu0 %v4686_v57 }
 0x12d   : > { %3323 = vmatprep.subr.bf16.mxu0 %v4690_v59 }
 0x12e   : > { %3345 = vmatpush3.bf16.msra.mxu1 %v4717_v11 }
 0x12f   : > { %3346 = vmatprep.subr.bf16.mxu1 %v4246_v32 }
 0x130   : > { %3325 = vmatpush1.bf16.msra.mxu0 %v4706_v5 }
 0x131   : > { %3327 = vmatprep.subr.bf16.mxu0 %v4710_v6 }
 0x132   : > { %3348 = vmatpush3.bf16.msra.mxu1 %v4736_v22 }
 0x133   : > { %3349 = vmatprep.subr.bf16.mxu1 %v4246_v32 }
 0x134   : > { %3329 = vmatpush1.bf16.msra.mxu0 %v4727_v17 }
 0x135   : > { %3331 = vmatprep.subr.bf16.mxu0 %v4730_v18 }
 0x136   : > { %3351 = vmatpush3.bf16.msra.mxu1 %v4748_v28 }
 0x137   : > { %3352 = vmatprep.subr.bf16.mxu1 %v4246_v32 }
 0x138   : > { %3333 = vmatpush1.bf16.msra.mxu0 %v4744_v25 }
 0x139   : > { %3359 = vmatprep.subr.bf16.mxu0 %v4616_v12 }
 0x13a   : > { %3354 = vmatpush3.bf16.msra.mxu1 %v4762_v33 }
 0x13b   : > { %3355 = vmatprep.subr.bf16.mxu1 %v4246_v32 }
 0x13e   : > { %3357 = vmatpush3.bf16.msra.mxu1 %v4772_v38 }
 0x13f   : > { %3390 = vmatprep.subr.bf16.mxu1 %v4246_v32 }
 0x18c   : > { %v4833_v40 = vpop.permute.xlu0 %924 }
 0x18d   : > { %vm4836_vm2 = vcmp.lt.s32.totalorder %v2368_v39, %v4833_v40  ;;  %vm4845_vm3 = vcmp.lt.s32.totalorder %v1282_v43, %v4833_v40  ;;  %vm4851_vm4 = vcmp.lt.s32.totalorder %v1463_v46, %v4833_v40  ;;  %vm4857_vm5 = vcmp.lt.s32.totalorder %v1644_v49, %v4833_v40 }
 0x18e   : > { %vm4863_vm6 = vcmp.lt.s32.totalorder %v1825_v51, %v4833_v40  ;;  %vm4869_vm7 = vcmp.lt.s32.totalorder %v2006_v54, %v4833_v40  ;;  %vm4875_vm8 = vcmp.lt.s32.totalorder %v2187_v56, %v4833_v40 }
 0x1cd   : > { %v691_v8 = vpop.f32.mrb[0].mxu0 }
 0x1ce   : > { %v692_v9 = vadd.f32 %v691_v8, %v4880_v3  ;;  %v693_v10 = vpop.f32.mrb[1].mxu0 }
 0x1cf   : > { %v694_v13 = vadd.f32 %v693_v10, %v4882_v4 }
 0x1d0   : > { %843 = vst [vmem:[#allocation3] sm:$0xff] %v692_v9 }
 0x1d1   : > { %844 = vst [vmem:[#allocation3 + $0x8] sm:$0xff] %v694_v13  ;;  %v697_v16 = vpop.f32.mrb[2].mxu0 }
 0x1d2   : > { %v698_v20 = vadd.f32 %v697_v16, %v4880_v3  ;;  %v699_v21 = vpop.f32.mrb[3].mxu0  ;;  %v2948_v24 = vpop.f32.mrb[0].mxu1 }
 0x1d3   : > { %v700_v23 = vadd.f32 %v699_v21, %v4882_v4  ;;  %v810_v29 = vadd.f32 %v2948_v24, %v596_v14  ;;  %v804_v30 = vpop.f32.mrb[1].mxu1 }
 0x1d4   : > { %846 = vst [vmem:[#allocation3 + $0x18] sm:$0xff] %v698_v20  ;;  %v805_v37 = vadd.f32 %v804_v30, %v596_v14 }
 0x1d5   : > { %847 = vst [vmem:[#allocation3 + $0x20] sm:$0xff] %v700_v23  ;;  %v703_v36 = vpop.f32.mrb[4].mxu0  ;;  %848 = vst [vmem:[#allocation3 + $0x28] sm:$0xff] %v810_v29 }
 0x1d6   : > { %v704_v39 = vadd.f32 %v703_v36, %v4880_v3  ;;  %v705_v43 = vpop.f32.mrb[5].mxu0  ;;  %845 = vst [vmem:[#allocation3 + $0x10] sm:$0xff] %v805_v37  ;;  %v2951_v49 = vpop.f32.mrb[2].mxu1 }
 0x1d7   : > { %v706_v46 = vadd.f32 %v705_v43, %v4882_v4  ;;  %v820_v51 = vadd.f32 %v2951_v49, %v596_v14  ;;  %v814_v54 = vpop.f32.mrb[3].mxu1 }
 0x1d8   : > { %849 = vst [vmem:[#allocation3 + $0x30] sm:$0xff] %v704_v39  ;;  %v815_v60 = vadd.f32 %v814_v54, %v596_v14 }
 0x1d9   : > { %850 = vst [vmem:[#allocation3 + $0x38] sm:$0xff] %v706_v46  ;;  %v709_v56 = vpop.f32.mrb[6].mxu0  ;;  %854 = vst [vmem:[#allocation3 + $0x58] sm:$0xff] %v820_v51 }
 0x1da   : > { %v710_v61 = vadd.f32 %v709_v56, %v4880_v3  ;;  %v711_v62 = vpop.f32.mrb[7].mxu0  ;;  %851 = vst [vmem:[#allocation3 + $0x40] sm:$0xff] %v815_v60  ;;  %v2954_v1 = vpop.f32.mrb[4].mxu1 }
 0x1db   : > { %v712_v63 = vadd.f32 %v711_v62, %v4882_v4  ;;  %v830_v7 = vadd.f32 %v2954_v1, %v596_v14  ;;  %v824_v8 = vpop.f32.mrb[5].mxu1 }
 0x1dc   : > { %852 = vst [vmem:[#allocation3 + $0x48] sm:$0xff] %v710_v61  ;;  %v825_v10 = vadd.f32 %v824_v8, %v596_v14 }
 0x1dd   : > { %853 = vst [vmem:[#allocation3 + $0x50] sm:$0xff] %v712_v63  ;;  %v715_v9 = vpop.f32.mrb[8].mxu0  ;;  %860 = vst [vmem:[#allocation3 + $0x88] sm:$0xff] %v830_v7 }
 0x1de   : > { %v716_v13 = vadd.f32 %v715_v9, %v4880_v3  ;;  %v717_v16 = vpop.f32.mrb[9].mxu0  ;;  %857 = vst [vmem:[#allocation3 + $0x70] sm:$0xff] %v825_v10  ;;  %v2957_v21 = vpop.f32.mrb[6].mxu1 }
 0x1df   : > { %v718_v20 = vadd.f32 %v717_v16, %v4882_v4  ;;  %v840_v23 = vadd.f32 %v2957_v21, %v596_v14  ;;  %v834_v24 = vpop.f32.mrb[7].mxu1  ;;  %v4904_v21 = vld [vmem:[%s480_s20] ss:$0 sm:$0xff] }
 0x1e0   : > { %855 = vst [vmem:[#allocation3 + $0x60] sm:$0xff] %v716_v13  ;;  %v835_v30 = vadd.f32 %v834_v24, %v596_v14 }
 0x1e1   : > { %856 = vst [vmem:[#allocation3 + $0x68] sm:$0xff] %v718_v20  ;;  %v721_v29 = vpop.f32.mrb[10].mxu0  ;;  %866 = vst [vmem:[#allocation3 + $0xb8] sm:$0xff] %v840_v23 }
 0x1e2   : > { %v722_v36 = vadd.f32 %v721_v29, %v4880_v3  ;;  %v723_v37 = vpop.f32.mrb[11].mxu0  ;;  %863 = vst [vmem:[#allocation3 + $0xa0] sm:$0xff] %v835_v30 }
 0x1e3   : > { %v724_v39 = vadd.f32 %v723_v37, %v4882_v4 }
 0x1e4   : > { %858 = vst [vmem:[#allocation3 + $0x78] sm:$0xff] %v722_v36 }
 0x1e5   : > { %859 = vst [vmem:[#allocation3 + $0x80] sm:$0xff] %v724_v39  ;;  %v727_v43 = vpop.f32.mrb[12].mxu0 }
 0x1e6   : > { %v728_v46 = vadd.f32 %v727_v43, %v4880_v3  ;;  %v729_v49 = vpop.f32.mrb[13].mxu0 }
 0x1e7   : > { %v730_v51 = vadd.f32 %v729_v49, %v4882_v4 }
 0x1e8   : > { %861 = vst [vmem:[#allocation3 + $0x90] sm:$0xff] %v728_v46  ;;  %v1101_v46 = vstv %s4812_s23  ;;  %s2751_s23 = sshll.u32 %s4841_s7, 3  ;;  %s2756_s7 = sshll.u32 %s4818_s25, 3 }
 0x1e9   : > { %862 = vst [vmem:[#allocation3 + $0x98] sm:$0xff] %v730_v51  ;;  %v733_v14 = vpop.f32.mrb[14].mxu0  ;;  %vm1102_vm9 = vcmp.lt.s32.totalorder %v1101_v46, %v4833_v40  ;;  %s1110_s0 = sshra.s32 %s2751_s23, 3  ;;  %s1286_s15 = scalar_lea.vmem [#allocation4], %s2751_s23 }
 0x1ea   : > { %v734_v54 = vadd.f32 %v733_v14, %v4880_v3  ;;  %v735_v56 = vpop.f32.mrb[15].mxu0  ;;  %s2789_s18 = smul.u32 24, %s1110_s0  ;;  %s1291_s2 = sshra.s32 %s2756_s7, 3 }
 0x1eb   : > { %v736_v60 = vadd.f32 %v735_v56, %v4882_v4  ;;  %s2790_s4 = smul.u32 24, %s1291_s2  ;;  %s1467_s20 = scalar_lea.vmem [#allocation4], %s2756_s7 }
 0x1ec   : > { %864 = vst [vmem:[#allocation3 + $0xa8] sm:$0xff] %v734_v54  ;;  %s1114_s3 = scalar_lea.vmem [#allocation3], %s2789_s18  ;;  %s2760_s25 = sshll.u32 %s4824_s26, 3 }
 0x1ed   : > { %865 = vst [vmem:[#allocation3 + $0xb0] sm:$0xff] %v736_v60  ;;  %s1648_s18 = scalar_lea.vmem [#allocation4], %s2760_s25  ;;  %s2765_s26 = sshll.u32 %s4821_s14, 3 }
 0x1ee   : > { %v1003_v61 = vpop.f32.mrb[16].mxu0  ;;  %s1829_s2 = scalar_lea.vmem [#allocation4], %s2765_s26  ;;  %s2769_s14 = sshll.u32 %s4827_s16, 3 }
 0x1ef   : > { %v1005_v62 = vpop.f32.mrb[17].mxu0  ;;  %s2773_s16 = sshll.u32 %s4830_s21, 3  ;;  %s2784_s21 = sshll.u32 %s4223_s30, 7 }
 0x1f4   : > { %v934_v63 = vld [vmem:[%s933_s17] sm:$0xff]  ;;  %v935_v7 = vld [vmem:[%s933_s17 + $0x8] sm:$0xff]  ;;  %v1074_v9 = vpop.f32.mrb[8].mxu1  ;;  %v936_v36 = vld [vmem:[%s933_s17 + $0x10] sm:$0xff]  ;;  %s1295_s17 = scalar_lea.vmem [#allocation3], %s2790_s4  ;;  %s1834_s4 = sshra.s32 %s2769_s14, 3 }
 0x1f5   : > { %v1078_v1 = vadd.f32 %v1003_v61, %v934_v63  ;;  %v1085_v10 = vadd.f32 %v1005_v62, %v935_v7  ;;  %v2992_v13 = vpop.f32.mrb[9].mxu1  ;;  %v1092_v24 = vadd.f32 %v4904_v21, %v1074_v9  ;;  %v1116_v63 = vld [vmem:[%s1114_s3 + $0x8] sm:$0xff]  ;;  %v1296_v45 = vld [vmem:[%s1295_s17] sm:$0xff] }
 0x1f7   : > { %v2748_v8 = vmul.f32 -1.442695, %v1078_v1  ;;  %v2749_v3 = vmul.f32 -1.442695, %v1085_v10 }
 0x1f9   : > { %3823 = vpow2.f32 %v2748_v8 }
 0x1fa   : > { %3825 = vpow2.f32 %v2749_v3 }
 0x203   : > { %v3824_v16 = vpop.eup %3823 }
 0x204   : > { %v1082_v4 = vadd.f32 1.0, %v3824_v16  ;;  %v3826_v20 = vpop.eup %3825 }
 0x205   : > { %v1089_v23 = vadd.f32 1.0, %v3826_v20 }
 0x206   : > { %3827 = vrcp.f32 %v1082_v4 }
 0x207   : > { %3829 = vrcp.f32 %v1089_v23 }
 0x210   : > { %v3828_v29 = vpop.eup %3827 }
 0x211   : > { %v1093_v30 = vmul.f32 %v3828_v29, %v1092_v24  ;;  %v3830_v39 = vpop.eup %3829  ;;  %v1117_v29 = vld [vmem:[%s1114_s3 + $0x10] sm:$0xff] }
 0x212   : > { %v1096_v43 = vsub.f32 1.0, %v3830_v39  ;;  %v1098_v14 = vmul.f32 %v3830_v39, %v4758_v31 }
 0x213   : > { %v1094_v37 = vadd.f32 %v1093_v30, %v936_v36 }
 0x215   : > { %3831 = vtanh.f32 %v1094_v37 }
 0x21f   : > { %v3832_v49 = vpop.eup %3831 }
 0x220   : > { %v1097_v51 = vmul.f32 %v3832_v49, %v1096_v43 }
 0x222   : > { %v1099_v54 = vadd.f32 %v1098_v14, %v1097_v51 }
 0x224   : > { %v4911_v56 = vsel %vm1102_vm9, %v1099_v54, %v4758_v31  ;;  %v1104_v60 = vsel %vm1102_vm9, %v1099_v54, 0.0  ;;  %v1115_v31 = vld [vmem:[%s1114_s3] sm:$0xff]  ;;  %s1653_s3 = sshra.s32 %s2765_s26, 3  ;;  %s2777_s26 = sshll.u32 %s4815_s19, 3 }
 0x225   : > { %1107 = vst [vmem:[%s1106_s11] sm:$0xff] %v1104_v60  ;;  %1183 = vmatmul.mubr.f32.vlgmr.msra.gmra.mrb[18].mxu0 %v4911_v56  ;;  %3026 = vmatmul.mubr.f32.vlgmr.msra.gmra.mrb[10].mxu1 %v4911_v56  ;;  %s1472_s11 = sshra.s32 %s2760_s25, 3  ;;  %s2010_s25 = scalar_lea.vmem [#allocation4], %s2769_s14 }
 0x226   : > { %3361 = vmatpush1.bf16.msra.mxu0 %v4620_v15  ;;  %3392 = vmatpush3.bf16.msra.mxu1 %v4660_v42  ;;  %s2791_s23 = smul.u32 24, %s1472_s11  ;;  %s2015_s11 = sshra.s32 %s2773_s16, 3 }
 0x227   : > { %3363 = vmatprep.subr.bf16.mxu0 %v4624_v19  ;;  %3393 = vmatprep.subr.bf16.mxu1 %v4246_v32 }
 0x228   : > { %1363 = vmatprep.mubr.f32.mxu0 %v4244_v0  ;;  %3060 = vmatprep.mubr.msk.f32.mxu1 %vm4247_vm1, %v4244_v0  ;;  %s1476_s0 = scalar_lea.vmem [#allocation3], %s2791_s23  ;;  %s2794_s23 = smul.u32 24, %s2015_s11 }
 0x229   : > { %v1477_v47 = vld [vmem:[%s1476_s0] sm:$0xff] }
 0x22a   : > { %3365 = vmatpush1.bf16.msra.mxu0 %v4633_v26  ;;  %3395 = vmatpush3.bf16.msra.mxu1 %v4678_v53 }
 0x22b   : > { %3367 = vmatprep.subr.bf16.mxu0 %v4636_v27  ;;  %3396 = vmatprep.subr.bf16.mxu1 %v4246_v32 }
 0x22e   : > { %3369 = vmatpush1.bf16.msra.mxu0 %v4646_v34  ;;  %3398 = vmatpush3.bf16.msra.mxu1 %v4698_v2 }
 0x22f   : > { %3371 = vmatprep.subr.bf16.mxu0 %v4650_v35  ;;  %3399 = vmatprep.subr.bf16.mxu1 %v4246_v32 }
 0x232   : > { %3373 = vmatpush1.bf16.msra.mxu0 %v4664_v44  ;;  %3401 = vmatpush3.bf16.msra.mxu1 %v4717_v11 }
 0x233   : > { %3375 = vmatprep.subr.bf16.mxu0 %v4670_v48  ;;  %3402 = vmatprep.subr.bf16.mxu1 %v4246_v32 }
 0x236   : > { %3377 = vmatpush1.bf16.msra.mxu0 %v4686_v57  ;;  %3404 = vmatpush3.bf16.msra.mxu1 %v4736_v22 }
 0x237   : > { %3379 = vmatprep.subr.bf16.mxu0 %v4690_v59  ;;  %3405 = vmatprep.subr.bf16.mxu1 %v4246_v32 }
 0x23a   : > { %3381 = vmatpush1.bf16.msra.mxu0 %v4706_v5  ;;  %3407 = vmatpush3.bf16.msra.mxu1 %v4748_v28 }
 0x23b   : > { %3383 = vmatprep.subr.bf16.mxu0 %v4710_v6  ;;  %3408 = vmatprep.subr.bf16.mxu1 %v4246_v32 }
 0x23e   : > { %3385 = vmatpush1.bf16.msra.mxu0 %v4727_v17  ;;  %3410 = vmatpush3.bf16.msra.mxu1 %v4762_v33 }
 0x23f   : > { %3387 = vmatprep.subr.bf16.mxu0 %v4730_v18  ;;  %3411 = vmatprep.subr.bf16.mxu1 %v4246_v32 }
 0x242   : > { %3389 = vmatpush1.bf16.msra.mxu0 %v4744_v25  ;;  %3413 = vmatpush3.bf16.msra.mxu1 %v4772_v38 }
 0x243   : > { %3415 = vmatprep.subr.bf16.mxu0 %v4616_v12  ;;  %3446 = vmatprep.subr.bf16.mxu1 %v4246_v32 }
 0x2f8   : > { %v1184_v40 = vpop.f32.mrb[18].mxu0  ;;  %v1255_v61 = vpop.f32.mrb[10].mxu1 }
 0x2f9   : > { %v1259_v62 = vadd.f32 %v1184_v40, %v1115_v31  ;;  %v1186_v1 = vpop.f32.mrb[19].mxu0  ;;  %v3027_v7 = vpop.f32.mrb[11].mxu1  ;;  %v1273_v20 = vadd.f32 %v4904_v21, %v1255_v61  ;;  %v1297_v31 = vld [vmem:[%s1295_s17 + $0x8] sm:$0xff] }
 0x2fa   : > { %v1266_v8 = vadd.f32 %v1186_v1, %v1116_v63 }
 0x2fb   : > { %v2753_v9 = vmul.f32 -1.442695, %v1259_v62 }
 0x2fc   : > { %v2754_v10 = vmul.f32 -1.442695, %v1266_v8 }
 0x2fd   : > { %3833 = vpow2.f32 %v2753_v9 }
 0x2fe   : > { %3835 = vpow2.f32 %v2754_v10 }
 0x307   : > { %v3834_v13 = vpop.eup %3833 }
 0x308   : > { %v1263_v3 = vadd.f32 1.0, %v3834_v13  ;;  %v3836_v16 = vpop.eup %3835 }
 0x309   : > { %v1270_v4 = vadd.f32 1.0, %v3836_v16 }
 0x30a   : > { %3837 = vrcp.f32 %v1263_v3 }
 0x30b   : > { %3839 = vrcp.f32 %v1270_v4  ;;  %v1298_v4 = vld [vmem:[%s1295_s17 + $0x10] sm:$0xff]  ;;  %s2793_s17 = smul.u32 24, %s1834_s4  ;;  %s2727_s4 = sshll.u32 %s4601_s24, 6 }
 0x314   : > { %v3838_v23 = vpop.eup %3837 }
 0x315   : > { %v1274_v24 = vmul.f32 %v3838_v23, %v1273_v20  ;;  %v3840_v36 = vpop.eup %3839 }
 0x316   : > { %v1277_v37 = vsub.f32 1.0, %v3840_v36  ;;  %v1279_v46 = vmul.f32 %v3840_v36, %v4911_v56 }
 0x317   : > { %v1275_v30 = vadd.f32 %v1274_v24, %v1117_v29 }
 0x319   : > { %3841 = vtanh.f32 %v1275_v30 }
 0x323   : > { %v3842_v39 = vpop.eup %3841 }
 0x324   : > { %v1278_v43 = vmul.f32 %v3842_v39, %v1277_v37 }
 0x326   : > { %v1280_v49 = vadd.f32 %v1279_v46, %v1278_v43 }
 0x328   : > { %v4960_v51 = vsel %vm4845_vm3, %v1280_v49, %v4911_v56  ;;  %v1285_v14 = vsel %vm4845_vm3, %v1280_v49, 0.0 }
 0x329   : > { %1287 = vst [vmem:[%s1286_s15] sm:$0xff] %v1285_v14  ;;  %1364 = vmatmul.mubr.f32.vlgmr.msra.gmra.mrb[20].mxu0 %v4960_v51  ;;  %3061 = vmatmul.mubr.f32.vlgmr.msra.gmra.mrb[12].mxu1 %v4960_v51  ;;  %v1478_v14 = vld [vmem:[%s1476_s0 + $0x8] sm:$0xff]  ;;  %s2792_s15 = smul.u32 24, %s1653_s3  ;;  %s2196_s3 = sshra.s32 %s2777_s26, 3 }
 0x32a   : > { %3417 = vmatpush1.bf16.msra.mxu0 %v4620_v15  ;;  %3448 = vmatpush3.bf16.msra.mxu1 %v4660_v42 }
 0x32b   : > { %3419 = vmatprep.subr.bf16.mxu0 %v4624_v19  ;;  %3449 = vmatprep.subr.bf16.mxu1 %v4246_v32  ;;  %s1657_s7 = scalar_lea.vmem [#allocation3], %s2792_s15  ;;  %s2795_s15 = smul.u32 24, %s2196_s3 }
 0x32c   : > { %1544 = vmatprep.mubr.f32.mxu0 %v4244_v0  ;;  %3095 = vmatprep.mubr.msk.f32.mxu1 %vm4247_vm1, %v4244_v0  ;;  %v1658_v50 = vld [vmem:[%s1657_s7] sm:$0xff] }
 0x32e   : > { %3421 = vmatpush1.bf16.msra.mxu0 %v4633_v26  ;;  %3451 = vmatpush3.bf16.msra.mxu1 %v4678_v53 }
 0x32f   : > { %3423 = vmatprep.subr.bf16.mxu0 %v4636_v27  ;;  %3452 = vmatprep.subr.bf16.mxu1 %v4246_v32 }
 0x332   : > { %3425 = vmatpush1.bf16.msra.mxu0 %v4646_v34  ;;  %3454 = vmatpush3.bf16.msra.mxu1 %v4698_v2 }
 0x333   : > { %3427 = vmatprep.subr.bf16.mxu0 %v4650_v35  ;;  %3455 = vmatprep.subr.bf16.mxu1 %v4246_v32 }
 0x336   : > { %3429 = vmatpush1.bf16.msra.mxu0 %v4664_v44  ;;  %3457 = vmatpush3.bf16.msra.mxu1 %v4717_v11 }
 0x337   : > { %3431 = vmatprep.subr.bf16.mxu0 %v4670_v48  ;;  %3458 = vmatprep.subr.bf16.mxu1 %v4246_v32 }
 0x33a   : > { %3433 = vmatpush1.bf16.msra.mxu0 %v4686_v57  ;;  %3460 = vmatpush3.bf16.msra.mxu1 %v4736_v22 }
 0x33b   : > { %3435 = vmatprep.subr.bf16.mxu0 %v4690_v59  ;;  %3461 = vmatprep.subr.bf16.mxu1 %v4246_v32 }
 0x33e   : > { %3437 = vmatpush1.bf16.msra.mxu0 %v4706_v5  ;;  %3463 = vmatpush3.bf16.msra.mxu1 %v4748_v28 }
 0x33f   : > { %3439 = vmatprep.subr.bf16.mxu0 %v4710_v6  ;;  %3464 = vmatprep.subr.bf16.mxu1 %v4246_v32 }
 0x342   : > { %3441 = vmatpush1.bf16.msra.mxu0 %v4727_v17  ;;  %3466 = vmatpush3.bf16.msra.mxu1 %v4762_v33 }
 0x343   : > { %3443 = vmatprep.subr.bf16.mxu0 %v4730_v18  ;;  %3467 = vmatprep.subr.bf16.mxu1 %v4246_v32 }
 0x346   : > { %3445 = vmatpush1.bf16.msra.mxu0 %v4744_v25  ;;  %3469 = vmatpush3.bf16.msra.mxu1 %v4772_v38 }
 0x347   : > { %3471 = vmatprep.subr.bf16.mxu0 %v4616_v12  ;;  %3502 = vmatprep.subr.bf16.mxu1 %v4246_v32 }
 0x3fc   : > { %v1365_v54 = vpop.f32.mrb[20].mxu0  ;;  %v1436_v56 = vpop.f32.mrb[12].mxu1 }
 0x3fd   : > { %v1440_v60 = vadd.f32 %v1365_v54, %v1296_v45  ;;  %v1367_v40 = vpop.f32.mrb[21].mxu0  ;;  %v3062_v61 = vpop.f32.mrb[13].mxu1  ;;  %v1454_v13 = vadd.f32 %v4904_v21, %v1436_v56 }
 0x3fe   : > { %v1447_v62 = vadd.f32 %v1367_v40, %v1297_v31 }
 0x3ff   : > { %v2758_v63 = vmul.f32 -1.442695, %v1440_v60 }
 0x400   : > { %v2759_v1 = vmul.f32 -1.442695, %v1447_v62 }
 0x401   : > { %3843 = vpow2.f32 %v2758_v63 }
 0x402   : > { %3845 = vpow2.f32 %v2759_v1 }
 0x40b   : > { %v3844_v7 = vpop.eup %3843 }
 0x40c   : > { %v1444_v8 = vadd.f32 1.0, %v3844_v7  ;;  %v3846_v9 = vpop.eup %3845 }
 0x40d   : > { %v1451_v10 = vadd.f32 1.0, %v3846_v9  ;;  %v1479_v9 = vld [vmem:[%s1476_s0 + $0x10] sm:$0xff]  ;;  %s2019_s0 = scalar_lea.vmem [#allocation3], %s2794_s23  ;;  %s4248_s23 = smov [#allocation16]  }
 0x40e   : > { %3847 = vrcp.f32 %v1444_v8 }
 0x40f   : > { %3849 = vrcp.f32 %v1451_v10 }
 0x418   : > { %v3848_v3 = vpop.eup %3847 }
 0x419   : > { %v1455_v16 = vmul.f32 %v3848_v3, %v1454_v13  ;;  %v3850_v23 = vpop.eup %3849 }
 0x41a   : > { %v1458_v24 = vsub.f32 1.0, %v3850_v23  ;;  %v1460_v36 = vmul.f32 %v3850_v23, %v4960_v51 }
 0x41b   : > { %v1456_v20 = vadd.f32 %v1455_v16, %v1298_v4 }
 0x41d   : > { %3851 = vtanh.f32 %v1456_v20 }
 0x427   : > { %v3852_v29 = vpop.eup %3851 }
 0x428   : > { %v1459_v30 = vmul.f32 %v3852_v29, %v1458_v24 }
 0x42a   : > { %v1461_v37 = vadd.f32 %v1460_v36, %v1459_v30 }
 0x42c   : > { %v5011_v39 = vsel %vm4851_vm4, %v1461_v37, %v4960_v51  ;;  %v1466_v43 = vsel %vm4851_vm4, %v1461_v37, 0.0 }
 0x42d   : > { %1468 = vst [vmem:[%s1467_s20] sm:$0xff] %v1466_v43  ;;  %1545 = vmatmul.mubr.f32.vlgmr.msra.gmra.mrb[22].mxu0 %v5011_v39  ;;  %3096 = vmatmul.mubr.f32.vlgmr.msra.gmra.mrb[14].mxu1 %v5011_v39  ;;  %s1838_s20 = scalar_lea.vmem [#allocation3], %s2793_s17 }
 0x42e   : > { %3473 = vmatpush1.bf16.msra.mxu0 %v4620_v15  ;;  %3504 = vmatpush3.bf16.msra.mxu1 %v4660_v42  ;;  %v1839_v52 = vld [vmem:[%s1838_s20] sm:$0xff] }
 0x42f   : > { %3475 = vmatprep.subr.bf16.mxu0 %v4624_v19  ;;  %3505 = vmatprep.subr.bf16.mxu1 %v4246_v32 }
 0x430   : > { %1725 = vmatprep.mubr.f32.mxu0 %v4244_v0  ;;  %3130 = vmatprep.mubr.msk.f32.mxu1 %vm4247_vm1, %v4244_v0 }
 0x432   : > { %3477 = vmatpush1.bf16.msra.mxu0 %v4633_v26  ;;  %3507 = vmatpush3.bf16.msra.mxu1 %v4678_v53 }
 0x433   : > { %3479 = vmatprep.subr.bf16.mxu0 %v4636_v27  ;;  %3508 = vmatprep.subr.bf16.mxu1 %v4246_v32 }
 0x436   : > { %3481 = vmatpush1.bf16.msra.mxu0 %v4646_v34  ;;  %3510 = vmatpush3.bf16.msra.mxu1 %v4698_v2 }
 0x437   : > { %3483 = vmatprep.subr.bf16.mxu0 %v4650_v35  ;;  %3511 = vmatprep.subr.bf16.mxu1 %v4246_v32 }
 0x43a   : > { %3485 = vmatpush1.bf16.msra.mxu0 %v4664_v44  ;;  %3513 = vmatpush3.bf16.msra.mxu1 %v4717_v11 }
 0x43b   : > { %3487 = vmatprep.subr.bf16.mxu0 %v4670_v48  ;;  %3514 = vmatprep.subr.bf16.mxu1 %v4246_v32 }
 0x43e   : > { %3489 = vmatpush1.bf16.msra.mxu0 %v4686_v57  ;;  %3516 = vmatpush3.bf16.msra.mxu1 %v4736_v22 }
 0x43f   : > { %3491 = vmatprep.subr.bf16.mxu0 %v4690_v59  ;;  %3517 = vmatprep.subr.bf16.mxu1 %v4246_v32 }
 0x442   : > { %3493 = vmatpush1.bf16.msra.mxu0 %v4706_v5  ;;  %3519 = vmatpush3.bf16.msra.mxu1 %v4748_v28 }
 0x443   : > { %3495 = vmatprep.subr.bf16.mxu0 %v4710_v6  ;;  %3520 = vmatprep.subr.bf16.mxu1 %v4246_v32 }
 0x446   : > { %3497 = vmatpush1.bf16.msra.mxu0 %v4727_v17  ;;  %3522 = vmatpush3.bf16.msra.mxu1 %v4762_v33 }
 0x447   : > { %3499 = vmatprep.subr.bf16.mxu0 %v4730_v18  ;;  %3523 = vmatprep.subr.bf16.mxu1 %v4246_v32 }
 0x44a   : > { %3501 = vmatpush1.bf16.msra.mxu0 %v4744_v25  ;;  %3525 = vmatpush3.bf16.msra.mxu1 %v4772_v38 }
 0x44b   : > { %3527 = vmatprep.subr.bf16.mxu0 %v4616_v12  ;;  %3558 = vmatprep.subr.bf16.mxu1 %v4246_v32 }
 0x500   : > { %v1546_v46 = vpop.f32.mrb[22].mxu0  ;;  %v1617_v49 = vpop.f32.mrb[14].mxu1 }
 0x501   : > { %v1621_v51 = vadd.f32 %v1546_v46, %v1477_v47  ;;  %v1548_v45 = vpop.f32.mrb[23].mxu0  ;;  %v3097_v54 = vpop.f32.mrb[15].mxu1  ;;  %v1635_v1 = vadd.f32 %v4904_v21, %v1617_v49 }
 0x502   : > { %v1628_v56 = vadd.f32 %v1548_v45, %v1478_v14 }
 0x503   : > { %v2762_v60 = vmul.f32 -1.442695, %v1621_v51 }
 0x504   : > { %v2763_v31 = vmul.f32 -1.442695, %v1628_v56 }
 0x505   : > { %3853 = vpow2.f32 %v2762_v60 }
 0x506   : > { %3855 = vpow2.f32 %v2763_v31 }
 0x50f   : > { %v3854_v40 = vpop.eup %3853 }
 0x510   : > { %v1625_v61 = vadd.f32 1.0, %v3854_v40  ;;  %v3856_v62 = vpop.eup %3855 }
 0x511   : > { %v1632_v63 = vadd.f32 1.0, %v3856_v62 }
 0x512   : > { %3857 = vrcp.f32 %v1625_v61  ;;  %v1660_v61 = vld [vmem:[%s1657_s7 + $0x10] sm:$0xff] }
 0x513   : > { %3859 = vrcp.f32 %v1632_v63 }
 0x51c   : > { %v3858_v7 = vpop.eup %3857 }
 0x51d   : > { %v1636_v8 = vmul.f32 %v3858_v7, %v1635_v1  ;;  %v3860_v13 = vpop.eup %3859 }
 0x51e   : > { %v1639_v3 = vsub.f32 1.0, %v3860_v13  ;;  %v1641_v20 = vmul.f32 %v3860_v13, %v5011_v39 }
 0x51f   : > { %v1637_v10 = vadd.f32 %v1636_v8, %v1479_v9 }
 0x521   : > { %3861 = vtanh.f32 %v1637_v10 }
 0x52b   : > { %v3862_v16 = vpop.eup %3861 }
 0x52c   : > { %v1640_v4 = vmul.f32 %v3862_v16, %v1639_v3 }
 0x52e   : > { %v1642_v23 = vadd.f32 %v1641_v20, %v1640_v4 }
 0x530   : > { %v5062_v24 = vsel %vm4857_vm5, %v1642_v23, %v5011_v39  ;;  %v1647_v29 = vsel %vm4857_vm5, %v1642_v23, 0.0  ;;  %v1659_v39 = vld [vmem:[%s1657_s7 + $0x8] sm:$0xff]  ;;  %s2200_s7 = scalar_lea.vmem [#allocation3], %s2795_s15 }
 0x531   : > { %1649 = vst [vmem:[%s1648_s18] sm:$0xff] %v1647_v29  ;;  %1726 = vmatmul.mubr.f32.vlgmr.msra.gmra.mrb[24].mxu0 %v5062_v24  ;;  %3131 = vmatmul.mubr.f32.vlgmr.msra.gmra.mrb[16].mxu1 %v5062_v24  ;;  %v1840_v23 = vld [vmem:[%s1838_s20 + $0x8] sm:$0xff]  ;;  %s2191_s18 = scalar_lea.vmem [#allocation4], %s2773_s16  ;;  %s2401_s16 = scalar_lea.sflag [#allocation17], %s4601_s24 }
 0x532   : > { %3529 = vmatpush1.bf16.msra.mxu0 %v4620_v15  ;;  %3560 = vmatpush3.bf16.msra.mxu1 %v4660_v42 }
 0x533   : > { %3531 = vmatprep.subr.bf16.mxu0 %v4624_v19  ;;  %3561 = vmatprep.subr.bf16.mxu1 %v4246_v32 }
 0x534   : > { %1906 = vmatprep.mubr.f32.mxu0 %v4244_v0  ;;  %3165 = vmatprep.mubr.msk.f32.mxu1 %vm4247_vm1, %v4244_v0 }
 0x536   : > { %3533 = vmatpush1.bf16.msra.mxu0 %v4633_v26  ;;  %3563 = vmatpush3.bf16.msra.mxu1 %v4678_v53 }
 0x537   : > { %3535 = vmatprep.subr.bf16.mxu0 %v4636_v27  ;;  %3564 = vmatprep.subr.bf16.mxu1 %v4246_v32 }
 0x53a   : > { %3537 = vmatpush1.bf16.msra.mxu0 %v4646_v34  ;;  %3566 = vmatpush3.bf16.msra.mxu1 %v4698_v2 }
 0x53b   : > { %3539 = vmatprep.subr.bf16.mxu0 %v4650_v35  ;;  %3567 = vmatprep.subr.bf16.mxu1 %v4246_v32 }
 0x53e   : > { %3541 = vmatpush1.bf16.msra.mxu0 %v4664_v44  ;;  %3569 = vmatpush3.bf16.msra.mxu1 %v4717_v11 }
 0x53f   : > { %3543 = vmatprep.subr.bf16.mxu0 %v4670_v48  ;;  %3570 = vmatprep.subr.bf16.mxu1 %v4246_v32 }
 0x542   : > { %3545 = vmatpush1.bf16.msra.mxu0 %v4686_v57  ;;  %3572 = vmatpush3.bf16.msra.mxu1 %v4736_v22 }
 0x543   : > { %3547 = vmatprep.subr.bf16.mxu0 %v4690_v59  ;;  %3573 = vmatprep.subr.bf16.mxu1 %v4246_v32 }
 0x546   : > { %3549 = vmatpush1.bf16.msra.mxu0 %v4706_v5  ;;  %3575 = vmatpush3.bf16.msra.mxu1 %v4748_v28 }
 0x547   : > { %3551 = vmatprep.subr.bf16.mxu0 %v4710_v6  ;;  %3576 = vmatprep.subr.bf16.mxu1 %v4246_v32 }
 0x54a   : > { %3553 = vmatpush1.bf16.msra.mxu0 %v4727_v17  ;;  %3578 = vmatpush3.bf16.msra.mxu1 %v4762_v33 }
 0x54b   : > { %3555 = vmatprep.subr.bf16.mxu0 %v4730_v18  ;;  %3579 = vmatprep.subr.bf16.mxu1 %v4246_v32 }
 0x54e   : > { %3557 = vmatpush1.bf16.msra.mxu0 %v4744_v25  ;;  %3581 = vmatpush3.bf16.msra.mxu1 %v4772_v38 }
 0x54f   : > { %3583 = vmatprep.subr.bf16.mxu0 %v4616_v12  ;;  %3614 = vmatprep.subr.bf16.mxu1 %v4246_v32 }
 0x604   : > { %v1727_v30 = vpop.f32.mrb[24].mxu0  ;;  %v1798_v36 = vpop.f32.mrb[16].mxu1 }
 0x605   : > { %v1802_v37 = vadd.f32 %v1727_v30, %v1658_v50  ;;  %v1729_v43 = vpop.f32.mrb[25].mxu0  ;;  %v3132_v47 = vpop.f32.mrb[17].mxu1  ;;  %v1816_v60 = vadd.f32 %v4904_v21, %v1798_v36 }
 0x606   : > { %v1809_v46 = vadd.f32 %v1729_v43, %v1659_v39 }
 0x607   : > { %v2767_v49 = vmul.f32 -1.442695, %v1802_v37 }
 0x608   : > { %v2768_v51 = vmul.f32 -1.442695, %v1809_v46 }
 0x609   : > { %3863 = vpow2.f32 %v2767_v49 }
 0x60a   : > { %3865 = vpow2.f32 %v2768_v51  ;;  %v1841_v51 = vld [vmem:[%s1838_s20 + $0x10] sm:$0xff] }
 0x613   : > { %v3864_v14 = vpop.eup %3863 }
 0x614   : > { %v1806_v45 = vadd.f32 1.0, %v3864_v14  ;;  %v3866_v54 = vpop.eup %3865 }
 0x615   : > { %v1813_v56 = vadd.f32 1.0, %v3866_v54 }
 0x616   : > { %3867 = vrcp.f32 %v1806_v45 }
 0x617   : > { %3869 = vrcp.f32 %v1813_v56 }
 0x620   : > { %v3868_v31 = vpop.eup %3867 }
 0x621   : > { %v1817_v40 = vmul.f32 %v3868_v31, %v1816_v60  ;;  %v3870_v63 = vpop.eup %3869 }
 0x622   : > { %v1820_v1 = vsub.f32 1.0, %v3870_v63  ;;  %v1822_v9 = vmul.f32 %v3870_v63, %v5062_v24 }
 0x623   : > { %v1818_v62 = vadd.f32 %v1817_v40, %v1660_v61 }
 0x625   : > { %3871 = vtanh.f32 %v1818_v62 }
 0x62f   : > { %v3872_v7 = vpop.eup %3871 }
 0x630   : > { %v1821_v8 = vmul.f32 %v3872_v7, %v1820_v1  ;;  %v2201_v1 = vld [vmem:[%s2200_s7] sm:$0xff] }
 0x632   : > { %v1823_v10 = vadd.f32 %v1822_v9, %v1821_v8 }
 0x634   : > { %v5113_v13 = vsel %vm4863_vm6, %v1823_v10, %v5062_v24  ;;  %v1828_v3 = vsel %vm4863_vm6, %v1823_v10, 0.0  ;;  %v2202_v10 = vld [vmem:[%s2200_s7 + $0x8] sm:$0xff] }
 0x635   : > { %1830 = vst [vmem:[%s1829_s2] sm:$0xff] %v1828_v3  ;;  %1907 = vmatmul.mubr.f32.vlgmr.msra.gmra.mrb[26].mxu0 %v5113_v13  ;;  %3166 = vmatmul.mubr.f32.vlgmr.msra.gmra.mrb[18].mxu1 %v5113_v13  ;;  %s550_s2 = scalar_lea.vmem [#allocation16], %s2726_s12  ;;  %s2372_s12 = scalar_lea.vmem [#allocation4], %s2777_s26 }
 0x636   : > { %3585 = vmatpush1.bf16.msra.mxu0 %v4620_v15  ;;  %3616 = vmatpush3.bf16.msra.mxu1 %v4660_v42  ;;  %s2435_s14 = sshll.u32 %s550_s2, 4  ;;  %s5232_s14 = int_to_ptr.vmem [resolvable:$true] %s2435_s14 }
 0x637   : > { %3587 = vmatprep.subr.bf16.mxu0 %v4624_v19  ;;  %3617 = vmatprep.subr.bf16.mxu1 %v4246_v32  ;;  %s4109_s11 = scalar_lea.vmem %s5232_s14, 128 }
 0x638   : > { %2087 = vmatprep.mubr.f32.mxu0 %v4244_v0  ;;  %3200 = vmatprep.mubr.msk.f32.mxu1 %vm4247_vm1, %v4244_v0  ;;  %p4110_p3 = scmp.ne.s32.totalorder %s5232_s14, %s4109_s11 }
 0x63a   : > { %3589 = vmatpush1.bf16.msra.mxu0 %v4633_v26  ;;  %3619 = vmatpush3.bf16.msra.mxu1 %v4678_v53  ;;  %p4111_p0 = pnand %p4110_p3, %p5388_p6 }
 0x63b   : > { %3591 = vmatprep.subr.bf16.mxu0 %v4636_v27  ;;  %3620 = vmatprep.subr.bf16.mxu1 %v4246_v32 }
 0x63c   : > { %p4112_p10 = pneg %p4111_p0 }
 0x63e   : > { %3593 = vmatpush1.bf16.msra.mxu0 %v4646_v34  ;;  %3622 = vmatpush3.bf16.msra.mxu1 %v4698_v2 }
 0x63f   : > { %3595 = vmatprep.subr.bf16.mxu0 %v4650_v35  ;;  %3623 = vmatprep.subr.bf16.mxu1 %v4246_v32 }
 0x642   : > { %3597 = vmatpush1.bf16.msra.mxu0 %v4664_v44  ;;  %3625 = vmatpush3.bf16.msra.mxu1 %v4717_v11 }
 0x643   : > { %3599 = vmatprep.subr.bf16.mxu0 %v4670_v48  ;;  %3626 = vmatprep.subr.bf16.mxu1 %v4246_v32 }
 0x646   : > { %3601 = vmatpush1.bf16.msra.mxu0 %v4686_v57  ;;  %3628 = vmatpush3.bf16.msra.mxu1 %v4736_v22 }
 0x647   : > { %3603 = vmatprep.subr.bf16.mxu0 %v4690_v59  ;;  %3629 = vmatprep.subr.bf16.mxu1 %v4246_v32 }
 0x64a   : > { %3605 = vmatpush1.bf16.msra.mxu0 %v4706_v5  ;;  %3631 = vmatpush3.bf16.msra.mxu1 %v4748_v28 }
 0x64b   : > { %3607 = vmatprep.subr.bf16.mxu0 %v4710_v6  ;;  %3632 = vmatprep.subr.bf16.mxu1 %v4246_v32 }
 0x64e   : > { %3609 = vmatpush1.bf16.msra.mxu0 %v4727_v17  ;;  %3634 = vmatpush3.bf16.msra.mxu1 %v4762_v33 }
 0x64f   : > { %3611 = vmatprep.subr.bf16.mxu0 %v4730_v18  ;;  %3635 = vmatprep.subr.bf16.mxu1 %v4246_v32 }
 0x652   : > { %3613 = vmatpush1.bf16.msra.mxu0 %v4744_v25  ;;  %3637 = vmatpush3.bf16.msra.mxu1 %v4772_v38 }
 0x653   : > { %3639 = vmatprep.subr.bf16.mxu0 %v4616_v12  ;;  %3670 = vmatprep.subr.bf16.mxu1 %v4246_v32 }
 0x708   : > { %v1908_v16 = vpop.f32.mrb[26].mxu0  ;;  %v1979_v4 = vpop.f32.mrb[18].mxu1 }
 0x709   : > { %v1983_v20 = vadd.f32 %v1908_v16, %v1839_v52  ;;  %v1910_v24 = vpop.f32.mrb[27].mxu0  ;;  %v3167_v29 = vpop.f32.mrb[19].mxu1  ;;  %v1997_v47 = vadd.f32 %v4904_v21, %v1979_v4 }
 0x70a   : > { %v1990_v50 = vadd.f32 %v1910_v24, %v1840_v23 }
 0x70b   : > { %v2771_v30 = vmul.f32 -1.442695, %v1983_v20 }
 0x70c   : > { %v2772_v36 = vmul.f32 -1.442695, %v1990_v50 }
 0x70d   : > { %3873 = vpow2.f32 %v2771_v30 }
 0x70e   : > { %3875 = vpow2.f32 %v2772_v36  ;;  %v2203_v36 = vld [vmem:[%s2200_s7 + $0x10] sm:$0xff] }
 0x717   : > { %v3874_v12 = vpop.eup %3873 }
 0x718   : > { %v1987_v37 = vadd.f32 1.0, %v3874_v12  ;;  %v3876_v39 = vpop.eup %3875 }
 0x719   : > { %v1994_v43 = vadd.f32 1.0, %v3876_v39 }
 0x71a   : > { %3877 = vrcp.f32 %v1987_v37 }
 0x71b   : > { %3879 = vrcp.f32 %v1994_v43 }
 0x724   : > { %v3878_v46 = vpop.eup %3877 }
 0x725   : > { %v1998_v49 = vmul.f32 %v3878_v46, %v1997_v47  ;;  %v3880_v45 = vpop.eup %3879 }
 0x726   : > { %v2001_v54 = vsub.f32 1.0, %v3880_v45  ;;  %v2003_v31 = vmul.f32 %v3880_v45, %v5113_v13 }
 0x727   : > { %v1999_v14 = vadd.f32 %v1998_v49, %v1841_v51 }
 0x729   : > { %3881 = vtanh.f32 %v1999_v14 }
 0x733   : > { %v3882_v56 = vpop.eup %3881 }
 0x734   : > { %v2002_v60 = vmul.f32 %v3882_v56, %v2001_v54 }
 0x736   : > { %v2004_v40 = vadd.f32 %v2003_v31, %v2002_v60 }
 0x738   : > { %v5164_v61 = vsel %vm4869_vm7, %v2004_v40, %v5113_v13  ;;  %v2009_v62 = vsel %vm4869_vm7, %v2004_v40, 0.0 }
 0x739   : > { %2011 = vst [vmem:[%s2010_s25] sm:$0xff] %v2009_v62  ;;  %2088 = vmatmul.mubr.f32.vlgmr.msra.gmra.mrb[28].mxu0 %v5164_v61  ;;  %3201 = vmatmul.mubr.f32.vlgmr.msra.gmra.mrb[20].mxu1 %v5164_v61  ;;  %s5230_s25 = scalar_lea.hbm %s5328_s8, %s2784_s21 }
 0x73a   : > { %3641 = vmatpush1.bf16.msra.mxu0 %v4620_v15  ;;  %3672 = vmatpush3.bf16.msra.mxu1 %v4660_v42 }
 0x73b   : > { %3643 = vmatprep.subr.bf16.mxu0 %v4624_v19  ;;  %3673 = vmatprep.subr.bf16.mxu1 %v4246_v32 }
 0x73c   : > { %2268 = vmatprep.mubr.f32.mxu0 %v4244_v0  ;;  %3235 = vmatprep.mubr.msk.f32.mxu1 %vm4247_vm1, %v4244_v0  ;;  %v2020_v0 = vld [vmem:[%s2019_s0] sm:$0xff] }
 0x73e   : > { %3645 = vmatpush1.bf16.msra.mxu0 %v4633_v26  ;;  %3675 = vmatpush3.bf16.msra.mxu1 %v4678_v53 }
 0x73f   : > { %3647 = vmatprep.subr.bf16.mxu0 %v4636_v27  ;;  %3676 = vmatprep.subr.bf16.mxu1 %v4246_v32  ;;  %v2021_v27 = vld [vmem:[%s2019_s0 + $0x8] sm:$0xff] }
 0x742   : > { %3649 = vmatpush1.bf16.msra.mxu0 %v4646_v34  ;;  %3678 = vmatpush3.bf16.msra.mxu1 %v4698_v2 }
 0x743   : > { %3651 = vmatprep.subr.bf16.mxu0 %v4650_v35  ;;  %3679 = vmatprep.subr.bf16.mxu1 %v4246_v32 }
 0x746   : > { %3653 = vmatpush1.bf16.msra.mxu0 %v4664_v44  ;;  %3681 = vmatpush3.bf16.msra.mxu1 %v4717_v11  ;;  %v2022_v11 = vld [vmem:[%s2019_s0 + $0x10] sm:$0xff]  ;;  %s4113_s0 = sshll.u32 %s4248_s23, 4  ;;  %s4114_s0 = int_to_ptr.vmem [resolvable:$false] %s4113_s0 }
 0x747   : > { %3655 = vmatprep.subr.bf16.mxu0 %v4670_v48  ;;  %3682 = vmatprep.subr.bf16.mxu1 %v4246_v32  ;;  %p4116_p9 = scmp.lt.s32.totalorder %s5232_s14, %s4114_s0 }
 0x74a   : > { %3657 = vmatpush1.bf16.msra.mxu0 %v4686_v57  ;;  %3684 = vmatpush3.bf16.msra.mxu1 %v4736_v22 }
 0x74b   : > { %3659 = vmatprep.subr.bf16.mxu0 %v4690_v59  ;;  %3685 = vmatprep.subr.bf16.mxu1 %v4246_v32 }
 0x74e   : > { %3661 = vmatpush1.bf16.msra.mxu0 %v4706_v5  ;;  %3687 = vmatpush3.bf16.msra.mxu1 %v4748_v28 }
 0x74f   : > { %3663 = vmatprep.subr.bf16.mxu0 %v4710_v6  ;;  %3688 = vmatprep.subr.bf16.mxu1 %v4246_v32 }
 0x752   : > { %3665 = vmatpush1.bf16.msra.mxu0 %v4727_v17  ;;  %3690 = vmatpush3.bf16.msra.mxu1 %v4762_v33 }
 0x753   : > { %3667 = vmatprep.subr.bf16.mxu0 %v4730_v18  ;;  %3691 = vmatprep.subr.bf16.mxu1 %v4246_v32 }
 0x756   : > { %3669 = vmatpush1.bf16.msra.mxu0 %v4744_v25  ;;  %3693 = vmatpush3.bf16.msra.mxu1 %v4772_v38 }
 0x80c   : > { %v2089_v15 = vpop.f32.mrb[28].mxu0  ;;  %v2160_v19 = vpop.f32.mrb[20].mxu1 }
 0x80d   : > { %v2164_v26 = vadd.f32 %v2089_v15, %v2020_v0  ;;  %v2091_v34 = vpop.f32.mrb[29].mxu0  ;;  %v3202_v35 = vpop.f32.mrb[21].mxu1  ;;  %v2178_v2 = vadd.f32 %v4904_v21, %v2160_v19 }
 0x80e   : > { %v2171_v42 = vadd.f32 %v2091_v34, %v2021_v27 }
 0x80f   : > { %v2775_v44 = vmul.f32 -1.442695, %v2164_v26 }
 0x810   : > { %v2776_v32 = vmul.f32 -1.442695, %v2171_v42 }
 0x811   : > { %3883 = vpow2.f32 %v2775_v44 }
 0x812   : > { %3885 = vpow2.f32 %v2776_v32 }
 0x81b   : > { %v3884_v48 = vpop.eup %3883 }
 0x81c   : > { %v2168_v53 = vadd.f32 1.0, %v3884_v48  ;;  %v3886_v57 = vpop.eup %3885 }
 0x81d   : > { %v2175_v59 = vadd.f32 1.0, %v3886_v57 }
 0x81e   : > { %3887 = vrcp.f32 %v2168_v53 }
 0x81f   : > { %3889 = vrcp.f32 %v2175_v59 }
 0x828   : > { %v3888_v5 = vpop.eup %3887 }
 0x829   : > { %v2179_v6 = vmul.f32 %v3888_v5, %v2178_v2  ;;  %v3890_v18 = vpop.eup %3889 }
 0x82a   : > { %v2182_v22 = vsub.f32 1.0, %v3890_v18  ;;  %v2184_v33 = vmul.f32 %v3890_v18, %v5164_v61 }
 0x82b   : > { %v2180_v17 = vadd.f32 %v2179_v6, %v2022_v11 }
 0x82d   : > { %3891 = vtanh.f32 %v2180_v17 }
 0x837   : > { %v3892_v25 = vpop.eup %3891 }
 0x838   : > { %v2183_v28 = vmul.f32 %v3892_v25, %v2182_v22 }
 0x83a   : > { %v2185_v38 = vadd.f32 %v2184_v33, %v2183_v28 }
 0x83c   : > { %v2189_v55 = vsel %vm4875_vm8, %v2185_v38, %v5164_v61  ;;  %v2190_v63 = vsel %vm4875_vm8, %v2185_v38, 0.0 }
 0x83d   : > { %2192 = vst [vmem:[%s2191_s18] sm:$0xff] %v2190_v63  ;;  %2269 = vmatmul.mubr.f32.vlgmr.msra.gmra.mrb[30].mxu0 %v2189_v55  ;;  %3236 = vmatmul.mubr.f32.vlgmr.msra.gmra.mrb[22].mxu1 %v2189_v55  ;;  %s4115_s18 = scalar_lea.vmem %s4114_s0, 256 }
 0x83e   : > { %p4117_p12 = scmp.lt.s32.totalorder %s4115_s18, %s4109_s11 }
 0x840   : > { %p4118_p4 = por %p4117_p12, %p4116_p9 }
 0x842   : > { %p4119_p13 = pnand %p4118_p4, %p4112_p10 }
 0x910   : > { %v2270_v7 = vpop.f32.mrb[30].mxu0  ;;  %v2341_v8 = vpop.f32.mrb[22].mxu1 }
 0x911   : > { %v2345_v9 = vadd.f32 %v2270_v7, %v2201_v1  ;;  %v2272_v13 = vpop.f32.mrb[31].mxu0  ;;  %v3237_v3 = vpop.f32.mrb[23].mxu1  ;;  %v2359_v29 = vadd.f32 %v4904_v21, %v2341_v8 }
 0x912   : > { %v2352_v52 = vadd.f32 %v2272_v13, %v2202_v10 }
 0x913   : > { %v2779_v58 = vmul.f32 -1.442695, %v2345_v9 }
 0x914   : > { %v2780_v16 = vmul.f32 -1.442695, %v2352_v52 }
 0x915   : > { %3893 = vpow2.f32 %v2779_v58 }
 0x916   : > { %3895 = vpow2.f32 %v2780_v16 }
 0x91f   : > { %v3894_v4 = vpop.eup %3893 }
 0x920   : > { %v2349_v20 = vadd.f32 1.0, %v3894_v4  ;;  %v3896_v23 = vpop.eup %3895 }
 0x921   : > { %v2356_v24 = vadd.f32 1.0, %v3896_v23 }
 0x922   : > { %3897 = vrcp.f32 %v2349_v20 }
 0x923   : > { %3899 = vrcp.f32 %v2356_v24 }
 0x92c   : > { %v3898_v50 = vpop.eup %3897 }
 0x92d   : > { %v2360_v30 = vmul.f32 %v3898_v50, %v2359_v29  ;;  %v3900_v37 = vpop.eup %3899 }
 0x92e   : > { %v2363_v39 = vsub.f32 1.0, %v3900_v37  ;;  %v2365_v46 = vmul.f32 %v3900_v37, %v2189_v55 }
 0x92f   : > { %v2361_v12 = vadd.f32 %v2360_v30, %v2203_v36 }
 0x931   : > { %3901 = vtanh.f32 %v2361_v12 }
 0x93b   : > { %v3902_v43 = vpop.eup %3901 }
 0x93c   : > { %v2364_v47 = vmul.f32 %v3902_v43, %v2363_v39 }
 0x93e   : > { %v2366_v21 = vadd.f32 %v2365_v46, %v2364_v47 }
 0x940   : > { %v2371_v49 = vsel %vm4836_vm2, %v2366_v21, 0.0  ;;  %v2370_v51 = vsel %vm4836_vm2, %v2366_v21, %v2189_v55 }
 0x941   : > { %2373 = vst [vmem:[%s2372_s12] sm:$0xff] %v2371_v49  ;;  %2394 = vst [vmem:[%s550_s2] sm:$0xff] %v2370_v51 }
 0x942   : > { %4122 = shalt.err (!%p4119_p13)
}
 0x943   : > { %s4123_s19 = scalar_lea.hbm %s5230_s25, 128  ;;  %s4127_s15 = scalar_lea.hbm %s5328_s8, 256 }
 0x944   : > { %p4124_p7 = scmp.ne.s32.totalorder %s5230_s25, %s4123_s19  ;;  %p4128_p5 = scmp.lt.u32.totalorder %s5230_s25, %s5328_s8 }
 0x945   : > { %p4129_p11 = scmp.lt.u32.totalorder %s4127_s15, %s4123_s19  ;;  %p4131_p3 = scmp.lt.u32.totalorder %s4123_s19, %s5230_s25 }
 0x946   : > { %p4125_p1 = pnand %p4124_p7, %p5388_p6 }
 0x947   : > { %p4130_p8 = por %p4129_p11, %p4128_p5 }
 0x948   : > { %p4126_p2 = pneg %p4125_p1 }
 0x949   : > { %p4132_p0 = por %p4131_p3, %p4130_p8 }
 0x94b   : > { %p4133_p10 = pnand %p4132_p0, %p4126_p2 }
 0x94d   : > { %4136 = shalt.err (!%p4133_p10)
}
 0x94e   : > { %3722 = dma.vmem_to_hbm [thread:$0]  (%p5388_p6), %s5232_s14, 128, %s5230_s25, %s2401_s16   ;;  %v2375_v41 = vld [vmem:[#allocation4] sm:$0xff]  ;;  %v2376_v14 = vld [vmem:[#allocation4 + $0x8] sm:$0xff]  ;;  %v2377_v45 = vld [vmem:[#allocation4 + $0x10] sm:$0xff] }
 0x94f   : > { %s543_s17 = scalar_lea.vmem [#allocation15], %s2727_s4  ;;  %s5389_s23 = sld [smem:[#allocation29_spill]]  ;;  %v2378_v54 = vld [vmem:[#allocation4 + $0x18] sm:$0xff]  ;;  %v2379_v56 = vld [vmem:[#allocation4 + $0x20] sm:$0xff]  ;;  %v2380_v60 = vld [vmem:[#allocation4 + $0x28] sm:$0xff] }
 0x950   : > { %s2419_s20 = sshll.u32 %s543_s17, 4  ;;  %2383 = vst [vmem:[%s543_s17] sm:$0xff] %v2375_v41  ;;  %2384 = vst [vmem:[%s543_s17 + $0x8] sm:$0xff] %v2376_v14  ;;  %v2381_v31 = vld [vmem:[#allocation4 + $0x30] sm:$0xff]  ;;  %v2382_v40 = vld [vmem:[#allocation4 + $0x38] sm:$0xff]  ;;  %s2396_s30 = scalar_lea.sflag [#allocation7], %s4601_s24  ;;  %s5271_s20 = int_to_ptr.vmem [resolvable:$true] %s2419_s20 }
 0x951   : > { %2385 = vst [vmem:[%s543_s17 + $0x10] sm:$0xff] %v2377_v45  ;;  %2386 = vst [vmem:[%s543_s17 + $0x18] sm:$0xff] %v2378_v54  ;;  %s4249_s14 = smov [#allocation15]  }
 0x952   : > { %2387 = vst [vmem:[%s543_s17 + $0x20] sm:$0xff] %v2379_v56  ;;  %2388 = vst [vmem:[%s543_s17 + $0x28] sm:$0xff] %v2380_v60  ;;  %s4141_s4 = sshll.u32 %s4249_s14, 4  ;;  %s4142_s4 = int_to_ptr.vmem [resolvable:$false] %s4141_s4 }
 0x953   : > { %2389 = vst [vmem:[%s543_s17 + $0x30] sm:$0xff] %v2381_v31  ;;  %2390 = vst [vmem:[%s543_s17 + $0x38] sm:$0xff] %v2382_v40  ;;  %s4143_s25 = scalar_lea.vmem %s4142_s4, 2048  ;;  %p4144_p13 = scmp.lt.s32.totalorder %s5271_s20, %s4142_s4 }
 0x955   : > { %s5269_s0 = scalar_lea.hbm %s5389_s23, %s2784_s21  ;;  %s4137_s21 = scalar_lea.vmem %s5271_s20, 1024 }
 0x956   : > { %p4138_p9 = scmp.ne.s32.totalorder %s5271_s20, %s4137_s21  ;;  %p4145_p7 = scmp.lt.s32.totalorder %s4143_s25, %s4137_s21 }
 0x958   : > { %p4139_p12 = pnand %p4138_p9, %p5388_p6  ;;  %p4146_p1 = por %p4145_p7, %p4144_p13 }
 0x95a   : > { %p4140_p4 = pneg %p4139_p12 }
 0x95c   : > { %p4147_p2 = pnand %p4146_p1, %p4140_p4 }
 0x95e   : > { %4150 = shalt.err (!%p4147_p2)
}
 0x95f   : > { %s4151_s16 = scalar_lea.hbm %s5269_s0, 1024  ;;  %s4155_s26 = scalar_lea.hbm %s5389_s23, 2048 }
 0x960   : > { %p4152_p5 = scmp.ne.s32.totalorder %s5269_s0, %s4151_s16  ;;  %p4156_p3 = scmp.lt.u32.totalorder %s5269_s0, %s5389_s23 }
 0x961   : > { %p4157_p0 = scmp.lt.u32.totalorder %s4155_s26, %s4151_s16  ;;  %p4159_p9 = scmp.lt.u32.totalorder %s4151_s16, %s5269_s0 }
 0x962   : > { %p4153_p11 = pnand %p4152_p5, %p5388_p6 }
 0x963   : > { %p4158_p10 = por %p4157_p0, %p4156_p3 }
 0x964   : > { %p4154_p8 = pneg %p4153_p11 }
 0x965   : > { %p4160_p12 = por %p4159_p9, %p4158_p10 }
 0x967   : > { %p4161_p4 = pnand %p4160_p12, %p4154_p8 }
 0x969   : > { %4164 = shalt.err (!%p4161_p4)
}
 0x96a   : > { %s4250_s7 = smov 128   ;;  %s4251_s2 = smov 256  }
 0x96b   : > { %s4252_s17 = smov 8  }
 0x96c   : > { %3721 = dma.vmem_to_hbm [thread:$0]  (%p5388_p6), %s5271_s20, 1024, %s5269_s0, %s2396_s30, %s4250_s7, %s4251_s2, %s4252_s17  }
 0x96d PF: > { %s2447_s12 = sand.u32 1, %s4211_s27   ;;  %p5390_p13 = scmp.ne.s32.totalorder %s5363_s13, 0 }
 0x96e   : > { %p5391_p7 = scmp.ge.s32.totalorder %s4231_s10, 2  ;;  %s2448_s11 = scalar_lea.sflag [#allocation7], %s2447_s12 }
 0x970   : > { %p3749_p1 = pnand %p5391_p7, %p5390_p13 }
 0x972   : > { %4202 = dma.done.wait (!%p3749_p1), %s2448_s11, 1024  }
 0x973   : > { %4204 = vsyncadd (!%p3749_p1), %s2448_s11, 4294966272  ;;  %s2457_s21 = scalar_lea.sflag [#allocation17], %s2447_s12 }
 0x974   : > { %4206 = dma.done.wait (!%p3749_p1), %s2457_s21, 128  }
 0x975   : > { %4208 = vsyncadd (!%p3749_p1), %s2457_s21, 4294967168  ;;  %s29_s10 = sadd.s32 1, %s4231_s10   ;;  %s5392_s22 = sld [smem:[#allocation24_spill]] }
 0x976   : > { %p26_p2 = scmp.ge.s32.totalorder %s29_s10, 4   ;;  %s5393_s24 = sld [smem:[#allocation23_spill]] }
 0x977   : > { %s5394_s27 = smov %s4215_s28  ;;  %s5395_s28 = smov %s4219_s29 }
 0x978   : > { %s5397_s30 = smov %s4227_s9  ;;  %28 = sbr.rel (!%p26_p2) target bundleno = 15 (0xf), region = 193 }
 0x97b   : > { %s5396_s29 = smov %s5392_s22 }
 0x97c   : > { %s5398_s9 = smov %s5393_s24 }
 0x97f   :  { %2462 = vsyncpa [#allocation6], 1 }
 0x980   :  { %2464 = vsyncpa [#allocation6 + $0x1], 1 }
 0x981   :  { %2465 = vsyncpa [#allocation9], 1 }
 0x982   :  { %2466 = vsyncpa [#allocation7], 1 }
 0x983   :  { %2468 = vsyncpa [#allocation7 + $0x1], 1 }
 0x984   :  { %2469 = vsyncpa [#allocation17], 1 }
 0x985   :  { %2471 = vsyncpa [#allocation17 + $0x1], 1 }

// kernel: relation_model_forward.4
= control target key start
LH: loop header
LB: loop body
LE: loop exit
PB: predicated region body
PF: predicated region fallthrough
CT: control target
= control target key end

     0   :  { %s5628_s0 = inlined_call_operand.hbm [shape: f32[64,256], index: 0, kind: input, shape index: {}]   ;;  %s5629_s1 = inlined_call_operand.hbm [shape: s32[8,1], index: 1, kind: input, shape index: {}]   ;;  %s5630_s2 = inlined_call_operand.hbm [shape: f32[2,256,384], index: 2, kind: input, shape index: {}]   ;;  %s5631_s3 = inlined_call_operand.hbm [shape: f32[2,128,384], index: 3, kind: input, shape index: {}]   ;;  %s5632_s4 = inlined_call_operand.hbm [shape: f32[2,1,384], index: 4, kind: input, shape index: {}]   ;;  %s5633_s5 = inlined_call_operand.hbm [shape: f32[2,1,128], index: 5, kind: input, shape index: {}]   ;;  %s5634_s6 = inlined_call_operand.hbm [shape: f32[2,8,128], index: 6, kind: input, shape index: {}]   ;;  %s5635_s7 = inlined_call_operand.hbm [shape: f32[8,8,256], index: 7, kind: output, shape index: {0}]   ;;  %s5636_s8 = inlined_call_operand.hbm [shape: f32[2,8,128], index: 8, kind: output, shape index: {1}]  }
   0x1   :  { %5648 = sst [smem:[#allocation25_spill]] %s5628_s0 }
   0x2   :  { %5649 = sst [smem:[#allocation26_spill]] %s5630_s2 }
   0x3   :  { %5650 = sst [smem:[#allocation27_spill]] %s5631_s3 }
   0x4   :  { %5651 = sst [smem:[#allocation28_spill]] %s5632_s4 }
   0x5   :  { %5652 = sst [smem:[#allocation29_spill]] %s5635_s7 }
   0x6   :  { %14 = vsyncpa [#allocation6], 0 }
   0x7   :  { %16 = vsyncpa [#allocation6 + $0x1], 0 }
   0x8   :  { %17 = vsyncpa [#allocation9], 0 }
   0x9   :  { %18 = vsyncpa [#allocation7], 0 }
   0xa   :  { %20 = vsyncpa [#allocation7 + $0x1], 0 }
   0xb   :  { %21 = vsyncpa [#allocation17], 0 }
   0xc   :  { %23 = vsyncpa [#allocation17 + $0x1], 0  ;;  %s4474_s27 = smov 0   ;;  %s4476_s28 = smov 0  }
   0xd   :  { %s4478_s29 = smov 0   ;;  %s4480_s30 = smov 0  }
   0xe   :  { %s4482_s9 = smov 0   ;;  %s4484_s10 = smov 0  }
   0xf LB: > { %s101_s11 = sadd.s32 1, %s4395_s29  ;;  %p5637_p0 = scmp.ne.s32.totalorder %s4395_s29, %s4391_s28  ;;  %s4407_s10 = sphi %s4484_s10, %s29_s10   ;;  %s4403_s9 = sphi %s4482_s9, %s5706_s9   ;;  %s4399_s30 = sphi %s4480_s30, %s5705_s30   ;;  %s4395_s29 = sphi %s4478_s29, %s5704_s29   ;;  %s4391_s28 = sphi %s4476_s28, %s5703_s28   ;;  %s4387_s27 = sphi %s4474_s27, %s5702_s27  }
  0x10   : > { %p109_p1 = scmp.eq.s32.totalorder %s4407_s10, 0  ;;  %p5638_p3 = scmp.lt.s32.totalorder %s4407_s10, 2 }
  0x11   : > { %s313_s13 = sand.u32 1, %s4407_s10   ;;  %s4409_s14 = smov [#allocation5]  }
  0x12   : > { %p4513_p4 = por %p109_p1, %p5637_p0  ;;  %s328_s15 = sshll.u32 %s4409_s14, 4  ;;  %s329_s15 = int_to_ptr.vmem [resolvable:$true] %s328_s15 }
  0x13   : > { %p4520_p5 = pnand %p5638_p3, %p109_p1  ;;  %s4524_s17 = scalar_lea.sflag [#allocation6], %s313_s13 }
  0x14   : > { %s5653_s12 = scalar_select %p4513_p4, 1, 0 }
  0x15   : > { %s5655_s0 = sld [smem:[#allocation25_spill]]  ;;  %p4081_p7 = pneg %p4520_p5 }
  0x1b   : > { %s4079_s20 = scalar_lea.hbm %s5655_s0, 2048 }
  0x1c   : > { %p4080_p6 = scmp.ne.s32.totalorder %s5655_s0, %s4079_s20  ;;  %p4086_p10 = scmp.lt.u32.totalorder %s4079_s20, %s5655_s0 }
  0x1e   : > { %p4082_p8 = pnand %p4081_p7, %p4080_p6 }
  0x20   : > { %p4083_p9 = pneg %p4082_p8 }
  0x22   : > { %p4088_p11 = pnand %p4086_p10, %p4083_p9 }
  0x24   : > { %4091 = shalt.err (!%p4088_p11)
}
  0x25   : > { %s4092_s25 = scalar_lea.vmem %s329_s15, 2048  ;;  %s4099_s26 = scalar_lea.vmem %s329_s15, 4096 }
  0x26   : > { %p4093_p12 = scmp.ne.s32.totalorder %s329_s15, %s4092_s25  ;;  %p4100_p2 = scmp.lt.s32.totalorder %s329_s15, %s329_s15 }
  0x27   : > { %p4101_p0 = scmp.lt.s32.totalorder %s4099_s26, %s4092_s25 }
  0x28   : > { %p4095_p13 = pnand %p4093_p12, %p4081_p7 }
  0x29   : > { %p4102_p3 = por %p4101_p0, %p4100_p2 }
  0x2a   : > { %p4096_p1 = pneg %p4095_p13 }
  0x2c   : > { %p4103_p4 = pnand %p4102_p3, %p4096_p1 }
  0x2e   : > { %4106 = shalt.err (!%p4103_p4)
}
  0x2f   : > { %s4410_s13 = smov 256   ;;  %s4411_s14 = smov 16  }
  0x30   : > { %3908 = dma.hbm_to_vmem [thread:$0]  (!%p4520_p5), %s5655_s0, 2048, %s329_s15, %s4524_s17, %s4410_s13, %s4410_s13, %s4411_s14  }
  0x31   : > { %p5656_p0 = scmp.ne.s32.totalorder %s5653_s12, 0  ;;  %p5657_p2 = scmp.lt.s32.totalorder %s4407_s10, 2 }
  0x32   : > { %s4552_s21 = sand.u32 1, %s4395_s29   ;;  %s41_s22 = sadd.s32 1, %s4403_s9 }
  0x33   : > { %p4547_p3 = pnand %p5657_p2, %p5656_p0  ;;  %p43_p4 = scmp.ge.s32.totalorder %s41_s22, 2 }
  0x34   : > { %s3870_s16 = smul.u32 768, %s4552_s21  ;;  %s5660_s2 = sld [smem:[#allocation26_spill]] }
  0x35   : > { %s5658_s20 = scalar_select %p4547_p3, 1, 0 }
  0x36   : > { %s3871_s23 = smul.u32 12288, %s4403_s9  ;;  %s5708_s22 = smov (%p43_p4, %s41_s22), 0 }
  0x37   : > { %5659 = sst [smem:[#allocation23_spill]] %s5708_s22  ;;  %s98_s15 = ssub.s32 %s4403_s9, %s5708_s22 }
  0x38   : > { %s342_s26 = scalar_lea.vmem [#allocation10], %s3870_s16  ;;  %p99_p5 = scmp.eq.s32.totalorder %s98_s15, 0 }
  0x39   : > { %s349_s13 = sshll.u32 %s342_s26, 4  ;;  %s3872_s14 = smul.u32 384, %s4552_s21  ;;  %s4566_s13 = int_to_ptr.vmem [resolvable:$true] %s349_s13 }
  0x3a   : > { %s4562_s12 = scalar_lea.hbm %s5660_s2, %s3871_s23  ;;  %p4578_p7 = pneg %p4547_p3 }
  0x3b   : > { %s4572_s18 = scalar_select %p99_p5, %s4395_s29, %s101_s11  }
  0x3c   : > { %s4107_s19 = scalar_lea.hbm %s4562_s12, 12288  ;;  %s4112_s25 = scalar_lea.hbm %s5660_s2, 24576 }
  0x3d   : > { %5661 = sst [smem:[#allocation24_spill]] %s4572_s18  ;;  %p4108_p6 = scmp.ne.s32.totalorder %s4562_s12, %s4107_s19 }
  0x3e   : > { %p4113_p10 = scmp.lt.u32.totalorder %s4562_s12, %s5660_s2  ;;  %p4114_p11 = scmp.lt.u32.totalorder %s4112_s25, %s4107_s19 }
  0x3f   : > { %p4110_p8 = pnand %p4578_p7, %p4108_p6  ;;  %p4116_p13 = scmp.lt.u32.totalorder %s4107_s19, %s4562_s12 }
  0x40   : > { %p4115_p12 = por %p4114_p11, %p4113_p10 }
  0x41   : > { %p4111_p9 = pneg %p4110_p8 }
  0x42   : > { %p4117_p1 = por %p4116_p13, %p4115_p12 }
  0x44   : > { %p4118_p0 = pnand %p4117_p1, %p4111_p9 }
  0x46   : > { %4121 = shalt.err (!%p4118_p0)
}
  0x47   : > { %s4122_s11 = scalar_lea.vmem %s4566_s13, 12288  ;;  %s4412_s16 = smov [#allocation10]  }
  0x48   : > { %p4123_p2 = scmp.ne.s32.totalorder %s4566_s13, %s4122_s11  ;;  %s4127_s24 = sshll.u32 %s4412_s16, 4  ;;  %s4128_s24 = int_to_ptr.vmem [resolvable:$false] %s4127_s24 }
  0x49   : > { %s4129_s15 = scalar_lea.vmem %s4128_s24, 24576  ;;  %p4130_p6 = scmp.lt.s32.totalorder %s4566_s13, %s4128_s24 }
  0x4a   : > { %p4125_p4 = pnand %p4123_p2, %p4578_p7  ;;  %p4131_p8 = scmp.lt.s32.totalorder %s4129_s15, %s4122_s11 }
  0x4c   : > { %p4126_p5 = pneg %p4125_p4  ;;  %p4132_p10 = por %p4131_p8, %p4130_p6 }
  0x4e   : > { %p4133_p11 = pnand %p4132_p10, %p4126_p5 }
  0x50   : > { %4136 = shalt.err (!%p4133_p11)
}
  0x51   : > { %s4413_s19 = smov 384   ;;  %s4414_s25 = smov 24  }
  0x52   : > { %3911 = dma.hbm_to_vmem [thread:$0]  (!%p4547_p3), %s4562_s12, 12288, %s4566_s13, %s4524_s17, %s4413_s19, %s4413_s19, %s4414_s25  }
  0x53   : > { %s3873_s26 = smul.u32 6144, %s4403_s9  ;;  %s363_s11 = scalar_lea.vmem [#allocation11], %s3872_s14 }
  0x54   : > { %s370_s16 = sshll.u32 %s363_s11, 4  ;;  %s5663_s3 = sld [smem:[#allocation27_spill]]  ;;  %s4614_s16 = int_to_ptr.vmem [resolvable:$true] %s370_s16 }
  0x5a   : > { %s4612_s2 = scalar_lea.hbm %s5663_s3, %s3873_s26  ;;  %s4142_s14 = scalar_lea.hbm %s5663_s3, 12288 }
  0x5b   : > { %s4137_s22 = scalar_lea.hbm %s4612_s2, 6144  ;;  %p4143_p1 = scmp.lt.u32.totalorder %s4612_s2, %s5663_s3 }
  0x5c   : > { %p4138_p9 = scmp.ne.s32.totalorder %s4612_s2, %s4137_s22  ;;  %p4144_p0 = scmp.lt.u32.totalorder %s4142_s14, %s4137_s22 }
  0x5d   : > { %p4146_p4 = scmp.lt.u32.totalorder %s4137_s22, %s4612_s2 }
  0x5e   : > { %p4140_p12 = pnand %p4138_p9, %p4578_p7  ;;  %p4145_p2 = por %p4144_p0, %p4143_p1 }
  0x60   : > { %p4141_p13 = pneg %p4140_p12  ;;  %p4147_p5 = por %p4146_p4, %p4145_p2 }
  0x62   : > { %p4148_p6 = pnand %p4147_p5, %p4141_p13 }
  0x64   : > { %4151 = shalt.err (!%p4148_p6)
}
  0x65   : > { %s4152_s0 = scalar_lea.vmem %s4614_s16, 6144  ;;  %s4415_s26 = smov [#allocation11]  }
  0x66   : > { %p4153_p8 = scmp.ne.s32.totalorder %s4614_s16, %s4152_s0  ;;  %s4157_s15 = sshll.u32 %s4415_s26, 4  ;;  %s4158_s15 = int_to_ptr.vmem [resolvable:$false] %s4157_s15 }
  0x67   : > { %s4159_s24 = scalar_lea.vmem %s4158_s15, 12288  ;;  %p4160_p9 = scmp.lt.s32.totalorder %s4614_s16, %s4158_s15 }
  0x68   : > { %p4155_p10 = pnand %p4153_p8, %p4578_p7  ;;  %p4161_p12 = scmp.lt.s32.totalorder %s4159_s24, %s4152_s0 }
  0x6a   : > { %p4156_p11 = pneg %p4155_p10  ;;  %p4162_p1 = por %p4161_p12, %p4160_p9 }
  0x6c   : > { %p4163_p0 = pnand %p4162_p1, %p4156_p11 }
  0x6e   : > { %4166 = shalt.err (!%p4163_p0)
}
  0x6f   : > { %3914 = dma.hbm_to_vmem [thread:$0]  (!%p4547_p3), %s4612_s2, 6144, %s4614_s16, %s4524_s17, %s4413_s19, %s4413_s19, %s4414_s25  }
  0x70   : > { %s3875_s22 = smul.u32 48, %s4403_s9  ;;  %s5665_s4 = sld [smem:[#allocation28_spill]] }
  0x71   : > { %s5664_s12 = smul.u32 3, %s4552_s21 }
  0x73   : > { %s384_s13 = scalar_lea.vmem [#allocation12], %s5664_s12 }
  0x74   : > { %s392_s14 = sshll.u32 %s384_s13, 4  ;;  %s393_s14 = int_to_ptr.vmem [resolvable:$true] %s392_s14 }
  0x76   : > { %s390_s26 = scalar_lea.hbm %s5665_s4, %s3875_s22  ;;  %s4172_s18 = scalar_lea.hbm %s5665_s4, 96 }
  0x77   : > { %s4167_s15 = scalar_lea.hbm %s390_s26, 48  ;;  %p4173_p5 = scmp.lt.u32.totalorder %s390_s26, %s5665_s4 }
  0x78   : > { %p4168_p13 = scmp.ne.s32.totalorder %s390_s26, %s4167_s15  ;;  %p4174_p6 = scmp.lt.u32.totalorder %s4172_s18, %s4167_s15 }
  0x79   : > { %p4176_p10 = scmp.lt.u32.totalorder %s4167_s15, %s390_s26 }
  0x7a   : > { %p4170_p2 = pnand %p4168_p13, %p4578_p7  ;;  %p4175_p8 = por %p4174_p6, %p4173_p5 }
  0x7c   : > { %p4171_p4 = pneg %p4170_p2  ;;  %p4177_p11 = por %p4176_p10, %p4175_p8 }
  0x7e   : > { %p4178_p9 = pnand %p4177_p11, %p4171_p4 }
  0x80   : > { %4181 = shalt.err (!%p4178_p9)
}
  0x81   : > { %s4182_s19 = scalar_lea.vmem %s393_s14, 48  ;;  %s4416_s25 = smov [#allocation12]  }
  0x82   : > { %p4183_p12 = scmp.ne.s32.totalorder %s393_s14, %s4182_s19  ;;  %s4187_s16 = sshll.u32 %s4416_s25, 4  ;;  %s4188_s16 = int_to_ptr.vmem [resolvable:$false] %s4187_s16 }
  0x83   : > { %s4189_s3 = scalar_lea.vmem %s4188_s16, 96  ;;  %p4190_p13 = scmp.lt.s32.totalorder %s393_s14, %s4188_s16 }
  0x84   : > { %p4185_p1 = pnand %p4183_p12, %p4578_p7  ;;  %p4191_p2 = scmp.lt.s32.totalorder %s4189_s3, %s4182_s19 }
  0x86   : > { %p4186_p0 = pneg %p4185_p1  ;;  %p4192_p3 = por %p4191_p2, %p4190_p13 }
  0x88   : > { %p4193_p5 = pnand %p4192_p3, %p4186_p0 }
  0x8a   : > { %4196 = shalt.err (!%p4193_p5)
}
  0x8b   : > { %p5666_p6 = scmp.ne.s32.totalorder %s5658_s20, 0  ;;  %s2794_s7 = sshll.u32 %s4403_s9, 4 }
  0x8c   : > { %s402_s18 = scalar_lea.vmem [#allocation13], %s4552_s21  ;;  %s407_s11 = scalar_lea.hbm %s5633_s5, %s2794_s7 }
  0x8d   : > { %3917 = dma.hbm_to_vmem [thread:$0]  (!%p5666_p6), %s390_s26, 48, %s393_s14, %s4524_s17  }
  0x8e   : > { %s409_s22 = sshll.u32 %s402_s18, 4  ;;  %s4197_s0 = scalar_lea.hbm %s407_s11, 16  ;;  %s410_s22 = int_to_ptr.vmem [resolvable:$true] %s409_s22 }
  0x8f   : > { %p4198_p4 = scmp.ne.s32.totalorder %s407_s11, %s4197_s0  ;;  %s4202_s2 = scalar_lea.hbm %s5633_s5, 32 }
  0x90   : > { %p4203_p10 = scmp.lt.u32.totalorder %s407_s11, %s5633_s5  ;;  %p4204_p11 = scmp.lt.u32.totalorder %s4202_s2, %s4197_s0 }
  0x91   : > { %p4200_p3 = pnand %p4198_p4, %p4578_p7  ;;  %p4206_p12 = scmp.lt.u32.totalorder %s4197_s0, %s407_s11 }
  0x92   : > { %p4205_p9 = por %p4204_p11, %p4203_p10 }
  0x93   : > { %p4201_p8 = pneg %p4200_p3 }
  0x94   : > { %p4207_p1 = por %p4206_p12, %p4205_p9 }
  0x96   : > { %p4208_p0 = pnand %p4207_p1, %p4201_p8 }
  0x98   : > { %4211 = shalt.err (!%p4208_p0)
}
  0x99   : > { %s4212_s14 = scalar_lea.vmem %s410_s22, 16  ;;  %s4417_s26 = smov [#allocation13]  }
  0x9a   : > { %p4213_p13 = scmp.ne.s32.totalorder %s410_s22, %s4212_s14  ;;  %s4217_s16 = sshll.u32 %s4417_s26, 4  ;;  %s4218_s16 = int_to_ptr.vmem [resolvable:$false] %s4217_s16 }
  0x9b   : > { %s4219_s3 = scalar_lea.vmem %s4218_s16, 32  ;;  %p4220_p4 = scmp.lt.s32.totalorder %s410_s22, %s4218_s16 }
  0x9c   : > { %p4215_p2 = pnand %p4213_p13, %p4578_p7  ;;  %p4221_p3 = scmp.lt.s32.totalorder %s4219_s3, %s4212_s14 }
  0x9e   : > { %p4216_p5 = pneg %p4215_p2  ;;  %p4222_p6 = por %p4221_p3, %p4220_p4 }
  0xa0   : > { %p4223_p10 = pnand %p4222_p6, %p4216_p5 }
  0xa2   : > { %4226 = shalt.err (!%p4223_p10)
}
  0xa3   : > { %p5667_p11 = scmp.ne.s32.totalorder %s5658_s20, 0  ;;  %s4679_s7 = sadd.s32 4294967295, %s4407_s10  }
  0xa4   : > { %s2781_s18 = sadd.s32 4294967294, %s4407_s10   ;;  %p114_p6 = scmp.ne.s32.totalorder %s4391_s28, %s4387_s27 }
  0xa5   : > { %3920 = dma.hbm_to_vmem [thread:$0]  (!%p5667_p11), %s407_s11, 16, %s410_s22, %s4524_s17  }
  0xa6   : > { %p5643_p8 = scmp.eq.s32.totalorder %s4679_s7, 0  ;;  %p250_p9 = scmp.eq.s32.totalorder %s4679_s7, 1 }
  0xa7   : > { %p256_p12 = scmp.eq.s32.totalorder %s2781_s18, 1  ;;  %p2786_p0 = scmp.ge.s32.totalorder %s4407_s10, 1 }
  0xa8   : > { %p4688_p1 = por %p5643_p8, %p114_p6  ;;  %p5669_p13 = scmp.ne.s32.totalorder %s4395_s29, %s4391_s28 }
  0xa9   : > { %p4700_p5 = por %p256_p12, %p114_p6  ;;  %p289_p4 = scmp.lt.s32.totalorder %s4407_s10, 3 }
  0xaa   : > { %s5668_s12 = scalar_select %p4688_p1, 1, 0 }
  0xab   : > { %p4696_p2 = por %p250_p9, %p5669_p13  ;;  %s2795_s11 = sshll.u32 %s4552_s21, 3 }
  0xac   : > { %s5671_s13 = scalar_select %p4700_p5, 1, 0 }
  0xad   : > { %s5670_s22 = scalar_select %p4696_p2, 1, 0 }
  0xae   : > { %p4706_p3 = pnand %p2786_p0, %p289_p4  ;;  %s4418_s15 = smov [#allocation8]  }
  0xaf   : > { %s302_s24 = sshll.u32 %s4418_s15, 4  ;;  %s2796_s2 = sshll.u32 %s4403_s9, 7  ;;  %s4710_s24 = int_to_ptr.vmem [resolvable:$true] %s302_s24 }
  0xb0   : > { %s5672_s0 = scalar_select %p4706_p3, 1, 0 }
  0xb1   : > { %p3901_p10 = pneg %p4706_p3  ;;  %s4718_s14 = scalar_lea.hbm %s5634_s6, %s2796_s2 }
  0xb2   : > { %s420_s21 = scalar_lea.vmem [#allocation14], %s2795_s11  ;;  %s4227_s3 = scalar_lea.hbm %s4718_s14, 128 }
  0xb3   : > { %s427_s26 = sshll.u32 %s420_s21, 4  ;;  %p4722_p6 = pnand %p3901_p10, %p5643_p8  ;;  %s428_s26 = int_to_ptr.vmem [resolvable:$true] %s427_s26 }
  0xb4   : > { %p4228_p9 = scmp.ne.s32.totalorder %s4718_s14, %s4227_s3  ;;  %s4232_s2 = scalar_lea.hbm %s5634_s6, 256 }
  0xb5   : > { %s5673_s16 = scalar_select %p4722_p6, 1, 0 }
  0xb6   : > { %p4230_p12 = pnand %p4228_p9, %p4578_p7  ;;  %p4233_p13 = scmp.lt.u32.totalorder %s4718_s14, %s5634_s6 }
  0xb7   : > { %p4234_p4 = scmp.lt.u32.totalorder %s4232_s2, %s4227_s3  ;;  %p4236_p10 = scmp.lt.u32.totalorder %s4227_s3, %s4718_s14 }
  0xb8   : > { %p4231_p0 = pneg %p4230_p12 }
  0xb9   : > { %p4235_p5 = por %p4234_p4, %p4233_p13 }
  0xbb   : > { %p4237_p8 = por %p4236_p10, %p4235_p5 }
  0xbd   : > { %p4238_p2 = pnand %p4237_p8, %p4231_p0 }
  0xbf   : > { %4241 = shalt.err (!%p4238_p2)
}
  0xc0   : > { %s4242_s11 = scalar_lea.vmem %s428_s26, 128  ;;  %s4419_s21 = smov [#allocation14]  }
  0xc1   : > { %p4243_p1 = scmp.ne.s32.totalorder %s428_s26, %s4242_s11  ;;  %s4247_s4 = sshll.u32 %s4419_s21, 4  ;;  %s4248_s4 = int_to_ptr.vmem [resolvable:$false] %s4247_s4 }
  0xc2   : > { %s4249_s18 = scalar_lea.vmem %s4248_s4, 256  ;;  %p4250_p3 = scmp.lt.s32.totalorder %s428_s26, %s4248_s4 }
  0xc3   : > { %p4245_p9 = pnand %p4243_p1, %p4578_p7  ;;  %p4251_p6 = scmp.lt.s32.totalorder %s4249_s18, %s4242_s11 }
  0xc5   : > { %p4246_p12 = pneg %p4245_p9  ;;  %p4252_p11 = por %p4251_p6, %p4250_p3 }
  0xc7   : > { %p4253_p4 = pnand %p4252_p11, %p4246_p12 }
  0xc9   : > { %4256 = shalt.err (!%p4253_p4)
}
  0xca   : > { %p5674_p13 = scmp.ne.s32.totalorder %s5658_s20, 0  ;;  %s4257_s23 = scalar_lea.hbm %s5629_s1, 128 }
  0xcb   : > { %p4258_p7 = scmp.ne.s32.totalorder %s5629_s1, %s4257_s23  ;;  %p5675_p8 = scmp.ne.s32.totalorder %s5673_s16, 0 }
  0xcc   : > { %3923 = dma.hbm_to_vmem [thread:$0]  (!%p5674_p13), %s4718_s14, 128, %s428_s26, %s4524_s17  }
  0xcd   : > { %p4259_p1 = pneg %p5675_p8  ;;  %p4264_p11 = scmp.lt.u32.totalorder %s4257_s23, %s5629_s1 }
  0xcf   : > { %p4260_p2 = pnand %p4259_p1, %p4258_p7 }
  0xd1   : > { %p4261_p5 = pneg %p4260_p2 }
  0xd3   : > { %p4266_p3 = pnand %p4264_p11, %p4261_p5 }
  0xd5   : > { %4269 = shalt.err (!%p4266_p3)
}
  0xd6   : > { %s4270_s17 = scalar_lea.vmem %s4710_s24, 128  ;;  %p4278_p9 = scmp.lt.s32.totalorder %s4710_s24, %s4710_s24 }
  0xd7   : > { %p4271_p6 = scmp.ne.s32.totalorder %s4710_s24, %s4270_s17  ;;  %p4279_p12 = scmp.lt.s32.totalorder %s4270_s17, %s4270_s17 }
  0xd9   : > { %p4273_p0 = pnand %p4271_p6, %p4259_p1  ;;  %p4280_p4 = por %p4279_p12, %p4278_p9 }
  0xdb   : > { %p4274_p10 = pneg %p4273_p0 }
  0xdd   : > { %p4281_p13 = pnand %p4280_p4, %p4274_p10 }
  0xdf   : > { %4284 = shalt.err (!%p4281_p13)
}
  0xe0   : > { %3904 = dma.hbm_to_vmem [thread:$0]  (!%p5675_p8), %s5629_s1, 128, %s4710_s24, [#allocation9]  }
  0xe1   : > { %p5676_p7 = scmp.ne.s32.totalorder %s5672_s0, 0 }
  0xe2   : > { %s438_s26 = sand.u32 (!%p5676_p7), 1, %s4679_s7   ;;  %p5677_p1 = scmp.eq.s32.totalorder (!%p5676_p7), %s4679_s7, 0 }
  0xe3   : > { %436 = sbr.rel (%p5676_p7) target bundleno = 2473 (0x9a9), region = 48  ;;  %s439_s11 = scalar_lea.sflag (!%p5676_p7), [#allocation6], %s438_s26 }
  0xea   : > { %4366 = dma.done.wait (%p5677_p1), %s439_s11, 2048   ;;  %p5678_p2 = pmov %p5677_p1 }
  0xeb   : > { %p5679_p5 = pmov %p5677_p1 }
  0xec   : > { %4368 = vsyncadd (%p5678_p2), %s439_s11, 4294965248 }
  0xed   : > { %4370 = dma.done.wait (%p5679_p5), [#allocation9], 128   ;;  %p5680_p11 = pmov %p5677_p1 }
  0xee   : > { %s4777_s24 = sand.u32 1, %s4391_s28   ;;  %p5681_p8 = scmp.ne.s32.totalorder %s5668_s12, 0 }
  0xef   : > { %4372 = vsyncadd (%p5680_p11), [#allocation9], 4294967168  ;;  %s3876_s0 = smul.u32 768, %s4777_s24 }
  0xf1   : > { %s4780_s16 = scalar_lea.vmem [#allocation10], %s3876_s0 }
  0xf2   : > { %4374 = dma.done.wait (%p5681_p8), %s439_s11, 18624  }
  0xf3   : > { %4376 = vsyncadd (%p5681_p8), %s439_s11, 4294948672  ;;  %v4420_v0 = vmov 0   ;;  %v587_v1 = vld [vmem:[%s4780_s16 + $0x8] sm:$0xff]  ;;  %v590_v2 = vld [vmem:[%s4780_s16 + $0x20] sm:$0xff]  ;;  %s3877_s7 = smul.u32 384, %s4777_s24  ;;  %s2800_s21 = sshll.u32 %s4777_s24, 3 }
  0xf4   : > { %3998 = vset.pattern.permute.xlu0 %v4420_v0  ;;  %v586_v3 = vld [vmem:[%s4780_s16] sm:$0xff]  ;;  %v3326_v4 = vpack.c.bf16 %v590_v2, %v587_v1  ;;  %v589_v5 = vld [vmem:[%s4780_s16 + $0x18] sm:$0xff]  ;;  %v596_v7 = vld [vmem:[%s4780_s16 + $0x50] sm:$0xff]  ;;  %s490_s18 = scalar_lea.vmem [#allocation14], %s2800_s21  ;;  %vm4423_vm0 = vmmov 0   ;;  %s2803_s3 = sshll.u32 %s4399_s30, 1 }
  0xf5   : > { %v593_v6 = vld [vmem:[%s4780_s16 + $0x38] sm:$0xff]  ;;  %v3328_v8 = vpack.c.bf16 %v589_v5, %v586_v3  ;;  %v592_v10 = vld [vmem:[%s4780_s16 + $0x30] sm:$0xff]  ;;  %v595_v11 = vld [vmem:[%s4780_s16 + $0x48] sm:$0xff]  ;;  %s4865_s12 = scalar_lea.vmem [#allocation11], %s3877_s7  ;;  %s561_s15 = ssub.s32 1, %s2803_s3 }
  0xf6   : > { %v3330_v9 = vpack.c.bf16 %v596_v7, %v593_v6  ;;  %v599_v12 = vld [vmem:[%s4780_s16 + $0x68] sm:$0xff]  ;;  %3327 = vmatprep.subr.bf16.mxu0 %v3326_v4  ;;  %v602_v13 = vld [vmem:[%s4780_s16 + $0x80] sm:$0xff]  ;;  %v3332_v14 = vpack.c.bf16 %v595_v11, %v592_v10  ;;  %v601_v17 = vld [vmem:[%s4780_s16 + $0x78] sm:$0xff]  ;;  %s5120_s23 = smul.u32 7, %s4399_s30  ;;  %s2813_s4 = sshll.u32 %s561_s15, 1 }
  0xf7   : > { %3329 = vmatpush1.bf16.msra.mxu0 %v3328_v8  ;;  %v3334_v15 = vpack.c.bf16 %v602_v13, %v599_v12  ;;  %v598_v16 = vld [vmem:[%s4780_s16 + $0x60] sm:$0xff]  ;;  %v605_v18 = vld [vmem:[%s4780_s16 + $0x98] sm:$0xff]  ;;  %v608_v19 = vld [vmem:[%s4780_s16 + $0xb0] sm:$0xff]  ;;  %s2267_s2 = smul.u32 7, %s561_s15  ;;  %s2822_s20 = sshll.u32 %s561_s15, 2 }
  0xf8   : > { %3331 = vmatprep.subr.bf16.mxu0 %v3330_v9  ;;  %v3336_v20 = vpack.c.bf16 %v601_v17, %v598_v16  ;;  %v3338_v21 = vpack.c.bf16 %v608_v19, %v605_v18  ;;  %v604_v22 = vld [vmem:[%s4780_s16 + $0x90] sm:$0xff]  ;;  %v607_v23 = vld [vmem:[%s4780_s16 + $0xa8] sm:$0xff]  ;;  %v614_v25 = vld [vmem:[%s4780_s16 + $0xe0] sm:$0xff]  ;;  %s5126_s25 = sadd.s32 %s2813_s4, %s5120_s23  ;;  %s1543_s17 = smul.u32 3, %s561_s15 }
  0xf9   : > { %v611_v24 = vld [vmem:[%s4780_s16 + $0xc8] sm:$0xff]  ;;  %v636_v26 = vld [vmem:[%s4780_s16 + $0x190] sm:$0xff]  ;;  %v3340_v30 = vpack.c.bf16 %v607_v23, %v604_v22  ;;  %v610_v31 = vld [vmem:[%s4780_s16 + $0xc0] sm:$0xff]  ;;  %s5123_s19 = sadd.s32 %s2267_s2, %s5120_s23  ;;  %s5129_s14 = sadd.s32 %s2822_s20, %s5120_s23 }
  0xfa   : > { %v639_v27 = vld [vmem:[%s4780_s16 + $0x1a8] sm:$0xff]  ;;  %v588_v28 = vld [vmem:[%s4780_s16 + $0x10] sm:$0xff]  ;;  %v613_v32 = vld [vmem:[%s4780_s16 + $0xd8] sm:$0xff]  ;;  %v3342_v35 = vpack.c.bf16 %v614_v25, %v611_v24  ;;  %s5132_s26 = sadd.s32 %s1543_s17, %s5120_s23  ;;  %s1905_s11 = smul.u32 5, %s561_s15 }
  0xfb   : > { %3333 = vmatpush1.bf16.msra.mxu0 %v3332_v14  ;;  %v591_v29 = vld [vmem:[%s4780_s16 + $0x28] sm:$0xff]  ;;  %v3390_v33 = vpack.c.bf16 %v639_v27, %v636_v26  ;;  %v617_v36 = vld [vmem:[%s4780_s16 + $0xf8] sm:$0xff]  ;;  %v642_v37 = vld [vmem:[%s4780_s16 + $0x1c0] sm:$0xff]  ;;  %v3344_v44 = vpack.c.bf16 %v613_v32, %v610_v31  ;;  %s2086_s0 = smul.u32 6, %s561_s15  ;;  %s481_s20 = scalar_lea.vmem [#allocation13], %s4777_s24 }
  0xfc   : > { %3335 = vmatprep.subr.bf16.mxu0 %v3334_v15  ;;  %v3392_v34 = vpack.c.bf16 %v591_v29, %v588_v28  ;;  %v645_v38 = vld [vmem:[%s4780_s16 + $0x1d8] sm:$0xff]  ;;  %v620_v39 = vld [vmem:[%s4780_s16 + $0x110] sm:$0xff]  ;;  %v594_v41 = vld [vmem:[%s4780_s16 + $0x40] sm:$0xff]  ;;  %p5696_p6 = scmp.ne.s32.totalorder %s5670_s22, 0 }
  0xfd   : > { %3391 = vmatprep.subr.bf16.mxu1 %v3390_v33  ;;  %v3394_v40 = vpack.c.bf16 %v645_v38, %v642_v37  ;;  %v597_v42 = vld [vmem:[%s4780_s16 + $0x58] sm:$0xff]  ;;  %v648_v45 = vld [vmem:[%s4780_s16 + $0x1f0] sm:$0xff]  ;;  %v651_v46 = vld [vmem:[%s4780_s16 + $0x208] sm:$0xff]  ;;  %v3346_v48 = vpack.c.bf16 %v620_v39, %v617_v36  ;;  %s5138_s7 = sadd.s32 %s2086_s0, %s5120_s23 }
  0xfe   : > { %3393 = vmatpush3.bf16.msra.mxu1 %v3392_v34  ;;  %v3396_v43 = vpack.c.bf16 %v597_v42, %v594_v41  ;;  %v600_v47 = vld [vmem:[%s4780_s16 + $0x70] sm:$0xff]  ;;  %v619_v50 = vld [vmem:[%s4780_s16 + $0x108] sm:$0xff]  ;;  %v3398_v51 = vpack.c.bf16 %v651_v46, %v648_v45  ;;  %v626_v54 = vld [vmem:[%s4780_s16 + $0x140] sm:$0xff] }
  0xff   : > { %3337 = vmatpush1.bf16.msra.mxu0 %v3336_v20  ;;  %3395 = vmatprep.subr.bf16.mxu1 %v3394_v40  ;;  %v616_v49 = vld [vmem:[%s4780_s16 + $0xf0] sm:$0xff]  ;;  %v603_v52 = vld [vmem:[%s4780_s16 + $0x88] sm:$0xff]  ;;  %v654_v55 = vld [vmem:[%s4780_s16 + $0x220] sm:$0xff] }
 0x100   : > { %3339 = vmatprep.subr.bf16.mxu0 %v3338_v21  ;;  %v623_v53 = vld [vmem:[%s4780_s16 + $0x128] sm:$0xff]  ;;  %v3400_v56 = vpack.c.bf16 %v603_v52, %v600_v47  ;;  %v657_v57 = vld [vmem:[%s4780_s16 + $0x238] sm:$0xff]  ;;  %v3348_v58 = vpack.c.bf16 %v619_v50, %v616_v49  ;;  %v622_v59 = vld [vmem:[%s4780_s16 + $0x120] sm:$0xff] }
 0x101   : > { %v3402_v60 = vpack.c.bf16 %v657_v57, %v654_v55  ;;  %v606_v61 = vld [vmem:[%s4780_s16 + $0xa0] sm:$0xff]  ;;  %v609_v62 = vld [vmem:[%s4780_s16 + $0xb8] sm:$0xff]  ;;  %v3350_v63 = vpack.c.bf16 %v626_v54, %v623_v53  ;;  %v660_v1 = vld [vmem:[%s4780_s16 + $0x250] sm:$0xff] }
 0x102   : > { %3397 = vmatpush3.bf16.msra.mxu1 %v3396_v43  ;;  %v625_v0 = vld [vmem:[%s4780_s16 + $0x138] sm:$0xff]  ;;  %v663_v2 = vld [vmem:[%s4780_s16 + $0x268] sm:$0xff]  ;;  %v632_v4 = vld [vmem:[%s4780_s16 + $0x170] sm:$0xff]  ;;  %v3404_v5 = vpack.c.bf16 %v609_v62, %v606_v61 }
 0x103   : > { %3341 = vmatpush1.bf16.msra.mxu0 %v3340_v30  ;;  %3399 = vmatprep.subr.bf16.mxu1 %v3398_v51  ;;  %v629_v3 = vld [vmem:[%s4780_s16 + $0x158] sm:$0xff]  ;;  %v3352_v6 = vpack.c.bf16 %v625_v0, %v622_v59  ;;  %v628_v7 = vld [vmem:[%s4780_s16 + $0x150] sm:$0xff]  ;;  %v3406_v8 = vpack.c.bf16 %v663_v2, %v660_v1  ;;  %v615_v10 = vld [vmem:[%s4780_s16 + $0xe8] sm:$0xff] }
 0x104   : > { %3343 = vmatprep.subr.bf16.mxu0 %v3342_v35  ;;  %v612_v9 = vld [vmem:[%s4780_s16 + $0xd0] sm:$0xff]  ;;  %v3354_v11 = vpack.c.bf16 %v632_v4, %v629_v3  ;;  %v631_v12 = vld [vmem:[%s4780_s16 + $0x168] sm:$0xff]  ;;  %v666_v13 = vld [vmem:[%s4780_s16 + $0x280] sm:$0xff] }
 0x105   : > { %v669_v14 = vld [vmem:[%s4780_s16 + $0x298] sm:$0xff]  ;;  %v635_v15 = vld [vmem:[%s4780_s16 + $0x188] sm:$0xff]  ;;  %v638_v16 = vld [vmem:[%s4780_s16 + $0x1a0] sm:$0xff]  ;;  %v3408_v17 = vpack.c.bf16 %v615_v10, %v612_v9  ;;  %v3356_v18 = vpack.c.bf16 %v631_v12, %v628_v7 }
 0x106   : > { %3401 = vmatpush3.bf16.msra.mxu1 %v3400_v56  ;;  %v634_v19 = vld [vmem:[%s4780_s16 + $0x180] sm:$0xff]  ;;  %v3410_v20 = vpack.c.bf16 %v669_v14, %v666_v13  ;;  %v621_v22 = vld [vmem:[%s4780_s16 + $0x118] sm:$0xff]  ;;  %v3358_v23 = vpack.c.bf16 %v638_v16, %v635_v15  ;;  %v672_v25 = vld [vmem:[%s4780_s16 + $0x2b0] sm:$0xff] }
 0x107   : > { %3345 = vmatpush1.bf16.msra.mxu0 %v3344_v44  ;;  %3403 = vmatprep.subr.bf16.mxu1 %v3402_v60  ;;  %v618_v21 = vld [vmem:[%s4780_s16 + $0x100] sm:$0xff]  ;;  %v637_v24 = vld [vmem:[%s4780_s16 + $0x198] sm:$0xff]  ;;  %v675_v26 = vld [vmem:[%s4780_s16 + $0x2c8] sm:$0xff] }
 0x108   : > { %3347 = vmatprep.subr.bf16.mxu0 %v3346_v48  ;;  %v641_v27 = vld [vmem:[%s4780_s16 + $0x1b8] sm:$0xff]  ;;  %v644_v28 = vld [vmem:[%s4780_s16 + $0x1d0] sm:$0xff]  ;;  %v3412_v29 = vpack.c.bf16 %v621_v22, %v618_v21  ;;  %v571_v30 = vld [vmem:[#allocation5 + $0x8] sm:$0xff]  ;;  %v3360_v31 = vpack.c.bf16 %v637_v24, %v634_v19  ;;  %v3414_v33 = vpack.c.bf16 %v675_v26, %v672_v25 }
 0x109   : > { %v640_v32 = vld [vmem:[%s4780_s16 + $0x1b0] sm:$0xff]  ;;  %v627_v35 = vld [vmem:[%s4780_s16 + $0x148] sm:$0xff]  ;;  %v3362_v36 = vpack.c.bf16 %v644_v28, %v641_v27  ;;  %v678_v38 = vld [vmem:[%s4780_s16 + $0x2e0] sm:$0xff]  ;;  %876 = vmatprep.mubr.f32.mxu1 %v571_v30  ;;  %763 = vmatprep.mubr.f32.mxu0 %v571_v30 }
 0x10a   : > { %3405 = vmatpush3.bf16.msra.mxu1 %v3404_v5  ;;  %v624_v34 = vld [vmem:[%s4780_s16 + $0x130] sm:$0xff]  ;;  %v643_v37 = vld [vmem:[%s4780_s16 + $0x1c8] sm:$0xff]  ;;  %v681_v39 = vld [vmem:[%s4780_s16 + $0x2f8] sm:$0xff] }
 0x10b   : > { %3349 = vmatpush1.bf16.msra.mxu0 %v3348_v58  ;;  %3407 = vmatprep.subr.bf16.mxu1 %v3406_v8  ;;  %v647_v40 = vld [vmem:[%s4780_s16 + $0x1e8] sm:$0xff]  ;;  %v650_v41 = vld [vmem:[%s4780_s16 + $0x200] sm:$0xff]  ;;  %v3416_v42 = vpack.c.bf16 %v627_v35, %v624_v34  ;;  %v3364_v43 = vpack.c.bf16 %v643_v37, %v640_v32  ;;  %v3418_v45 = vpack.c.bf16 %v681_v39, %v678_v38  ;;  %v633_v47 = vld [vmem:[%s4780_s16 + $0x178] sm:$0xff] }
 0x10c   : > { %3351 = vmatprep.subr.bf16.mxu0 %v3350_v63  ;;  %v646_v44 = vld [vmem:[%s4780_s16 + $0x1e0] sm:$0xff]  ;;  %v3366_v48 = vpack.c.bf16 %v650_v41, %v647_v40  ;;  %v649_v49 = vld [vmem:[%s4780_s16 + $0x1f8] sm:$0xff]  ;;  %v942_v50 = vld [vmem:[%s4865_s12 + $0x8] sm:$0xff] }
 0x10d   : > { %v630_v46 = vld [vmem:[%s4780_s16 + $0x160] sm:$0xff]  ;;  %v653_v52 = vld [vmem:[%s4780_s16 + $0x218] sm:$0xff]  ;;  %v656_v53 = vld [vmem:[%s4780_s16 + $0x230] sm:$0xff]  ;;  %v3368_v55 = vpack.c.bf16 %v649_v49, %v646_v44 }
 0x10e   : > { %3409 = vmatpush3.bf16.msra.mxu1 %v3408_v17  ;;  %v945_v51 = vld [vmem:[%s4865_s12 + $0x20] sm:$0xff]  ;;  %v3420_v54 = vpack.c.bf16 %v633_v47, %v630_v46  ;;  %v652_v56 = vld [vmem:[%s4780_s16 + $0x210] sm:$0xff]  ;;  %v944_v59 = vld [vmem:[%s4865_s12 + $0x18] sm:$0xff]  ;;  %v3370_v60 = vpack.c.bf16 %v656_v53, %v653_v52 }
 0x10f   : > { %3353 = vmatpush1.bf16.msra.mxu0 %v3352_v6  ;;  %3411 = vmatprep.subr.bf16.mxu1 %v3410_v20  ;;  %v4872_v57 = vpack.c.bf16 %v945_v51, %v942_v50  ;;  %v941_v58 = vld [vmem:[%s4865_s12] sm:$0xff]  ;;  %v655_v61 = vld [vmem:[%s4780_s16 + $0x228] sm:$0xff]  ;;  %v948_v62 = vld [vmem:[%s4865_s12 + $0x38] sm:$0xff] }
 0x110   : > { %3355 = vmatprep.subr.bf16.mxu0 %v3354_v11  ;;  %v951_v63 = vld [vmem:[%s4865_s12 + $0x50] sm:$0xff]  ;;  %v659_v0 = vld [vmem:[%s4780_s16 + $0x248] sm:$0xff]  ;;  %v662_v1 = vld [vmem:[%s4780_s16 + $0x260] sm:$0xff]  ;;  %v4884_v4 = vpack.c.bf16 %v944_v59, %v941_v58  ;;  %v3372_v5 = vpack.c.bf16 %v655_v61, %v652_v56 }
 0x111   : > { %v658_v2 = vld [vmem:[%s4780_s16 + $0x240] sm:$0xff]  ;;  %v4882_v3 = vld [vmem:[#allocation5] sm:$0xff]  ;;  %v4886_v6 = vld [vmem:[#allocation5 + $0x18] sm:$0xff]  ;;  %v4889_v7 = vpack.c.bf16 %v951_v63, %v948_v62  ;;  %v3374_v10 = vpack.c.bf16 %v662_v1, %v659_v0 }
 0x112   : > { %3413 = vmatpush3.bf16.msra.mxu1 %v3412_v29  ;;  %v947_v8 = vld [vmem:[%s4865_s12 + $0x30] sm:$0xff]  ;;  %v950_v9 = vld [vmem:[%s4865_s12 + $0x48] sm:$0xff]  ;;  %v661_v11 = vld [vmem:[%s4780_s16 + $0x258] sm:$0xff] }
 0x113   : > { %3357 = vmatpush1.bf16.msra.mxu0 %v3356_v18  ;;  %3415 = vmatprep.subr.bf16.mxu1 %v3414_v33  ;;  %v954_v12 = vld [vmem:[%s4865_s12 + $0x68] sm:$0xff]  ;;  %v957_v13 = vld [vmem:[%s4865_s12 + $0x80] sm:$0xff]  ;;  %v665_v14 = vld [vmem:[%s4780_s16 + $0x278] sm:$0xff]  ;;  %v4904_v18 = vpack.c.bf16 %v950_v9, %v947_v8  ;;  %v3376_v19 = vpack.c.bf16 %v661_v11, %v658_v2 }
 0x114   : > { %3359 = vmatprep.subr.bf16.mxu0 %v3358_v23  ;;  %v668_v15 = vld [vmem:[%s4780_s16 + $0x290] sm:$0xff]  ;;  %v4901_v17 = vld [vmem:[#allocation5 + $0x10] sm:$0xff]  ;;  %v4906_v20 = vld [vmem:[#allocation5 + $0x28] sm:$0xff]  ;;  %v4909_v21 = vpack.c.bf16 %v957_v13, %v954_v12 }
 0x115   : > { %v664_v16 = vld [vmem:[%s4780_s16 + $0x270] sm:$0xff]  ;;  %v953_v22 = vld [vmem:[%s4865_s12 + $0x60] sm:$0xff]  ;;  %v956_v23 = vld [vmem:[%s4865_s12 + $0x78] sm:$0xff]  ;;  %v3378_v24 = vpack.c.bf16 %v668_v15, %v665_v14  ;;  %v4421_v15 = vmov 0.0|0.0  }
 0x116   : > { %3417 = vmatpush3.bf16.msra.mxu1 %v3416_v42  ;;  %v667_v25 = vld [vmem:[%s4780_s16 + $0x288] sm:$0xff]  ;;  %v960_v26 = vld [vmem:[%s4865_s12 + $0x98] sm:$0xff]  ;;  %v963_v27 = vld [vmem:[%s4865_s12 + $0xb0] sm:$0xff]  ;;  %v4925_v33 = vpack.c.bf16 %v956_v23, %v953_v22 }
 0x117   : > { %3361 = vmatpush1.bf16.msra.mxu0 %v3360_v31  ;;  %3419 = vmatprep.subr.bf16.mxu1 %v3418_v45  ;;  %v671_v28 = vld [vmem:[%s4780_s16 + $0x2a8] sm:$0xff]  ;;  %v674_v29 = vld [vmem:[%s4780_s16 + $0x2c0] sm:$0xff]  ;;  %v673_v31 = vld [vmem:[%s4780_s16 + $0x2b8] sm:$0xff]  ;;  %v3380_v34 = vpack.c.bf16 %v667_v25, %v664_v16 }
 0x118   : > { %3363 = vmatprep.subr.bf16.mxu0 %v3362_v36  ;;  %v670_v30 = vld [vmem:[%s4780_s16 + $0x2a0] sm:$0xff]  ;;  %v4922_v32 = vld [vmem:[#allocation5 + $0x20] sm:$0xff]  ;;  %v4927_v35 = vld [vmem:[#allocation5 + $0x38] sm:$0xff]  ;;  %v4930_v36 = vpack.c.bf16 %v963_v27, %v960_v26  ;;  %v3382_v39 = vpack.c.bf16 %v674_v29, %v671_v28 }
 0x119   : > { %v959_v37 = vld [vmem:[%s4865_s12 + $0x90] sm:$0xff]  ;;  %v962_v38 = vld [vmem:[%s4865_s12 + $0xa8] sm:$0xff]  ;;  %v969_v41 = vld [vmem:[%s4865_s12 + $0xe0] sm:$0xff] }
 0x11a   : > { %3421 = vmatpush3.bf16.msra.mxu1 %v3420_v54  ;;  %v966_v40 = vld [vmem:[%s4865_s12 + $0xc8] sm:$0xff]  ;;  %v996_v42 = vld [vmem:[#allocation8] sm:$0xff]  ;;  %v680_v44 = vld [vmem:[%s4780_s16 + $0x2f0] sm:$0xff]  ;;  %v4944_v47 = vpack.c.bf16 %v962_v38, %v959_v37 }
 0x11b   : > { %3365 = vmatpush1.bf16.msra.mxu0 %v3364_v43  ;;  %3423 = vmatprep.subr.bf16.mxu1 %v4872_v57  ;;  %v677_v43 = vld [vmem:[%s4780_s16 + $0x2d8] sm:$0xff]  ;;  %v676_v45 = vld [vmem:[%s4780_s16 + $0x2d0] sm:$0xff]  ;;  %v4941_v46 = vld [vmem:[#allocation5 + $0x30] sm:$0xff]  ;;  %v4949_v50 = vpack.c.bf16 %v969_v41, %v966_v40 }
 0x11c   : > { %3367 = vmatprep.subr.bf16.mxu0 %v3366_v48  ;;  %998 = vperm.xlu0 %3998, %v996_v42   ;;  %v3384_v48 = vpack.c.bf16 %v673_v31, %v670_v30  ;;  %v4946_v49 = vld [vmem:[#allocation5 + $0x48] sm:$0xff]  ;;  %v968_v52 = vld [vmem:[%s4865_s12 + $0xd8] sm:$0xff]  ;;  %v3386_v53 = vpack.c.bf16 %v680_v44, %v677_v43  ;;  %v679_v54 = vld [vmem:[%s4780_s16 + $0x2e8] sm:$0xff]  ;;  %s5135_s16 = sadd.s32 %s1905_s11, %s5120_s23 }
 0x11d   : > { %877 = vmatmul.mubr.f32.vlgmr.msra.gmra.mrb[0].mxu1 %v4882_v3  ;;  %v965_v51 = vld [vmem:[%s4865_s12 + $0xc0] sm:$0xff]  ;;  %v975_v56 = vld [vmem:[%s4865_s12 + $0x110] sm:$0xff]  ;;  %v4958_v58 = vld [vmem:[#allocation5 + $0x40] sm:$0xff] }
 0x11e   : > { %881 = vmatprep.mubr.f32.mxu1 %v4886_v6  ;;  %3425 = vmatpush1.bf16.msra.mxu1 %v4884_v4  ;;  %v4961_v59 = vpack.c.bf16 %v968_v52, %v965_v51  ;;  %v4963_v61 = vld [vmem:[#allocation5 + $0x58] sm:$0xff]  ;;  %v974_v0 = vld [vmem:[%s4865_s12 + $0x108] sm:$0xff]  ;;  %v981_v2 = vld [vmem:[%s4865_s12 + $0x140] sm:$0xff] }
 0x11f   : > { %3369 = vmatpush1.bf16.msra.mxu0 %v3368_v55  ;;  %3427 = vmatprep.subr.bf16.mxu1 %v4889_v7  ;;  %v972_v55 = vld [vmem:[%s4865_s12 + $0xf8] sm:$0xff]  ;;  %v971_v63 = vld [vmem:[%s4865_s12 + $0xf0] sm:$0xff]  ;;  %v978_v1 = vld [vmem:[%s4865_s12 + $0x128] sm:$0xff] }
 0x120   : > { %3371 = vmatprep.subr.bf16.mxu0 %v3370_v60  ;;  %v3388_v60 = vpack.c.bf16 %v679_v54, %v676_v45  ;;  %v4966_v62 = vpack.c.bf16 %v975_v56, %v972_v55  ;;  %v946_v8 = vld [vmem:[%s4865_s12 + $0x28] sm:$0xff]  ;;  %v4982_v11 = vpack.c.bf16 %v974_v0, %v971_v63  ;;  %v4984_v12 = vpack.c.bf16 %v981_v2, %v978_v1  ;;  %v977_v13 = vld [vmem:[%s4865_s12 + $0x120] sm:$0xff]  ;;  %v980_v14 = vld [vmem:[%s4865_s12 + $0x138] sm:$0xff] }
 0x121   : > { %882 = vmatmul.mubr.f32.gmra.mrb[2].mxu1 %v4901_v17  ;;  %v4976_v9 = vld [vmem:[#allocation5 + $0x50] sm:$0xff]  ;;  %v987_v22 = vld [vmem:[%s4865_s12 + $0x170] sm:$0xff]  ;;  %v949_v23 = vld [vmem:[%s4865_s12 + $0x40] sm:$0xff]  ;;  %v5004_v27 = vpack.c.bf16 %v980_v14, %v977_v13  ;;  %v2442_v54 = vstv %s5123_s19  ;;  %v1718_v0 = vstv %s5132_s26  ;;  %v684_v14 = vlaneseq }
 0x122   : > { %886 = vmatprep.mubr.f32.mxu1 %v4906_v20  ;;  %3429 = vmatpush1.bf16.msra.mxu1 %v4904_v18  ;;  %v4998_v25 = vld [vmem:[#allocation5 + $0x60] sm:$0xff]  ;;  %v5001_v26 = vld [vmem:[#allocation5 + $0x78] sm:$0xff]  ;;  %v986_v29 = vld [vmem:[%s4865_s12 + $0x168] sm:$0xff]  ;;  %v1899_v2 = vstv %s5129_s14 }
 0x123   : > { %3373 = vmatpush1.bf16.msra.mxu0 %v3372_v5  ;;  %3431 = vmatprep.subr.bf16.mxu1 %v4909_v21  ;;  %v943_v5 = vld [vmem:[%s4865_s12 + $0x10] sm:$0xff]  ;;  %v958_v31 = vld [vmem:[%s4865_s12 + $0x88] sm:$0xff]  ;;  %v973_v43 = vld [vmem:[%s4865_s12 + $0x100] sm:$0xff] }
 0x124   : > { %3375 = vmatprep.subr.bf16.mxu0 %v3374_v10  ;;  %v4979_v10 = vld [vmem:[#allocation5 + $0x68] sm:$0xff]  ;;  %v4989_v16 = vpack.c.bf16 %v946_v8, %v943_v5  ;;  %v5038_v40 = vld [vmem:[%s490_s18] sm:$0xff]  ;;  %v976_v44 = vld [vmem:[%s4865_s12 + $0x118] sm:$0xff]  ;;  %v2080_v8 = vstv %s5135_s16  ;;  %s3878_s18 = smul.u32 3, %s4777_s24 }
 0x125   : > { %887 = vmatmul.mubr.f32.gmra.mrb[4].mxu1 %v4922_v32  ;;  %v970_v42 = vld [vmem:[%s4865_s12 + $0xe8] sm:$0xff]  ;;  %v5063_v45 = vpack.c.bf16 %v976_v44, %v973_v43  ;;  %v985_v51 = vld [vmem:[%s4865_s12 + $0x160] sm:$0xff]  ;;  %v988_v52 = vld [vmem:[%s4865_s12 + $0x178] sm:$0xff] }
 0x126   : > { %891 = vmatprep.mubr.f32.mxu1 %v4927_v35  ;;  %3433 = vmatpush1.bf16.msra.mxu1 %v4925_v33  ;;  %s473_s3 = scalar_lea.vmem [#allocation12], %s3878_s18 }
 0x127   : > { %3377 = vmatpush1.bf16.msra.mxu0 %v3376_v19  ;;  %3435 = vmatprep.subr.bf16.mxu1 %v4930_v36  ;;  %v984_v19 = vld [vmem:[%s4865_s12 + $0x158] sm:$0xff] }
 0x128   : > { %3379 = vmatprep.subr.bf16.mxu0 %v3378_v24  ;;  %v952_v24 = vld [vmem:[%s4865_s12 + $0x58] sm:$0xff]  ;;  %v5008_v28 = vpack.c.bf16 %v987_v22, %v984_v19  ;;  %v685_v19 = vshrl.u32 %v684_v14, 7 }
 0x129   : > { %892 = vmatmul.mubr.f32.gmra.mrb[6].mxu1 %v4941_v46  ;;  %v5012_v30 = vpack.c.bf16 %v952_v24, %v949_v23  ;;  %v682_v23 = vld [vmem:[%s473_s3] sm:$0x7] }
 0x12a   : > { %896 = vmatprep.mubr.f32.mxu1 %v4946_v49  ;;  %3437 = vmatpush1.bf16.msra.mxu1 %v4944_v47  ;;  %v694_v22 = vsub.s32 2, %v685_v19 }
 0x12b   : > { %3381 = vmatpush1.bf16.msra.mxu0 %v3380_v34  ;;  %3439 = vmatprep.subr.bf16.mxu1 %v4949_v50  ;;  %v584_v34 = vld [vmem:[#allocation5 + $0x70] sm:$0xff] }
 0x12c   : > { %3383 = vmatprep.subr.bf16.mxu0 %v3382_v39  ;;  %v964_v39 = vld [vmem:[%s4865_s12 + $0xb8] sm:$0xff] }
 0x12d   : > { %897 = vmatmul.mubr.f32.gmra.mrb[8].mxu1 %v4958_v58 }
 0x12e   : > { %901 = vmatprep.mubr.f32.mxu1 %v4963_v61  ;;  %3441 = vmatpush1.bf16.msra.mxu1 %v4961_v59 }
 0x12f   : > { %3385 = vmatpush1.bf16.msra.mxu0 %v3384_v48  ;;  %3443 = vmatprep.subr.bf16.mxu1 %v4966_v62  ;;  %v982_v48 = vld [vmem:[%s4865_s12 + $0x148] sm:$0xff] }
 0x130   : > { %3387 = vmatprep.subr.bf16.mxu0 %v3386_v53  ;;  %v5083_v53 = vpack.c.bf16 %v988_v52, %v985_v51  ;;  %v690_v52 = vsub.s32 1, %v685_v19 }
 0x131   : > { %902 = vmatmul.mubr.f32.gmra.mrb[10].mxu1 %v4976_v9 }
 0x132   : > { %906 = vmatprep.mubr.f32.mxu1 %v4979_v10  ;;  %3445 = vmatpush1.bf16.msra.mxu1 %v4982_v11 }
 0x133   : > { %3389 = vmatpush1.bf16.msra.mxu0 %v3388_v60  ;;  %3447 = vmatprep.subr.bf16.mxu1 %v4984_v12 }
 0x134   : > { %3454 = vmatprep.subr.bf16.mxu0 %v4421_v15 }
 0x135   : > { %907 = vmatmul.mubr.f32.gmra.mrb[12].mxu1 %v4998_v25 }
 0x136   : > { %764 = vmatmul.mubr.f32.vlgmr.msra.gmra.mrb[0].mxu0 %v4882_v3  ;;  %v983_v3 = vld [vmem:[%s4865_s12 + $0x150] sm:$0xff]  ;;  %911 = vmatprep.mubr.f32.mxu1 %v5001_v26 }
 0x137   : > { %769 = vmatprep.mubr.f32.mxu0 %v4886_v6  ;;  %3456 = vmatpush3.bf16.msra.mxu0 %v4989_v16  ;;  %v955_v6 = vld [vmem:[%s4865_s12 + $0x70] sm:$0xff]  ;;  %v5023_v37 = vpack.c.bf16 %v986_v29, %v983_v3 }
 0x138   : > { %3457 = vmatprep.subr.bf16.mxu0 %v4421_v15  ;;  %3449 = vmatpush1.bf16.msra.mxu1 %v5004_v27  ;;  %v5027_v38 = vpack.c.bf16 %v958_v31, %v955_v6 }
 0x139   : > { %3451 = vmatprep.subr.bf16.mxu1 %v5008_v28  ;;  %912 = vmatmul.mubr.f32.gmra.mrb[14].mxu1 %v584_v34 }
 0x13a   : > { %770 = vmatmul.mubr.f32.gmra.mrb[2].mxu0 %v4901_v17  ;;  %v961_v17 = vld [vmem:[%s4865_s12 + $0xa0] sm:$0xff] }
 0x13b   : > { %775 = vmatprep.mubr.f32.mxu0 %v4906_v20  ;;  %3459 = vmatpush3.bf16.msra.mxu0 %v5012_v30  ;;  %v4422_v20 = vmov 0.0   ;;  %v5041_v41 = vpack.c.bf16 %v964_v39, %v961_v17 }
 0x13c   : > { %3460 = vmatprep.subr.bf16.mxu0 %v4421_v15  ;;  %1075 = vmatprep.mubr.f32.mxu1 %v4422_v20 }
 0x13d   : > { %3453 = vmatpush1.bf16.msra.mxu1 %v5023_v37 }
 0x13e   : > { %776 = vmatmul.mubr.f32.gmra.mrb[4].mxu0 %v4922_v32  ;;  %3479 = vmatprep.subr.bf16.mxu1 %v4872_v57  ;;  %v967_v32 = vld [vmem:[%s4865_s12 + $0xd0] sm:$0xff] }
 0x13f   : > { %781 = vmatprep.mubr.f32.mxu0 %v4927_v35  ;;  %3462 = vmatpush3.bf16.msra.mxu0 %v5027_v38  ;;  %v5052_v35 = vpack.c.bf16 %v970_v42, %v967_v32 }
 0x140   : > { %3463 = vmatprep.subr.bf16.mxu0 %v4421_v15  ;;  %1076 = vmatmul.mubr.f32.vlgmr.msra.gmra.mrb[16].mxu1 %v5038_v40 }
 0x141   : > { %3481 = vmatpush1.bf16.msra.mxu1 %v4884_v4  ;;  %1256 = vmatprep.mubr.f32.mxu1 %v4422_v20 }
 0x142   : > { %782 = vmatmul.mubr.f32.gmra.mrb[6].mxu0 %v4941_v46  ;;  %3483 = vmatprep.subr.bf16.mxu1 %v4889_v7  ;;  %v979_v46 = vld [vmem:[%s4865_s12 + $0x130] sm:$0xff]  ;;  %s5149_s12 = sadd.s32 %s5120_s23, %s561_s15  ;;  %s1002_s15 = smul.u32 56, %s4399_s30 }
 0x143   : > { %787 = vmatprep.mubr.f32.mxu0 %v4946_v49  ;;  %3465 = vmatpush3.bf16.msra.mxu0 %v5041_v41  ;;  %v5073_v49 = vpack.c.bf16 %v982_v48, %v979_v46  ;;  %v686_v48 = vsub.s32 0, %v685_v19 }
 0x144   : > { %3466 = vmatprep.subr.bf16.mxu0 %v4421_v15  ;;  %s1003_s2 = sshra.s32 %s1002_s15, 3  ;;  %s1180_s11 = scalar_lea.vmem [#allocation4], %s1002_s15 }
 0x145   : > { %3485 = vmatpush1.bf16.msra.mxu1 %v4904_v18  ;;  %s2846_s4 = smul.u32 24, %s1003_s2 }
 0x146   : > { %788 = vmatmul.mubr.f32.gmra.mrb[8].mxu0 %v4958_v58  ;;  %3487 = vmatprep.subr.bf16.mxu1 %v4909_v21  ;;  %v1356_v58 = vstv %s5149_s12 }
 0x147   : > { %793 = vmatprep.mubr.f32.mxu0 %v4963_v61  ;;  %3468 = vmatpush3.bf16.msra.mxu0 %v5052_v35  ;;  %v1537_v61 = vstv %s5126_s25  ;;  %s1007_s17 = scalar_lea.vmem [#allocation3], %s2846_s4 }
 0x148   : > { %3469 = vmatprep.subr.bf16.mxu0 %v4421_v15 }
 0x149   : > { %3489 = vmatpush1.bf16.msra.mxu1 %v4925_v33 }
 0x14a   : > { %794 = vmatmul.mubr.f32.gmra.mrb[10].mxu0 %v4976_v9  ;;  %3491 = vmatprep.subr.bf16.mxu1 %v4930_v36 }
 0x14b   : > { %799 = vmatprep.mubr.f32.mxu0 %v4979_v10  ;;  %3471 = vmatpush3.bf16.msra.mxu0 %v5063_v45  ;;  %v2261_v10 = vstv %s5138_s7 }
 0x14c   : > { %3472 = vmatprep.subr.bf16.mxu0 %v4421_v15 }
 0x14d   : > { %3493 = vmatpush1.bf16.msra.mxu1 %v4944_v47 }
 0x14e   : > { %800 = vmatmul.mubr.f32.gmra.mrb[12].mxu0 %v4998_v25  ;;  %3495 = vmatprep.subr.bf16.mxu1 %v4949_v50  ;;  %v695_v25 = vrot.slane %v682_v23, %v694_v22 }
 0x14f   : > { %805 = vmatprep.mubr.f32.mxu0 %v5001_v26  ;;  %3474 = vmatpush3.bf16.msra.mxu0 %v5073_v49 }
 0x150   : > { %3475 = vmatprep.subr.bf16.mxu0 %v4421_v15 }
 0x151   : > { %3497 = vmatpush1.bf16.msra.mxu1 %v4961_v59 }
 0x152   : > { %806 = vmatmul.mubr.f32.gmra.mrb[14].mxu0 %v584_v34  ;;  %3499 = vmatprep.subr.bf16.mxu1 %v4966_v62 }
 0x153   : > { %3078 = vmatprep.mubr.msk.f32.mxu0 %vm4423_vm0, %v4422_v20  ;;  %3477 = vmatpush3.bf16.msra.mxu0 %v5083_v53 }
 0x154   : > { %3510 = vmatprep.subr.bf16.mxu0 %v4421_v15 }
 0x155   : > { %3501 = vmatpush1.bf16.msra.mxu1 %v4982_v11 }
 0x156   : > { %3079 = vmatmul.mubr.f32.vlgmr.msra.gmra.mrb[16].mxu0 %v5038_v40  ;;  %3503 = vmatprep.subr.bf16.mxu1 %v4984_v12 }
 0x157   : > { %3512 = vmatpush3.bf16.msra.mxu0 %v4989_v16  ;;  %3113 = vmatprep.mubr.msk.f32.mxu0 %vm4423_vm0, %v4422_v20 }
 0x158   : > { %3513 = vmatprep.subr.bf16.mxu0 %v4421_v15 }
 0x159   : > { %3505 = vmatpush1.bf16.msra.mxu1 %v5004_v27 }
 0x15a   : > { %3507 = vmatprep.subr.bf16.mxu1 %v5008_v28 }
 0x15b   : > { %3515 = vmatpush3.bf16.msra.mxu0 %v5012_v30 }
 0x15c   : > { %3516 = vmatprep.subr.bf16.mxu0 %v4421_v15 }
 0x15d   : > { %3509 = vmatpush1.bf16.msra.mxu1 %v5023_v37 }
 0x15e   : > { %3535 = vmatprep.subr.bf16.mxu1 %v4872_v57 }
 0x15f   : > { %3518 = vmatpush3.bf16.msra.mxu0 %v5027_v38 }
 0x160   : > { %3519 = vmatprep.subr.bf16.mxu0 %v4421_v15 }
 0x163   : > { %3521 = vmatpush3.bf16.msra.mxu0 %v5041_v41 }
 0x164   : > { %3522 = vmatprep.subr.bf16.mxu0 %v4421_v15 }
 0x167   : > { %3524 = vmatpush3.bf16.msra.mxu0 %v5052_v35 }
 0x168   : > { %3525 = vmatprep.subr.bf16.mxu0 %v4421_v15 }
 0x16b   : > { %3527 = vmatpush3.bf16.msra.mxu0 %v5063_v45 }
 0x16c   : > { %3528 = vmatprep.subr.bf16.mxu0 %v4421_v15 }
 0x16f   : > { %3530 = vmatpush3.bf16.msra.mxu0 %v5073_v49 }
 0x170   : > { %3531 = vmatprep.subr.bf16.mxu0 %v4421_v15 }
 0x173   : > { %3533 = vmatpush3.bf16.msra.mxu0 %v5083_v53 }
 0x174   : > { %3566 = vmatprep.subr.bf16.mxu0 %v4421_v15 }
 0x19b   : > { %v5141_v55 = vpop.permute.xlu0 %998 }
 0x19c   : > { %vm5144_vm1 = vcmp.lt.s32.totalorder %v2442_v54, %v5141_v55  ;;  %vm5153_vm2 = vcmp.lt.s32.totalorder %v1356_v58, %v5141_v55  ;;  %vm5159_vm3 = vcmp.lt.s32.totalorder %v1537_v61, %v5141_v55  ;;  %vm5165_vm4 = vcmp.lt.s32.totalorder %v1718_v0, %v5141_v55 }
 0x19d   : > { %vm5171_vm5 = vcmp.lt.s32.totalorder %v1899_v2, %v5141_v55  ;;  %vm5177_vm6 = vcmp.lt.s32.totalorder %v2080_v8, %v5141_v55  ;;  %vm5183_vm7 = vcmp.lt.s32.totalorder %v2261_v10, %v5141_v55  ;;  %v5188_v0 = vrot.slane %v682_v23, %v686_v48 }
 0x19e   : > { %v5190_v8 = vrot.slane %v682_v23, %v690_v52 }
 0x1f0   : > { %v2886_v24 = vpop.f32.mrb[0].mxu1 }
 0x1f1   : > { %v2887_v26 = vpop.f32.mrb[1].mxu1 }
 0x1f2   : > { %v2888_v3 = vadd.f32 %v2887_v26, %v2886_v24 }
 0x1f4   : > { %v879_v29 = vadd.f32 %v2888_v3, %v695_v25  ;;  %v2889_v6 = vpop.f32.mrb[2].mxu1 }
 0x1f5   : > { %v2890_v31 = vpop.f32.mrb[3].mxu1 }
 0x1f6   : > { %919 = vst [vmem:[#allocation3 + $0x10] sm:$0xff] %v879_v29  ;;  %v2891_v34 = vadd.f32 %v2890_v31, %v2889_v6 }
 0x1f8   : > { %v884_v17 = vadd.f32 %v2891_v34, %v695_v25  ;;  %v2892_v39 = vpop.f32.mrb[4].mxu1 }
 0x1f9   : > { %v2893_v32 = vpop.f32.mrb[5].mxu1 }
 0x1fa   : > { %922 = vst [vmem:[#allocation3 + $0x28] sm:$0xff] %v884_v17  ;;  %v2894_v42 = vadd.f32 %v2893_v32, %v2892_v39 }
 0x1fc   : > { %v889_v43 = vadd.f32 %v2894_v42, %v695_v25  ;;  %v2895_v44 = vpop.f32.mrb[6].mxu1 }
 0x1fd   : > { %v2896_v46 = vpop.f32.mrb[7].mxu1 }
 0x1fe   : > { %925 = vst [vmem:[#allocation3 + $0x40] sm:$0xff] %v889_v43  ;;  %v2897_v51 = vadd.f32 %v2896_v46, %v2895_v44 }
 0x200   : > { %v894_v54 = vadd.f32 %v2897_v51, %v695_v25  ;;  %v2898_v58 = vpop.f32.mrb[8].mxu1 }
 0x201   : > { %v2899_v61 = vpop.f32.mrb[9].mxu1 }
 0x202   : > { %928 = vst [vmem:[#allocation3 + $0x58] sm:$0xff] %v894_v54  ;;  %v2900_v2 = vadd.f32 %v2899_v61, %v2898_v58 }
 0x204   : > { %v899_v10 = vadd.f32 %v2900_v2, %v695_v25  ;;  %v2901_v14 = vpop.f32.mrb[10].mxu1 }
 0x205   : > { %v2902_v24 = vpop.f32.mrb[11].mxu1 }
 0x206   : > { %931 = vst [vmem:[#allocation3 + $0x70] sm:$0xff] %v899_v10  ;;  %v2903_v29 = vadd.f32 %v2902_v24, %v2901_v14 }
 0x208   : > { %v904_v6 = vadd.f32 %v2903_v29, %v695_v25  ;;  %v2904_v31 = vpop.f32.mrb[12].mxu1 }
 0x209   : > { %v765_v22 = vpop.f32.mrb[0].mxu0  ;;  %v2905_v17 = vpop.f32.mrb[13].mxu1 }
 0x20a   : > { %v766_v26 = vadd.f32 %v765_v22, %v5188_v0  ;;  %v767_v3 = vpop.f32.mrb[1].mxu0  ;;  %934 = vst [vmem:[#allocation3 + $0x88] sm:$0xff] %v904_v6  ;;  %v2906_v32 = vadd.f32 %v2905_v17, %v2904_v31 }
 0x20b   : > { %v768_v19 = vadd.f32 %v767_v3, %v5190_v8 }
 0x20c   : > { %917 = vst [vmem:[#allocation3] sm:$0xff] %v766_v26  ;;  %v909_v43 = vadd.f32 %v2906_v32, %v695_v25  ;;  %v2907_v44 = vpop.f32.mrb[14].mxu1 }
 0x20d   : > { %918 = vst [vmem:[#allocation3 + $0x8] sm:$0xff] %v768_v19  ;;  %v771_v34 = vpop.f32.mrb[2].mxu0  ;;  %v2908_v48 = vpop.f32.mrb[15].mxu1 }
 0x20e   : > { %v772_v23 = vadd.f32 %v771_v34, %v5188_v0  ;;  %v773_v39 = vpop.f32.mrb[3].mxu0  ;;  %937 = vst [vmem:[#allocation3 + $0xa0] sm:$0xff] %v909_v43  ;;  %v2909_v54 = vadd.f32 %v2908_v48, %v2907_v44 }
 0x20f   : > { %v774_v42 = vadd.f32 %v773_v39, %v5190_v8 }
 0x210   : > { %920 = vst [vmem:[#allocation3 + $0x18] sm:$0xff] %v772_v23  ;;  %v914_v61 = vadd.f32 %v2909_v54, %v695_v25 }
 0x211   : > { %921 = vst [vmem:[#allocation3 + $0x20] sm:$0xff] %v774_v42  ;;  %v777_v46 = vpop.f32.mrb[4].mxu0 }
 0x212   : > { %v778_v51 = vadd.f32 %v777_v46, %v5188_v0  ;;  %v779_v52 = vpop.f32.mrb[5].mxu0  ;;  %940 = vst [vmem:[#allocation3 + $0xb8] sm:$0xff] %v914_v61 }
 0x213   : > { %v780_v58 = vadd.f32 %v779_v52, %v5190_v8  ;;  %v1077_v10 = vpop.f32.mrb[16].mxu1 }
 0x214   : > { %923 = vst [vmem:[#allocation3 + $0x30] sm:$0xff] %v778_v51  ;;  %v1079_v24 = vpop.f32.mrb[17].mxu1 }
 0x215   : > { %924 = vst [vmem:[#allocation3 + $0x38] sm:$0xff] %v780_v58  ;;  %v783_v2 = vpop.f32.mrb[6].mxu0 }
 0x216   : > { %v784_v14 = vadd.f32 %v783_v2, %v5188_v0  ;;  %v785_v22 = vpop.f32.mrb[7].mxu0 }
 0x217   : > { %v786_v26 = vadd.f32 %v785_v22, %v5190_v8 }
 0x218   : > { %926 = vst [vmem:[#allocation3 + $0x48] sm:$0xff] %v784_v14 }
 0x219   : > { %927 = vst [vmem:[#allocation3 + $0x50] sm:$0xff] %v786_v26  ;;  %v789_v3 = vpop.f32.mrb[8].mxu0 }
 0x21a   : > { %v790_v29 = vadd.f32 %v789_v3, %v5188_v0  ;;  %v791_v19 = vpop.f32.mrb[9].mxu0  ;;  %v5212_v3 = vld [vmem:[%s481_s20] ss:$0 sm:$0xff] }
 0x21b   : > { %v792_v6 = vadd.f32 %v791_v19, %v5190_v8 }
 0x21c   : > { %929 = vst [vmem:[#allocation3 + $0x60] sm:$0xff] %v790_v29 }
 0x21d   : > { %930 = vst [vmem:[#allocation3 + $0x68] sm:$0xff] %v792_v6  ;;  %v795_v25 = vpop.f32.mrb[10].mxu0 }
 0x21e   : > { %v796_v31 = vadd.f32 %v795_v25, %v5188_v0  ;;  %v797_v34 = vpop.f32.mrb[11].mxu0 }
 0x21f   : > { %v798_v17 = vadd.f32 %v797_v34, %v5190_v8 }
 0x220   : > { %932 = vst [vmem:[#allocation3 + $0x78] sm:$0xff] %v796_v31 }
 0x221   : > { %933 = vst [vmem:[#allocation3 + $0x80] sm:$0xff] %v798_v17  ;;  %v801_v23 = vpop.f32.mrb[12].mxu0  ;;  %v1175_v17 = vstv %s5120_s23  ;;  %s2809_s23 = sshll.u32 %s5149_s12, 3  ;;  %s2814_s12 = sshll.u32 %s5126_s25, 3 }
 0x222   : > { %v802_v39 = vadd.f32 %v801_v23, %v5188_v0  ;;  %v803_v32 = vpop.f32.mrb[13].mxu0  ;;  %vm1176_vm8 = vcmp.lt.s32.totalorder %v1175_v17, %v5141_v55  ;;  %s1184_s0 = sshra.s32 %s2809_s23, 3  ;;  %s1360_s15 = scalar_lea.vmem [#allocation4], %s2809_s23 }
 0x223   : > { %v804_v42 = vadd.f32 %v803_v32, %v5190_v8  ;;  %s2847_s18 = smul.u32 24, %s1184_s0  ;;  %s1365_s2 = sshra.s32 %s2814_s12, 3 }
 0x224   : > { %935 = vst [vmem:[#allocation3 + $0x90] sm:$0xff] %v802_v39  ;;  %s2848_s4 = smul.u32 24, %s1365_s2  ;;  %s1541_s20 = scalar_lea.vmem [#allocation4], %s2814_s12 }
 0x225   : > { %936 = vst [vmem:[#allocation3 + $0x98] sm:$0xff] %v804_v42  ;;  %v807_v43 = vpop.f32.mrb[14].mxu0  ;;  %s1188_s3 = scalar_lea.vmem [#allocation3], %s2847_s18  ;;  %s2818_s25 = sshll.u32 %s5132_s26, 3 }
 0x226   : > { %v808_v44 = vadd.f32 %v807_v43, %v5188_v0  ;;  %v809_v46 = vpop.f32.mrb[15].mxu0  ;;  %s1722_s18 = scalar_lea.vmem [#allocation4], %s2818_s25  ;;  %s2823_s26 = sshll.u32 %s5129_s14, 3 }
 0x227   : > { %v810_v48 = vadd.f32 %v809_v46, %v5190_v8  ;;  %s1903_s2 = scalar_lea.vmem [#allocation4], %s2823_s26  ;;  %s2827_s14 = sshll.u32 %s5135_s16, 3 }
 0x228   : > { %938 = vst [vmem:[#allocation3 + $0xa8] sm:$0xff] %v808_v44  ;;  %s2831_s16 = sshll.u32 %s5138_s7, 3  ;;  %s2842_s7 = sshll.u32 %s4399_s30, 7 }
 0x229   : > { %939 = vst [vmem:[#allocation3 + $0xb0] sm:$0xff] %v810_v48  ;;  %v1148_v51 = vpop.f32.mrb[16].mxu0 }
 0x22a   : > { %v3080_v52 = vpop.f32.mrb[17].mxu0  ;;  %v1166_v19 = vadd.f32 %v5212_v3, %v1148_v51 }
 0x230   : > { %v1008_v54 = vld [vmem:[%s1007_s17] sm:$0xff]  ;;  %v1009_v61 = vld [vmem:[%s1007_s17 + $0x8] sm:$0xff]  ;;  %v1010_v25 = vld [vmem:[%s1007_s17 + $0x10] sm:$0xff]  ;;  %s1369_s17 = scalar_lea.vmem [#allocation3], %s2848_s4  ;;  %s1908_s4 = sshra.s32 %s2827_s14, 3 }
 0x231   : > { %v1152_v58 = vadd.f32 %v1077_v10, %v1008_v54  ;;  %v1159_v14 = vadd.f32 %v1079_v24, %v1009_v61  ;;  %v1190_v51 = vld [vmem:[%s1188_s3 + $0x8] sm:$0xff]  ;;  %v1370_v60 = vld [vmem:[%s1369_s17] sm:$0xff] }
 0x233   : > { %v2806_v2 = vmul.f32 -1.442695, %v1152_v58  ;;  %v2807_v22 = vmul.f32 -1.442695, %v1159_v14 }
 0x235   : > { %3999 = vpow2.f32 %v2806_v2 }
 0x236   : > { %4001 = vpow2.f32 %v2807_v22 }
 0x23f   : > { %v4000_v0 = vpop.eup %3999 }
 0x240   : > { %v1156_v26 = vadd.f32 1.0, %v4000_v0  ;;  %v4002_v8 = vpop.eup %4001 }
 0x241   : > { %v1163_v29 = vadd.f32 1.0, %v4002_v8 }
 0x242   : > { %4003 = vrcp.f32 %v1156_v26 }
 0x243   : > { %4005 = vrcp.f32 %v1163_v29 }
 0x24c   : > { %v4004_v6 = vpop.eup %4003 }
 0x24d   : > { %v1167_v10 = vmul.f32 %v4004_v6, %v1166_v19  ;;  %v4006_v31 = vpop.eup %4005  ;;  %v1191_v6 = vld [vmem:[%s1188_s3 + $0x10] sm:$0xff] }
 0x24e   : > { %v1170_v34 = vsub.f32 1.0, %v4006_v31  ;;  %v1172_v32 = vmul.f32 %v4006_v31, %v5038_v40 }
 0x24f   : > { %v1168_v24 = vadd.f32 %v1167_v10, %v1010_v25 }
 0x251   : > { %4007 = vtanh.f32 %v1168_v24 }
 0x25b   : > { %v4008_v23 = vpop.eup %4007 }
 0x25c   : > { %v1171_v39 = vmul.f32 %v4008_v23, %v1170_v34 }
 0x25e   : > { %v1173_v42 = vadd.f32 %v1172_v32, %v1171_v39 }
 0x260   : > { %v5219_v43 = vsel %vm1176_vm8, %v1173_v42, %v5038_v40  ;;  %v1178_v44 = vsel %vm1176_vm8, %v1173_v42, 0.0  ;;  %v1189_v40 = vld [vmem:[%s1188_s3] sm:$0xff]  ;;  %s1727_s3 = sshra.s32 %s2823_s26, 3  ;;  %s2835_s26 = sshll.u32 %s5123_s19, 3 }
 0x261   : > { %1181 = vst [vmem:[%s1180_s11] sm:$0xff] %v1178_v44  ;;  %1257 = vmatmul.mubr.f32.vlgmr.msra.gmra.mrb[18].mxu1 %v5219_v43  ;;  %3114 = vmatmul.mubr.f32.vlgmr.msra.gmra.mrb[18].mxu0 %v5219_v43  ;;  %s1546_s11 = sshra.s32 %s2818_s25, 3  ;;  %s2084_s25 = scalar_lea.vmem [#allocation4], %s2827_s14 }
 0x262   : > { %3537 = vmatpush1.bf16.msra.mxu1 %v4884_v4  ;;  %3568 = vmatpush3.bf16.msra.mxu0 %v4989_v16  ;;  %s2849_s23 = smul.u32 24, %s1546_s11  ;;  %s2089_s11 = sshra.s32 %s2831_s16, 3 }
 0x263   : > { %3539 = vmatprep.subr.bf16.mxu1 %v4889_v7  ;;  %3569 = vmatprep.subr.bf16.mxu0 %v4421_v15 }
 0x264   : > { %1437 = vmatprep.mubr.f32.mxu1 %v4422_v20  ;;  %3148 = vmatprep.mubr.msk.f32.mxu0 %vm4423_vm0, %v4422_v20  ;;  %s1550_s0 = scalar_lea.vmem [#allocation3], %s2849_s23  ;;  %s2852_s23 = smul.u32 24, %s2089_s11 }
 0x265   : > { %v1551_v63 = vld [vmem:[%s1550_s0] sm:$0xff] }
 0x266   : > { %3541 = vmatpush1.bf16.msra.mxu1 %v4904_v18  ;;  %3571 = vmatpush3.bf16.msra.mxu0 %v5012_v30 }
 0x267   : > { %3543 = vmatprep.subr.bf16.mxu1 %v4909_v21  ;;  %3572 = vmatprep.subr.bf16.mxu0 %v4421_v15 }
 0x26a   : > { %3545 = vmatpush1.bf16.msra.mxu1 %v4925_v33  ;;  %3574 = vmatpush3.bf16.msra.mxu0 %v5027_v38 }
 0x26b   : > { %3547 = vmatprep.subr.bf16.mxu1 %v4930_v36  ;;  %3575 = vmatprep.subr.bf16.mxu0 %v4421_v15 }
 0x26e   : > { %3549 = vmatpush1.bf16.msra.mxu1 %v4944_v47  ;;  %3577 = vmatpush3.bf16.msra.mxu0 %v5041_v41 }
 0x26f   : > { %3551 = vmatprep.subr.bf16.mxu1 %v4949_v50  ;;  %3578 = vmatprep.subr.bf16.mxu0 %v4421_v15 }
 0x272   : > { %3553 = vmatpush1.bf16.msra.mxu1 %v4961_v59  ;;  %3580 = vmatpush3.bf16.msra.mxu0 %v5052_v35 }
 0x273   : > { %3555 = vmatprep.subr.bf16.mxu1 %v4966_v62  ;;  %3581 = vmatprep.subr.bf16.mxu0 %v4421_v15 }
 0x276   : > { %3557 = vmatpush1.bf16.msra.mxu1 %v4982_v11  ;;  %3583 = vmatpush3.bf16.msra.mxu0 %v5063_v45 }
 0x277   : > { %3559 = vmatprep.subr.bf16.mxu1 %v4984_v12  ;;  %3584 = vmatprep.subr.bf16.mxu0 %v4421_v15 }
 0x27a   : > { %3561 = vmatpush1.bf16.msra.mxu1 %v5004_v27  ;;  %3586 = vmatpush3.bf16.msra.mxu0 %v5073_v49 }
 0x27b   : > { %3563 = vmatprep.subr.bf16.mxu1 %v5008_v28  ;;  %3587 = vmatprep.subr.bf16.mxu0 %v4421_v15 }
 0x27e   : > { %3565 = vmatpush1.bf16.msra.mxu1 %v5023_v37  ;;  %3589 = vmatpush3.bf16.msra.mxu0 %v5083_v53 }
 0x27f   : > { %3591 = vmatprep.subr.bf16.mxu1 %v4872_v57  ;;  %3622 = vmatprep.subr.bf16.mxu0 %v4421_v15 }
 0x334   : > { %v1258_v55 = vpop.f32.mrb[18].mxu1  ;;  %v1329_v46 = vpop.f32.mrb[18].mxu0 }
 0x335   : > { %v1333_v48 = vadd.f32 %v1258_v55, %v1189_v40  ;;  %v1260_v52 = vpop.f32.mrb[19].mxu1  ;;  %v3115_v54 = vpop.f32.mrb[19].mxu0  ;;  %v1347_v8 = vadd.f32 %v5212_v3, %v1329_v46  ;;  %v1371_v40 = vld [vmem:[%s1369_s17 + $0x8] sm:$0xff] }
 0x336   : > { %v1340_v58 = vadd.f32 %v1260_v52, %v1190_v51 }
 0x337   : > { %v2811_v61 = vmul.f32 -1.442695, %v1333_v48 }
 0x338   : > { %v2812_v2 = vmul.f32 -1.442695, %v1340_v58 }
 0x339   : > { %4009 = vpow2.f32 %v2811_v61 }
 0x33a   : > { %4011 = vpow2.f32 %v2812_v2 }
 0x343   : > { %v4010_v14 = vpop.eup %4009 }
 0x344   : > { %v1337_v22 = vadd.f32 1.0, %v4010_v14  ;;  %v4012_v0 = vpop.eup %4011 }
 0x345   : > { %v1344_v26 = vadd.f32 1.0, %v4012_v0 }
 0x346   : > { %4013 = vrcp.f32 %v1337_v22 }
 0x347   : > { %4015 = vrcp.f32 %v1344_v26  ;;  %v1372_v26 = vld [vmem:[%s1369_s17 + $0x10] sm:$0xff]  ;;  %s2851_s17 = smul.u32 24, %s1908_s4  ;;  %s2801_s4 = sshll.u32 %s4777_s24, 6 }
 0x350   : > { %v4014_v29 = vpop.eup %4013 }
 0x351   : > { %v1348_v19 = vmul.f32 %v4014_v29, %v1347_v8  ;;  %v4016_v25 = vpop.eup %4015 }
 0x352   : > { %v1351_v24 = vsub.f32 1.0, %v4016_v25  ;;  %v1353_v17 = vmul.f32 %v4016_v25, %v5219_v43 }
 0x353   : > { %v1349_v10 = vadd.f32 %v1348_v19, %v1191_v6 }
 0x355   : > { %4017 = vtanh.f32 %v1349_v10 }
 0x35f   : > { %v4018_v31 = vpop.eup %4017 }
 0x360   : > { %v1352_v34 = vmul.f32 %v4018_v31, %v1351_v24 }
 0x362   : > { %v1354_v23 = vadd.f32 %v1353_v17, %v1352_v34 }
 0x364   : > { %v5268_v39 = vsel %vm5153_vm2, %v1354_v23, %v5219_v43  ;;  %v1359_v32 = vsel %vm5153_vm2, %v1354_v23, 0.0 }
 0x365   : > { %1361 = vst [vmem:[%s1360_s15] sm:$0xff] %v1359_v32  ;;  %1438 = vmatmul.mubr.f32.vlgmr.msra.gmra.mrb[20].mxu1 %v5268_v39  ;;  %3149 = vmatmul.mubr.f32.vlgmr.msra.gmra.mrb[20].mxu0 %v5268_v39  ;;  %v1552_v32 = vld [vmem:[%s1550_s0 + $0x8] sm:$0xff]  ;;  %s2850_s15 = smul.u32 24, %s1727_s3  ;;  %s2270_s3 = sshra.s32 %s2835_s26, 3 }
 0x366   : > { %3593 = vmatpush1.bf16.msra.mxu1 %v4884_v4  ;;  %3624 = vmatpush3.bf16.msra.mxu0 %v4989_v16 }
 0x367   : > { %3595 = vmatprep.subr.bf16.mxu1 %v4889_v7  ;;  %3625 = vmatprep.subr.bf16.mxu0 %v4421_v15  ;;  %s1731_s12 = scalar_lea.vmem [#allocation3], %s2850_s15  ;;  %s2853_s15 = smul.u32 24, %s2270_s3 }
 0x368   : > { %1618 = vmatprep.mubr.f32.mxu1 %v4422_v20  ;;  %3183 = vmatprep.mubr.msk.f32.mxu0 %vm4423_vm0, %v4422_v20  ;;  %v1732_v1 = vld [vmem:[%s1731_s12] sm:$0xff] }
 0x36a   : > { %3597 = vmatpush1.bf16.msra.mxu1 %v4904_v18  ;;  %3627 = vmatpush3.bf16.msra.mxu0 %v5012_v30 }
 0x36b   : > { %3599 = vmatprep.subr.bf16.mxu1 %v4909_v21  ;;  %3628 = vmatprep.subr.bf16.mxu0 %v4421_v15 }
 0x36e   : > { %3601 = vmatpush1.bf16.msra.mxu1 %v4925_v33  ;;  %3630 = vmatpush3.bf16.msra.mxu0 %v5027_v38 }
 0x36f   : > { %3603 = vmatprep.subr.bf16.mxu1 %v4930_v36  ;;  %3631 = vmatprep.subr.bf16.mxu0 %v4421_v15 }
 0x372   : > { %3605 = vmatpush1.bf16.msra.mxu1 %v4944_v47  ;;  %3633 = vmatpush3.bf16.msra.mxu0 %v5041_v41 }
 0x373   : > { %3607 = vmatprep.subr.bf16.mxu1 %v4949_v50  ;;  %3634 = vmatprep.subr.bf16.mxu0 %v4421_v15 }
 0x376   : > { %3609 = vmatpush1.bf16.msra.mxu1 %v4961_v59  ;;  %3636 = vmatpush3.bf16.msra.mxu0 %v5052_v35 }
 0x377   : > { %3611 = vmatprep.subr.bf16.mxu1 %v4966_v62  ;;  %3637 = vmatprep.subr.bf16.mxu0 %v4421_v15 }
 0x37a   : > { %3613 = vmatpush1.bf16.msra.mxu1 %v4982_v11  ;;  %3639 = vmatpush3.bf16.msra.mxu0 %v5063_v45 }
 0x37b   : > { %3615 = vmatprep.subr.bf16.mxu1 %v4984_v12  ;;  %3640 = vmatprep.subr.bf16.mxu0 %v4421_v15 }
 0x37e   : > { %3617 = vmatpush1.bf16.msra.mxu1 %v5004_v27  ;;  %3642 = vmatpush3.bf16.msra.mxu0 %v5073_v49 }
 0x37f   : > { %3619 = vmatprep.subr.bf16.mxu1 %v5008_v28  ;;  %3643 = vmatprep.subr.bf16.mxu0 %v4421_v15 }
 0x382   : > { %3621 = vmatpush1.bf16.msra.mxu1 %v5023_v37  ;;  %3645 = vmatpush3.bf16.msra.mxu0 %v5083_v53 }
 0x383   : > { %3647 = vmatprep.subr.bf16.mxu1 %v4872_v57  ;;  %3678 = vmatprep.subr.bf16.mxu0 %v4421_v15 }
 0x438   : > { %v1439_v42 = vpop.f32.mrb[20].mxu1  ;;  %v1510_v43 = vpop.f32.mrb[20].mxu0 }
 0x439   : > { %v1514_v44 = vadd.f32 %v1439_v42, %v1370_v60  ;;  %v1441_v55 = vpop.f32.mrb[21].mxu1  ;;  %v3150_v46 = vpop.f32.mrb[21].mxu0  ;;  %v1528_v14 = vadd.f32 %v5212_v3, %v1510_v43 }
 0x43a   : > { %v1521_v48 = vadd.f32 %v1441_v55, %v1371_v40 }
 0x43b   : > { %v2816_v51 = vmul.f32 -1.442695, %v1514_v44 }
 0x43c   : > { %v2817_v52 = vmul.f32 -1.442695, %v1521_v48 }
 0x43d   : > { %4019 = vpow2.f32 %v2816_v51 }
 0x43e   : > { %4021 = vpow2.f32 %v2817_v52 }
 0x447   : > { %v4020_v54 = vpop.eup %4019 }
 0x448   : > { %v1518_v58 = vadd.f32 1.0, %v4020_v54  ;;  %v4022_v61 = vpop.eup %4021 }
 0x449   : > { %v1525_v2 = vadd.f32 1.0, %v4022_v61  ;;  %v1553_v61 = vld [vmem:[%s1550_s0 + $0x10] sm:$0xff]  ;;  %s2093_s0 = scalar_lea.vmem [#allocation3], %s2852_s23  ;;  %s4424_s23 = smov [#allocation16]  }
 0x44a   : > { %4023 = vrcp.f32 %v1518_v58 }
 0x44b   : > { %4025 = vrcp.f32 %v1525_v2 }
 0x454   : > { %v4024_v22 = vpop.eup %4023 }
 0x455   : > { %v1529_v0 = vmul.f32 %v4024_v22, %v1528_v14  ;;  %v4026_v29 = vpop.eup %4025 }
 0x456   : > { %v1532_v19 = vsub.f32 1.0, %v4026_v29  ;;  %v1534_v25 = vmul.f32 %v4026_v29, %v5268_v39 }
 0x457   : > { %v1530_v8 = vadd.f32 %v1529_v0, %v1372_v26 }
 0x459   : > { %4027 = vtanh.f32 %v1530_v8 }
 0x463   : > { %v4028_v6 = vpop.eup %4027 }
 0x464   : > { %v1533_v10 = vmul.f32 %v4028_v6, %v1532_v19 }
 0x466   : > { %v1535_v24 = vadd.f32 %v1534_v25, %v1533_v10 }
 0x468   : > { %v5319_v31 = vsel %vm5159_vm3, %v1535_v24, %v5268_v39  ;;  %v1540_v34 = vsel %vm5159_vm3, %v1535_v24, 0.0 }
 0x469   : > { %1542 = vst [vmem:[%s1541_s20] sm:$0xff] %v1540_v34  ;;  %1619 = vmatmul.mubr.f32.vlgmr.msra.gmra.mrb[22].mxu1 %v5319_v31  ;;  %3184 = vmatmul.mubr.f32.vlgmr.msra.gmra.mrb[22].mxu0 %v5319_v31  ;;  %s1912_s20 = scalar_lea.vmem [#allocation3], %s2851_s17 }
 0x46a   : > { %3649 = vmatpush1.bf16.msra.mxu1 %v4884_v4  ;;  %3680 = vmatpush3.bf16.msra.mxu0 %v4989_v16  ;;  %v1913_v5 = vld [vmem:[%s1912_s20] sm:$0xff] }
 0x46b   : > { %3651 = vmatprep.subr.bf16.mxu1 %v4889_v7  ;;  %3681 = vmatprep.subr.bf16.mxu0 %v4421_v15 }
 0x46c   : > { %1799 = vmatprep.mubr.f32.mxu1 %v4422_v20  ;;  %3218 = vmatprep.mubr.msk.f32.mxu0 %vm4423_vm0, %v4422_v20 }
 0x46e   : > { %3653 = vmatpush1.bf16.msra.mxu1 %v4904_v18  ;;  %3683 = vmatpush3.bf16.msra.mxu0 %v5012_v30 }
 0x46f   : > { %3655 = vmatprep.subr.bf16.mxu1 %v4909_v21  ;;  %3684 = vmatprep.subr.bf16.mxu0 %v4421_v15 }
 0x472   : > { %3657 = vmatpush1.bf16.msra.mxu1 %v4925_v33  ;;  %3686 = vmatpush3.bf16.msra.mxu0 %v5027_v38 }
 0x473   : > { %3659 = vmatprep.subr.bf16.mxu1 %v4930_v36  ;;  %3687 = vmatprep.subr.bf16.mxu0 %v4421_v15 }
 0x476   : > { %3661 = vmatpush1.bf16.msra.mxu1 %v4944_v47  ;;  %3689 = vmatpush3.bf16.msra.mxu0 %v5041_v41 }
 0x477   : > { %3663 = vmatprep.subr.bf16.mxu1 %v4949_v50  ;;  %3690 = vmatprep.subr.bf16.mxu0 %v4421_v15 }
 0x47a   : > { %3665 = vmatpush1.bf16.msra.mxu1 %v4961_v59  ;;  %3692 = vmatpush3.bf16.msra.mxu0 %v5052_v35 }
 0x47b   : > { %3667 = vmatprep.subr.bf16.mxu1 %v4966_v62  ;;  %3693 = vmatprep.subr.bf16.mxu0 %v4421_v15 }
 0x47e   : > { %3669 = vmatpush1.bf16.msra.mxu1 %v4982_v11  ;;  %3695 = vmatpush3.bf16.msra.mxu0 %v5063_v45 }
 0x47f   : > { %3671 = vmatprep.subr.bf16.mxu1 %v4984_v12  ;;  %3696 = vmatprep.subr.bf16.mxu0 %v4421_v15 }
 0x482   : > { %3673 = vmatpush1.bf16.msra.mxu1 %v5004_v27  ;;  %3698 = vmatpush3.bf16.msra.mxu0 %v5073_v49 }
 0x483   : > { %3675 = vmatprep.subr.bf16.mxu1 %v5008_v28  ;;  %3699 = vmatprep.subr.bf16.mxu0 %v4421_v15 }
 0x486   : > { %3677 = vmatpush1.bf16.msra.mxu1 %v5023_v37  ;;  %3701 = vmatpush3.bf16.msra.mxu0 %v5083_v53 }
 0x487   : > { %3703 = vmatprep.subr.bf16.mxu1 %v4872_v57  ;;  %3734 = vmatprep.subr.bf16.mxu0 %v4421_v15 }
 0x53c   : > { %v1620_v17 = vpop.f32.mrb[22].mxu1  ;;  %v1691_v23 = vpop.f32.mrb[22].mxu0 }
 0x53d   : > { %v1695_v39 = vadd.f32 %v1620_v17, %v1551_v63  ;;  %v1622_v60 = vpop.f32.mrb[23].mxu1  ;;  %v3185_v42 = vpop.f32.mrb[23].mxu0  ;;  %v1709_v52 = vadd.f32 %v5212_v3, %v1691_v23 }
 0x53e   : > { %v1702_v43 = vadd.f32 %v1622_v60, %v1552_v32 }
 0x53f   : > { %v2820_v44 = vmul.f32 -1.442695, %v1695_v39 }
 0x540   : > { %v2821_v40 = vmul.f32 -1.442695, %v1702_v43 }
 0x541   : > { %4029 = vpow2.f32 %v2820_v44 }
 0x542   : > { %4031 = vpow2.f32 %v2821_v40 }
 0x54b   : > { %v4030_v55 = vpop.eup %4029 }
 0x54c   : > { %v1699_v46 = vadd.f32 1.0, %v4030_v55  ;;  %v4032_v48 = vpop.eup %4031 }
 0x54d   : > { %v1706_v51 = vadd.f32 1.0, %v4032_v48 }
 0x54e   : > { %4033 = vrcp.f32 %v1699_v46  ;;  %v1734_v46 = vld [vmem:[%s1731_s12 + $0x10] sm:$0xff] }
 0x54f   : > { %4035 = vrcp.f32 %v1706_v51 }
 0x558   : > { %v4034_v54 = vpop.eup %4033 }
 0x559   : > { %v1710_v58 = vmul.f32 %v4034_v54, %v1709_v52  ;;  %v4036_v14 = vpop.eup %4035 }
 0x55a   : > { %v1713_v22 = vsub.f32 1.0, %v4036_v14  ;;  %v1715_v8 = vmul.f32 %v4036_v14, %v5319_v31 }
 0x55b   : > { %v1711_v2 = vadd.f32 %v1710_v58, %v1553_v61 }
 0x55d   : > { %4037 = vtanh.f32 %v1711_v2 }
 0x567   : > { %v4038_v0 = vpop.eup %4037 }
 0x568   : > { %v1714_v26 = vmul.f32 %v4038_v0, %v1713_v22 }
 0x56a   : > { %v1716_v29 = vadd.f32 %v1715_v8, %v1714_v26 }
 0x56c   : > { %v5370_v19 = vsel %vm5165_vm4, %v1716_v29, %v5319_v31  ;;  %v1721_v6 = vsel %vm5165_vm4, %v1716_v29, 0.0  ;;  %v1733_v31 = vld [vmem:[%s1731_s12 + $0x8] sm:$0xff]  ;;  %s2274_s12 = scalar_lea.vmem [#allocation3], %s2853_s15 }
 0x56d   : > { %1723 = vst [vmem:[%s1722_s18] sm:$0xff] %v1721_v6  ;;  %1800 = vmatmul.mubr.f32.vlgmr.msra.gmra.mrb[24].mxu1 %v5370_v19  ;;  %3219 = vmatmul.mubr.f32.vlgmr.msra.gmra.mrb[24].mxu0 %v5370_v19  ;;  %v1914_v29 = vld [vmem:[%s1912_s20 + $0x8] sm:$0xff]  ;;  %s2265_s18 = scalar_lea.vmem [#allocation4], %s2831_s16  ;;  %s2475_s16 = scalar_lea.sflag [#allocation17], %s4777_s24 }
 0x56e   : > { %3705 = vmatpush1.bf16.msra.mxu1 %v4884_v4  ;;  %3736 = vmatpush3.bf16.msra.mxu0 %v4989_v16 }
 0x56f   : > { %3707 = vmatprep.subr.bf16.mxu1 %v4889_v7  ;;  %3737 = vmatprep.subr.bf16.mxu0 %v4421_v15 }
 0x570   : > { %1980 = vmatprep.mubr.f32.mxu1 %v4422_v20  ;;  %3253 = vmatprep.mubr.msk.f32.mxu0 %vm4423_vm0, %v4422_v20 }
 0x572   : > { %3709 = vmatpush1.bf16.msra.mxu1 %v4904_v18  ;;  %3739 = vmatpush3.bf16.msra.mxu0 %v5012_v30 }
 0x573   : > { %3711 = vmatprep.subr.bf16.mxu1 %v4909_v21  ;;  %3740 = vmatprep.subr.bf16.mxu0 %v4421_v15 }
 0x576   : > { %3713 = vmatpush1.bf16.msra.mxu1 %v4925_v33  ;;  %3742 = vmatpush3.bf16.msra.mxu0 %v5027_v38 }
 0x577   : > { %3715 = vmatprep.subr.bf16.mxu1 %v4930_v36  ;;  %3743 = vmatprep.subr.bf16.mxu0 %v4421_v15 }
 0x57a   : > { %3717 = vmatpush1.bf16.msra.mxu1 %v4944_v47  ;;  %3745 = vmatpush3.bf16.msra.mxu0 %v5041_v41 }
 0x57b   : > { %3719 = vmatprep.subr.bf16.mxu1 %v4949_v50  ;;  %3746 = vmatprep.subr.bf16.mxu0 %v4421_v15 }
 0x57e   : > { %3721 = vmatpush1.bf16.msra.mxu1 %v4961_v59  ;;  %3748 = vmatpush3.bf16.msra.mxu0 %v5052_v35 }
 0x57f   : > { %3723 = vmatprep.subr.bf16.mxu1 %v4966_v62  ;;  %3749 = vmatprep.subr.bf16.mxu0 %v4421_v15 }
 0x582   : > { %3725 = vmatpush1.bf16.msra.mxu1 %v4982_v11  ;;  %3751 = vmatpush3.bf16.msra.mxu0 %v5063_v45 }
 0x583   : > { %3727 = vmatprep.subr.bf16.mxu1 %v4984_v12  ;;  %3752 = vmatprep.subr.bf16.mxu0 %v4421_v15 }
 0x586   : > { %3729 = vmatpush1.bf16.msra.mxu1 %v5004_v27  ;;  %3754 = vmatpush3.bf16.msra.mxu0 %v5073_v49 }
 0x587   : > { %3731 = vmatprep.subr.bf16.mxu1 %v5008_v28  ;;  %3755 = vmatprep.subr.bf16.mxu0 %v4421_v15 }
 0x58a   : > { %3733 = vmatpush1.bf16.msra.mxu1 %v5023_v37  ;;  %3757 = vmatpush3.bf16.msra.mxu0 %v5083_v53 }
 0x58b   : > { %3759 = vmatprep.subr.bf16.mxu1 %v4872_v57  ;;  %3790 = vmatprep.subr.bf16.mxu0 %v4421_v15 }
 0x640   : > { %v1801_v10 = vpop.f32.mrb[24].mxu1  ;;  %v1872_v25 = vpop.f32.mrb[24].mxu0 }
 0x641   : > { %v1876_v24 = vadd.f32 %v1801_v10, %v1732_v1  ;;  %v1803_v34 = vpop.f32.mrb[25].mxu1  ;;  %v3220_v63 = vpop.f32.mrb[25].mxu0  ;;  %v1890_v44 = vadd.f32 %v5212_v3, %v1872_v25 }
 0x642   : > { %v1883_v17 = vadd.f32 %v1803_v34, %v1733_v31 }
 0x643   : > { %v2825_v23 = vmul.f32 -1.442695, %v1876_v24 }
 0x644   : > { %v2826_v39 = vmul.f32 -1.442695, %v1883_v17 }
 0x645   : > { %4039 = vpow2.f32 %v2825_v23 }
 0x646   : > { %4041 = vpow2.f32 %v2826_v39  ;;  %v1915_v39 = vld [vmem:[%s1912_s20 + $0x10] sm:$0xff] }
 0x64f   : > { %v4040_v32 = vpop.eup %4039 }
 0x650   : > { %v1880_v60 = vadd.f32 1.0, %v4040_v32  ;;  %v4042_v42 = vpop.eup %4041 }
 0x651   : > { %v1887_v43 = vadd.f32 1.0, %v4042_v42 }
 0x652   : > { %4043 = vrcp.f32 %v1880_v60 }
 0x653   : > { %4045 = vrcp.f32 %v1887_v43 }
 0x65c   : > { %v4044_v40 = vpop.eup %4043 }
 0x65d   : > { %v1891_v55 = vmul.f32 %v4044_v40, %v1890_v44  ;;  %v4046_v51 = vpop.eup %4045 }
 0x65e   : > { %v1894_v52 = vsub.f32 1.0, %v4046_v51  ;;  %v1896_v61 = vmul.f32 %v4046_v51, %v5370_v19 }
 0x65f   : > { %v1892_v48 = vadd.f32 %v1891_v55, %v1734_v46 }
 0x661   : > { %4047 = vtanh.f32 %v1892_v48 }
 0x66b   : > { %v4048_v54 = vpop.eup %4047 }
 0x66c   : > { %v1895_v58 = vmul.f32 %v4048_v54, %v1894_v52  ;;  %v2275_v52 = vld [vmem:[%s2274_s12] sm:$0xff] }
 0x66e   : > { %v1897_v2 = vadd.f32 %v1896_v61, %v1895_v58 }
 0x670   : > { %v5421_v14 = vsel %vm5171_vm5, %v1897_v2, %v5370_v19  ;;  %v1902_v22 = vsel %vm5171_vm5, %v1897_v2, 0.0  ;;  %v2276_v2 = vld [vmem:[%s2274_s12 + $0x8] sm:$0xff] }
 0x671   : > { %1904 = vst [vmem:[%s1903_s2] sm:$0xff] %v1902_v22  ;;  %1981 = vmatmul.mubr.f32.vlgmr.msra.gmra.mrb[26].mxu1 %v5421_v14  ;;  %3254 = vmatmul.mubr.f32.vlgmr.msra.gmra.mrb[26].mxu0 %v5421_v14  ;;  %s551_s2 = scalar_lea.vmem [#allocation16], %s2800_s21  ;;  %s2446_s21 = scalar_lea.vmem [#allocation4], %s2835_s26 }
 0x672   : > { %3761 = vmatpush1.bf16.msra.mxu1 %v4884_v4  ;;  %3792 = vmatpush3.bf16.msra.mxu0 %v4989_v16  ;;  %s2509_s14 = sshll.u32 %s551_s2, 4  ;;  %s5540_s14 = int_to_ptr.vmem [resolvable:$true] %s2509_s14 }
 0x673   : > { %3763 = vmatprep.subr.bf16.mxu1 %v4889_v7  ;;  %3793 = vmatprep.subr.bf16.mxu0 %v4421_v15  ;;  %s4285_s11 = scalar_lea.vmem %s5540_s14, 128 }
 0x674   : > { %2161 = vmatprep.mubr.f32.mxu1 %v4422_v20  ;;  %3288 = vmatprep.mubr.msk.f32.mxu0 %vm4423_vm0, %v4422_v20  ;;  %p4286_p3 = scmp.ne.s32.totalorder %s5540_s14, %s4285_s11 }
 0x676   : > { %3765 = vmatpush1.bf16.msra.mxu1 %v4904_v18  ;;  %3795 = vmatpush3.bf16.msra.mxu0 %v5012_v30  ;;  %p4287_p0 = pnand %p4286_p3, %p5696_p6 }
 0x677   : > { %3767 = vmatprep.subr.bf16.mxu1 %v4909_v21  ;;  %3796 = vmatprep.subr.bf16.mxu0 %v4421_v15 }
 0x678   : > { %p4288_p10 = pneg %p4287_p0 }
 0x67a   : > { %3769 = vmatpush1.bf16.msra.mxu1 %v4925_v33  ;;  %3798 = vmatpush3.bf16.msra.mxu0 %v5027_v38 }
 0x67b   : > { %3771 = vmatprep.subr.bf16.mxu1 %v4930_v36  ;;  %3799 = vmatprep.subr.bf16.mxu0 %v4421_v15 }
 0x67e   : > { %3773 = vmatpush1.bf16.msra.mxu1 %v4944_v47  ;;  %3801 = vmatpush3.bf16.msra.mxu0 %v5041_v41 }
 0x67f   : > { %3775 = vmatprep.subr.bf16.mxu1 %v4949_v50  ;;  %3802 = vmatprep.subr.bf16.mxu0 %v4421_v15 }
 0x682   : > { %3777 = vmatpush1.bf16.msra.mxu1 %v4961_v59  ;;  %3804 = vmatpush3.bf16.msra.mxu0 %v5052_v35 }
 0x683   : > { %3779 = vmatprep.subr.bf16.mxu1 %v4966_v62  ;;  %3805 = vmatprep.subr.bf16.mxu0 %v4421_v15 }
 0x686   : > { %3781 = vmatpush1.bf16.msra.mxu1 %v4982_v11  ;;  %3807 = vmatpush3.bf16.msra.mxu0 %v5063_v45 }
 0x687   : > { %3783 = vmatprep.subr.bf16.mxu1 %v4984_v12  ;;  %3808 = vmatprep.subr.bf16.mxu0 %v4421_v15 }
 0x68a   : > { %3785 = vmatpush1.bf16.msra.mxu1 %v5004_v27  ;;  %3810 = vmatpush3.bf16.msra.mxu0 %v5073_v49 }
 0x68b   : > { %3787 = vmatprep.subr.bf16.mxu1 %v5008_v28  ;;  %3811 = vmatprep.subr.bf16.mxu0 %v4421_v15 }
 0x68e   : > { %3789 = vmatpush1.bf16.msra.mxu1 %v5023_v37  ;;  %3813 = vmatpush3.bf16.msra.mxu0 %v5083_v53 }
 0x68f   : > { %3815 = vmatprep.subr.bf16.mxu1 %v4872_v57  ;;  %3846 = vmatprep.subr.bf16.mxu0 %v4421_v15 }
 0x744   : > { %v1982_v0 = vpop.f32.mrb[26].mxu1  ;;  %v2053_v26 = vpop.f32.mrb[26].mxu0 }
 0x745   : > { %v2057_v8 = vadd.f32 %v1982_v0, %v1913_v5  ;;  %v1984_v19 = vpop.f32.mrb[27].mxu1  ;;  %v3255_v6 = vpop.f32.mrb[27].mxu0  ;;  %v2071_v63 = vadd.f32 %v5212_v3, %v2053_v26 }
 0x746   : > { %v2064_v1 = vadd.f32 %v1984_v19, %v1914_v29 }
 0x747   : > { %v2829_v10 = vmul.f32 -1.442695, %v2057_v8 }
 0x748   : > { %v2830_v25 = vmul.f32 -1.442695, %v2064_v1 }
 0x749   : > { %4049 = vpow2.f32 %v2829_v10 }
 0x74a   : > { %4051 = vpow2.f32 %v2830_v25  ;;  %v2277_v25 = vld [vmem:[%s2274_s12 + $0x10] sm:$0xff] }
 0x753   : > { %v4050_v57 = vpop.eup %4049 }
 0x754   : > { %v2061_v24 = vadd.f32 1.0, %v4050_v57  ;;  %v4052_v31 = vpop.eup %4051 }
 0x755   : > { %v2068_v34 = vadd.f32 1.0, %v4052_v31 }
 0x756   : > { %4053 = vrcp.f32 %v2061_v24 }
 0x757   : > { %4055 = vrcp.f32 %v2068_v34 }
 0x760   : > { %v4054_v17 = vpop.eup %4053 }
 0x761   : > { %v2072_v23 = vmul.f32 %v4054_v17, %v2071_v63  ;;  %v4056_v60 = vpop.eup %4055 }
 0x762   : > { %v2075_v42 = vsub.f32 1.0, %v4056_v60  ;;  %v2077_v40 = vmul.f32 %v4056_v60, %v5421_v14 }
 0x763   : > { %v2073_v32 = vadd.f32 %v2072_v23, %v1915_v39 }
 0x765   : > { %4057 = vtanh.f32 %v2073_v32 }
 0x76f   : > { %v4058_v43 = vpop.eup %4057 }
 0x770   : > { %v2076_v44 = vmul.f32 %v4058_v43, %v2075_v42 }
 0x772   : > { %v2078_v55 = vadd.f32 %v2077_v40, %v2076_v44 }
 0x774   : > { %v5472_v46 = vsel %vm5177_vm6, %v2078_v55, %v5421_v14  ;;  %v2083_v48 = vsel %vm5177_vm6, %v2078_v55, 0.0 }
 0x775   : > { %2085 = vst [vmem:[%s2084_s25] sm:$0xff] %v2083_v48  ;;  %2162 = vmatmul.mubr.f32.vlgmr.msra.gmra.mrb[28].mxu1 %v5472_v46  ;;  %3289 = vmatmul.mubr.f32.vlgmr.msra.gmra.mrb[28].mxu0 %v5472_v46  ;;  %s5538_s25 = scalar_lea.hbm %s5636_s8, %s2842_s7 }
 0x776   : > { %3817 = vmatpush1.bf16.msra.mxu1 %v4884_v4  ;;  %3848 = vmatpush3.bf16.msra.mxu0 %v4989_v16  ;;  %v2094_v4 = vld [vmem:[%s2093_s0] sm:$0xff] }
 0x777   : > { %3819 = vmatprep.subr.bf16.mxu1 %v4889_v7  ;;  %3849 = vmatprep.subr.bf16.mxu0 %v4421_v15 }
 0x778   : > { %2342 = vmatprep.mubr.f32.mxu1 %v4422_v20  ;;  %3323 = vmatprep.mubr.msk.f32.mxu0 %vm4423_vm0, %v4422_v20 }
 0x77a   : > { %3821 = vmatpush1.bf16.msra.mxu1 %v4904_v18  ;;  %3851 = vmatpush3.bf16.msra.mxu0 %v5012_v30 }
 0x77b   : > { %3823 = vmatprep.subr.bf16.mxu1 %v4909_v21  ;;  %3852 = vmatprep.subr.bf16.mxu0 %v4421_v15 }
 0x77e   : > { %3825 = vmatpush1.bf16.msra.mxu1 %v4925_v33  ;;  %3854 = vmatpush3.bf16.msra.mxu0 %v5027_v38  ;;  %v2095_v33 = vld [vmem:[%s2093_s0 + $0x8] sm:$0xff] }
 0x77f   : > { %3827 = vmatprep.subr.bf16.mxu1 %v4930_v36  ;;  %3855 = vmatprep.subr.bf16.mxu0 %v4421_v15 }
 0x782   : > { %3829 = vmatpush1.bf16.msra.mxu1 %v4944_v47  ;;  %3857 = vmatpush3.bf16.msra.mxu0 %v5041_v41 }
 0x783   : > { %3831 = vmatprep.subr.bf16.mxu1 %v4949_v50  ;;  %3858 = vmatprep.subr.bf16.mxu0 %v4421_v15 }
 0x786   : > { %3833 = vmatpush1.bf16.msra.mxu1 %v4961_v59  ;;  %3860 = vmatpush3.bf16.msra.mxu0 %v5052_v35 }
 0x787   : > { %3835 = vmatprep.subr.bf16.mxu1 %v4966_v62  ;;  %3861 = vmatprep.subr.bf16.mxu0 %v4421_v15 }
 0x78a   : > { %3837 = vmatpush1.bf16.msra.mxu1 %v4982_v11  ;;  %3863 = vmatpush3.bf16.msra.mxu0 %v5063_v45 }
 0x78b   : > { %3839 = vmatprep.subr.bf16.mxu1 %v4984_v12  ;;  %3864 = vmatprep.subr.bf16.mxu0 %v4421_v15 }
 0x78e   : > { %3841 = vmatpush1.bf16.msra.mxu1 %v5004_v27  ;;  %3866 = vmatpush3.bf16.msra.mxu0 %v5073_v49 }
 0x78f   : > { %3843 = vmatprep.subr.bf16.mxu1 %v5008_v28  ;;  %3867 = vmatprep.subr.bf16.mxu0 %v4421_v15 }
 0x792   : > { %3845 = vmatpush1.bf16.msra.mxu1 %v5023_v37  ;;  %3869 = vmatpush3.bf16.msra.mxu0 %v5083_v53  ;;  %v2096_v37 = vld [vmem:[%s2093_s0 + $0x10] sm:$0xff]  ;;  %s4289_s0 = sshll.u32 %s4424_s23, 4  ;;  %s4290_s0 = int_to_ptr.vmem [resolvable:$false] %s4289_s0 }
 0x793   : > { %p4292_p9 = scmp.lt.s32.totalorder %s5540_s14, %s4290_s0 }
 0x848   : > { %v2163_v7 = vpop.f32.mrb[28].mxu1  ;;  %v2234_v18 = vpop.f32.mrb[28].mxu0 }
 0x849   : > { %v2238_v21 = vadd.f32 %v2163_v7, %v2094_v4  ;;  %v2165_v36 = vpop.f32.mrb[29].mxu1  ;;  %v3290_v47 = vpop.f32.mrb[29].mxu0  ;;  %v2252_v27 = vadd.f32 %v5212_v3, %v2234_v18 }
 0x84a   : > { %v2245_v50 = vadd.f32 %v2165_v36, %v2095_v33 }
 0x84b   : > { %v2833_v59 = vmul.f32 -1.442695, %v2238_v21 }
 0x84c   : > { %v2834_v62 = vmul.f32 -1.442695, %v2245_v50 }
 0x84d   : > { %4059 = vpow2.f32 %v2833_v59 }
 0x84e   : > { %4061 = vpow2.f32 %v2834_v62 }
 0x857   : > { %v4060_v11 = vpop.eup %4059 }
 0x858   : > { %v2242_v12 = vadd.f32 1.0, %v4060_v11  ;;  %v4062_v15 = vpop.eup %4061 }
 0x859   : > { %v2249_v16 = vadd.f32 1.0, %v4062_v15 }
 0x85a   : > { %4063 = vrcp.f32 %v2242_v12 }
 0x85b   : > { %4065 = vrcp.f32 %v2249_v16 }
 0x864   : > { %v4064_v28 = vpop.eup %4063 }
 0x865   : > { %v2253_v30 = vmul.f32 %v4064_v28, %v2252_v27  ;;  %v4066_v20 = vpop.eup %4065 }
 0x866   : > { %v2256_v41 = vsub.f32 1.0, %v4066_v20  ;;  %v2258_v49 = vmul.f32 %v4066_v20, %v5472_v46 }
 0x867   : > { %v2254_v38 = vadd.f32 %v2253_v30, %v2096_v37 }
 0x869   : > { %4067 = vtanh.f32 %v2254_v38 }
 0x873   : > { %v4068_v35 = vpop.eup %4067 }
 0x874   : > { %v2257_v45 = vmul.f32 %v4068_v35, %v2256_v41 }
 0x876   : > { %v2259_v53 = vadd.f32 %v2258_v49, %v2257_v45 }
 0x878   : > { %v2263_v9 = vsel %vm5183_vm7, %v2259_v53, %v5472_v46  ;;  %v2264_v51 = vsel %vm5183_vm7, %v2259_v53, 0.0 }
 0x879   : > { %2266 = vst [vmem:[%s2265_s18] sm:$0xff] %v2264_v51  ;;  %2343 = vmatmul.mubr.f32.vlgmr.msra.gmra.mrb[30].mxu1 %v2263_v9  ;;  %3324 = vmatmul.mubr.f32.vlgmr.msra.gmra.mrb[30].mxu0 %v2263_v9  ;;  %s4291_s18 = scalar_lea.vmem %s4290_s0, 256 }
 0x87a   : > { %p4293_p12 = scmp.lt.s32.totalorder %s4291_s18, %s4285_s11 }
 0x87c   : > { %p4294_p4 = por %p4293_p12, %p4292_p9 }
 0x87e   : > { %p4295_p13 = pnand %p4294_p4, %p4288_p10 }
 0x94c   : > { %v2344_v54 = vpop.f32.mrb[30].mxu1  ;;  %v2415_v58 = vpop.f32.mrb[30].mxu0 }
 0x94d   : > { %v2419_v61 = vadd.f32 %v2344_v54, %v2275_v52  ;;  %v2346_v14 = vpop.f32.mrb[31].mxu1  ;;  %v3325_v22 = vpop.f32.mrb[31].mxu0  ;;  %v2433_v6 = vadd.f32 %v5212_v3, %v2415_v58 }
 0x94e   : > { %v2426_v5 = vadd.f32 %v2346_v14, %v2276_v2 }
 0x94f   : > { %v2837_v13 = vmul.f32 -1.442695, %v2419_v61 }
 0x950   : > { %v2838_v0 = vmul.f32 -1.442695, %v2426_v5 }
 0x951   : > { %4069 = vpow2.f32 %v2837_v13 }
 0x952   : > { %4071 = vpow2.f32 %v2838_v0 }
 0x95b   : > { %v4070_v26 = vpop.eup %4069 }
 0x95c   : > { %v2423_v8 = vadd.f32 1.0, %v4070_v26  ;;  %v4072_v29 = vpop.eup %4071 }
 0x95d   : > { %v2430_v19 = vadd.f32 1.0, %v4072_v29 }
 0x95e   : > { %4073 = vrcp.f32 %v2423_v8 }
 0x95f   : > { %4075 = vrcp.f32 %v2430_v19 }
 0x968   : > { %v4074_v1 = vpop.eup %4073 }
 0x969   : > { %v2434_v10 = vmul.f32 %v4074_v1, %v2433_v6  ;;  %v4076_v24 = vpop.eup %4075 }
 0x96a   : > { %v2437_v31 = vsub.f32 1.0, %v4076_v24  ;;  %v2439_v17 = vmul.f32 %v4076_v24, %v2263_v9 }
 0x96b   : > { %v2435_v57 = vadd.f32 %v2434_v10, %v2277_v25 }
 0x96d   : > { %4077 = vtanh.f32 %v2435_v57 }
 0x977   : > { %v4078_v34 = vpop.eup %4077 }
 0x978   : > { %v2438_v63 = vmul.f32 %v4078_v34, %v2437_v31 }
 0x97a   : > { %v2440_v3 = vadd.f32 %v2439_v17, %v2438_v63 }
 0x97c   : > { %v2445_v23 = vsel %vm5144_vm1, %v2440_v3, 0.0  ;;  %v2444_v39 = vsel %vm5144_vm1, %v2440_v3, %v2263_v9 }
 0x97d   : > { %2447 = vst [vmem:[%s2446_s21] sm:$0xff] %v2445_v23  ;;  %2468 = vst [vmem:[%s551_s2] sm:$0xff] %v2444_v39 }
 0x97e   : > { %4298 = shalt.err (!%p4295_p13)
}
 0x97f   : > { %s4299_s19 = scalar_lea.hbm %s5538_s25, 128  ;;  %s4303_s15 = scalar_lea.hbm %s5636_s8, 256 }
 0x980   : > { %p4300_p7 = scmp.ne.s32.totalorder %s5538_s25, %s4299_s19  ;;  %p4304_p5 = scmp.lt.u32.totalorder %s5538_s25, %s5636_s8 }
 0x981   : > { %p4305_p11 = scmp.lt.u32.totalorder %s4303_s15, %s4299_s19  ;;  %p4307_p3 = scmp.lt.u32.totalorder %s4299_s19, %s5538_s25 }
 0x982   : > { %p4301_p1 = pnand %p4300_p7, %p5696_p6 }
 0x983   : > { %p4306_p8 = por %p4305_p11, %p4304_p5 }
 0x984   : > { %p4302_p2 = pneg %p4301_p1 }
 0x985   : > { %p4308_p0 = por %p4307_p3, %p4306_p8 }
 0x987   : > { %p4309_p10 = pnand %p4308_p0, %p4302_p2 }
 0x989   : > { %4312 = shalt.err (!%p4309_p10)
}
 0x98a   : > { %3898 = dma.vmem_to_hbm [thread:$0]  (%p5696_p6), %s5540_s14, 128, %s5538_s25, %s2475_s16   ;;  %v2449_v56 = vld [vmem:[#allocation4] sm:$0xff]  ;;  %v2450_v32 = vld [vmem:[#allocation4 + $0x8] sm:$0xff]  ;;  %v2451_v60 = vld [vmem:[#allocation4 + $0x10] sm:$0xff] }
 0x98b   : > { %s544_s17 = scalar_lea.vmem [#allocation15], %s2801_s4  ;;  %s5697_s23 = sld [smem:[#allocation29_spill]]  ;;  %v2452_v42 = vld [vmem:[#allocation4 + $0x18] sm:$0xff]  ;;  %v2453_v43 = vld [vmem:[#allocation4 + $0x20] sm:$0xff]  ;;  %v2454_v44 = vld [vmem:[#allocation4 + $0x28] sm:$0xff] }
 0x98c   : > { %s2493_s20 = sshll.u32 %s544_s17, 4  ;;  %2457 = vst [vmem:[%s544_s17] sm:$0xff] %v2449_v56  ;;  %2458 = vst [vmem:[%s544_s17 + $0x8] sm:$0xff] %v2450_v32  ;;  %v2455_v40 = vld [vmem:[#allocation4 + $0x30] sm:$0xff]  ;;  %v2456_v55 = vld [vmem:[#allocation4 + $0x38] sm:$0xff]  ;;  %s2470_s30 = scalar_lea.sflag [#allocation7], %s4777_s24  ;;  %s5579_s20 = int_to_ptr.vmem [resolvable:$true] %s2493_s20 }
 0x98d   : > { %2459 = vst [vmem:[%s544_s17 + $0x10] sm:$0xff] %v2451_v60  ;;  %2460 = vst [vmem:[%s544_s17 + $0x18] sm:$0xff] %v2452_v42  ;;  %s4425_s14 = smov [#allocation15]  }
 0x98e   : > { %2461 = vst [vmem:[%s544_s17 + $0x20] sm:$0xff] %v2453_v43  ;;  %2462 = vst [vmem:[%s544_s17 + $0x28] sm:$0xff] %v2454_v44  ;;  %s4317_s4 = sshll.u32 %s4425_s14, 4  ;;  %s4318_s4 = int_to_ptr.vmem [resolvable:$false] %s4317_s4 }
 0x98f   : > { %2463 = vst [vmem:[%s544_s17 + $0x30] sm:$0xff] %v2455_v40  ;;  %2464 = vst [vmem:[%s544_s17 + $0x38] sm:$0xff] %v2456_v55  ;;  %s4319_s25 = scalar_lea.vmem %s4318_s4, 2048  ;;  %p4320_p13 = scmp.lt.s32.totalorder %s5579_s20, %s4318_s4 }
 0x991   : > { %s5577_s0 = scalar_lea.hbm %s5697_s23, %s2842_s7  ;;  %s4313_s7 = scalar_lea.vmem %s5579_s20, 1024 }
 0x992   : > { %p4314_p9 = scmp.ne.s32.totalorder %s5579_s20, %s4313_s7  ;;  %p4321_p7 = scmp.lt.s32.totalorder %s4319_s25, %s4313_s7 }
 0x994   : > { %p4315_p12 = pnand %p4314_p9, %p5696_p6  ;;  %p4322_p1 = por %p4321_p7, %p4320_p13 }
 0x996   : > { %p4316_p4 = pneg %p4315_p12 }
 0x998   : > { %p4323_p2 = pnand %p4322_p1, %p4316_p4 }
 0x99a   : > { %4326 = shalt.err (!%p4323_p2)
}
 0x99b   : > { %s4327_s16 = scalar_lea.hbm %s5577_s0, 1024  ;;  %s4331_s26 = scalar_lea.hbm %s5697_s23, 2048 }
 0x99c   : > { %p4328_p5 = scmp.ne.s32.totalorder %s5577_s0, %s4327_s16  ;;  %p4332_p3 = scmp.lt.u32.totalorder %s5577_s0, %s5697_s23 }
 0x99d   : > { %p4333_p0 = scmp.lt.u32.totalorder %s4331_s26, %s4327_s16  ;;  %p4335_p9 = scmp.lt.u32.totalorder %s4327_s16, %s5577_s0 }
 0x99e   : > { %p4329_p11 = pnand %p4328_p5, %p5696_p6 }
 0x99f   : > { %p4334_p10 = por %p4333_p0, %p4332_p3 }
 0x9a0   : > { %p4330_p8 = pneg %p4329_p11 }
 0x9a1   : > { %p4336_p12 = por %p4335_p9, %p4334_p10 }
 0x9a3   : > { %p4337_p4 = pnand %p4336_p12, %p4330_p8 }
 0x9a5   : > { %4340 = shalt.err (!%p4337_p4)
}
 0x9a6   : > { %s4426_s12 = smov 128   ;;  %s4427_s2 = smov 256  }
 0x9a7   : > { %s4428_s17 = smov 8  }
 0x9a8   : > { %3897 = dma.vmem_to_hbm [thread:$0]  (%p5696_p6), %s5579_s20, 1024, %s5577_s0, %s2470_s30, %s4426_s12, %s4427_s2, %s4428_s17  }
 0x9a9 PF: > { %s2521_s21 = sand.u32 1, %s4387_s27   ;;  %p5698_p13 = scmp.ne.s32.totalorder %s5671_s13, 0 }
 0x9aa   : > { %p5699_p7 = scmp.ge.s32.totalorder %s4407_s10, 2  ;;  %s2522_s11 = scalar_lea.sflag [#allocation7], %s2521_s21 }
 0x9ac   : > { %p3925_p1 = pnand %p5699_p7, %p5698_p13 }
 0x9ae   : > { %4378 = dma.done.wait (!%p3925_p1), %s2522_s11, 1024  }
 0x9af   : > { %4380 = vsyncadd (!%p3925_p1), %s2522_s11, 4294966272  ;;  %s2531_s7 = scalar_lea.sflag [#allocation17], %s2521_s21 }
 0x9b0   : > { %4382 = dma.done.wait (!%p3925_p1), %s2531_s7, 128  }
 0x9b1   : > { %4384 = vsyncadd (!%p3925_p1), %s2531_s7, 4294967168  ;;  %s29_s10 = sadd.s32 1, %s4407_s10   ;;  %s5700_s22 = sld [smem:[#allocation24_spill]] }
 0x9b2   : > { %p26_p2 = scmp.ge.s32.totalorder %s29_s10, 4   ;;  %s5701_s24 = sld [smem:[#allocation23_spill]] }
 0x9b3   : > { %s5702_s27 = smov %s4391_s28  ;;  %s5703_s28 = smov %s4395_s29 }
 0x9b4   : > { %s5705_s30 = smov %s4403_s9  ;;  %28 = sbr.rel (!%p26_p2) target bundleno = 15 (0xf), region = 193 }
 0x9b7   : > { %s5704_s29 = smov %s5700_s22 }
 0x9b8   : > { %s5706_s9 = smov %s5701_s24 }
 0x9bb   :  { %2536 = vsyncpa [#allocation6], 1 }
 0x9bc   :  { %2538 = vsyncpa [#allocation6 + $0x1], 1 }
 0x9bd   :  { %2539 = vsyncpa [#allocation9], 1 }
 0x9be   :  { %2540 = vsyncpa [#allocation7], 1 }
 0x9bf   :  { %2542 = vsyncpa [#allocation7 + $0x1], 1 }
 0x9c0   :  { %2543 = vsyncpa [#allocation17], 1 }
 0x9c1   :  { %2545 = vsyncpa [#allocation17 + $0x1], 1 }

</bundles_post_ra>
